<compile_context>
chip_gen: v7x
topology: tpu7x:2x2x1
jax: 0.10.0
libtpu: 0.0.40
codegen_flags: <defaults>
</compile_context>

<pallas_src>
import jax
import jax.numpy as jnp
from jax.experimental import pallas as pl
from jax.experimental.pallas import tpu as pltpu

EPS = 1e-5  # nn.BatchNorm2d default eps


def _conv_stats_kernel(x_ref, w_ref, conv_ref, stats_ref):
    """3x3 valid conv (im2col, single MXU dot) + per-batch BN partial stats.

    x_ref:     (1, H, W, Cin)     one batch element, NHWC, f32
    w_ref:     (9*Cin, Cout)      HWIO weight flattened (ky, kx, cin)-major, bf16
    conv_ref:  (1, Cout, Ho*Wo)   lane-dense conv output slab, f32
    stats_ref: (1, 2, Cout)       per-batch per-channel [sum, sum-of-squares]
    """
    _, H, W, Cin = x_ref.shape
    _, Cout, _ = conv_ref.shape
    Ho, Wo = H - 2, W - 2

    # im2col patch (Ho*Wo, 9*Cin); tap order (ky, kx, cin) matches w_ref rows.
    taps = []
    for ky in range(3):
        for kx in range(3):
            taps.append(
                x_ref[0, ky:ky + Ho, kx:kx + Wo, :]
                .reshape(Ho * Wo, Cin).astype(jnp.bfloat16))
    patch = jnp.concatenate(taps, axis=1)                      # (Ho*Wo, 9*Cin)

    # Single MXU pass, K = 9*Cin, bf16 operands, f32 accumulation.
    acc = jnp.dot(patch, w_ref[...],
                  preferred_element_type=jnp.float32)          # (Ho*Wo, Cout)

    # Per-batch partial BatchNorm statistics (combined globally in wrapper).
    ssum = jnp.sum(acc, axis=0, keepdims=True)                 # (1, Cout)
    ssq = jnp.sum(acc * acc, axis=0, keepdims=True)            # (1, Cout)
    stats_ref[0] = jnp.concatenate([ssum, ssq], axis=0)        # (2, Cout)

    # Lane-dense store: channels in sublanes, Ho*Wo in lanes.
    conv_ref[0] = acc.T


def _bn_relu_kernel(conv_ref, scale_ref, shift_ref, o_ref):
    """Fused folded-BN affine (scale/shift) + ReLU on lane-dense slabs.

    conv_ref: (1, Cout, Ho*Wo)   scale_ref/shift_ref: (Cout, 1)
    o_ref:    (1, Cout, Ho*Wo)
    """
    y = conv_ref[0] * scale_ref[...] + shift_ref[...]
    o_ref[0] = jnp.maximum(y, 0.0).astype(o_ref.dtype)


def mnp_aggregate(s_nchw, t_nchw, w_oihw, bias, gamma, beta):
    """Matches MNPAggregate.forward: conv(cat([s, t], dim=1)) -> BN -> ReLU."""
    # Conv bias cancels exactly under training-mode BatchNorm (mean shifts by
    # the same per-channel constant), so it is dropped from the fused op.
    del bias

    x = jnp.concatenate([s_nchw, t_nchw], axis=1)       # (N, 2C, H, W)
    x = jnp.transpose(x, (0, 2, 3, 1))                  # NCHW -> NHWC
    w = jnp.transpose(w_oihw, (2, 3, 1, 0))             # OIHW -> HWIO
    N, H, W_, Cin = x.shape
    Cout = w.shape[-1]
    Ho, Wo = H - 2, W_ - 2                              # valid conv, stride 1
    # Flatten weight to (9*Cin, Cout) with (ky, kx, cin)-major rows; bf16 for
    # the MXU operands (accumulation stays f32 inside the kernel).
    w2d = w.reshape(9 * Cin, Cout).astype(jnp.bfloat16)

    # -------- Pass 1: conv + per-batch partial BN statistics --------
    conv_t, stats = pl.pallas_call(
        _conv_stats_kernel,
        out_shape=(
            jax.ShapeDtypeStruct((N, Cout, Ho * Wo), jnp.float32),
            jax.ShapeDtypeStruct((N, 2, Cout), jnp.float32),
        ),
        grid=(N,),
        in_specs=[
            pl.BlockSpec((1, H, W_, Cin), lambda i: (i, 0, 0, 0)),
            pl.BlockSpec((9 * Cin, Cout), lambda i: (0, 0)),
        ],
        out_specs=(
            pl.BlockSpec((1, Cout, Ho * Wo), lambda i: (i, 0, 0)),
            pl.BlockSpec((1, 2, Cout), lambda i: (i, 0, 0)),
        ),
        compiler_params=pltpu.CompilerParams(
            dimension_semantics=("parallel",)),
    )(x, w2d)

    # -------- Global BN statistics + affine folding (tiny (Cout,) math) -----
    count = N * Ho * Wo
    tot = jnp.sum(stats, axis=0)                        # (2, Cout)
    mean = tot[0] / count
    # Clamp: E[x^2] - E[x]^2 can go slightly negative from cancellation.
    var = jnp.maximum(tot[1] / count - mean * mean, 0.0)
    scale = gamma * jax.lax.rsqrt(var + EPS)            # a
    shift = beta - mean * scale                         # b

    # -------- Pass 2: y = max(conv * a + b, 0) --------
    out_t = pl.pallas_call(
        _bn_relu_kernel,
        out_shape=jax.ShapeDtypeStruct((N, Cout, Ho * Wo), jnp.float32),
        grid=(N,),
        in_specs=[
            pl.BlockSpec((1, Cout, Ho * Wo), lambda i: (i, 0, 0)),
            pl.BlockSpec((Cout, 1), lambda i: (0, 0)),
            pl.BlockSpec((Cout, 1), lambda i: (0, 0)),
        ],
        out_specs=pl.BlockSpec((1, Cout, Ho * Wo), lambda i: (i, 0, 0)),
        compiler_params=pltpu.CompilerParams(
            dimension_semantics=("parallel",)),
    )(conv_t, scale.reshape(Cout, 1), shift.reshape(Cout, 1))

    # Slab is already NCHW-ordered; reshape is free (contiguous).
    return out_t.reshape(N, Cout, Ho, Wo)


def _reference(s, t, w, b, gamma, beta):
    """Pure-JAX reference mirroring the PyTorch forward (training-mode BN)."""
    x = jnp.concatenate([s, t], axis=1)
    conv = jax.lax.conv_general_dilated(
        x, w, window_strides=(1, 1), padding="VALID",
        dimension_numbers=("NCHW", "OIHW", "NCHW"))
    conv = conv + b.reshape(1, -1, 1, 1)
    mean = jnp.mean(conv, axis=(0, 2, 3), keepdims=True)
    var = jnp.mean((conv - mean) ** 2, axis=(0, 2, 3), keepdims=True)
    out = (conv - mean) / jnp.sqrt(var + EPS)
    out = out * gamma.reshape(1, -1, 1, 1) + beta.reshape(1, -1, 1, 1)
    return jnp.maximum(out, 0.0)


if __name__ == "__main__":
    key = jax.random.PRNGKey(0)
    ks, kt, kw, kb, kg, kbe = jax.random.split(key, 6)

    N, C, H, W = 2, 4, 16, 16                  # s/t features: (N, C, H, W)
    c_in, c_out = 2 * C, C

    s_feature = jax.random.normal(ks, (N, C, H, W), jnp.float32)
    t_feature = jax.random.normal(kt, (N, C, H, W), jnp.float32)

    # Deterministic synthetic parameters (shapes from MNPAggregate.__init__):
    # Conv2d(c_in, c_out, 3): weight (c_out, c_in, 3, 3), bias (c_out,)
    fan_in = c_in * 3 * 3
    bound = 1.0 / (fan_in ** 0.5)
    w_conv = jax.random.uniform(kw, (c_out, c_in, 3, 3), jnp.float32,
                                -bound, bound)
    b_conv = jax.random.uniform(kb, (c_out,), jnp.float32, -bound, bound)
    # BatchNorm2d(c_out) affine params (randomized to exercise the affine path)
    bn_gamma = 1.0 + 0.1 * jax.random.normal(kg, (c_out,), jnp.float32)
    bn_beta = 0.1 * jax.random.normal(kbe, (c_out,), jnp.float32)

    out = jax.block_until_ready(
        mnp_aggregate(s_feature, t_feature, w_conv, b_conv, bn_gamma, bn_beta))

    ref = _reference(s_feature, t_feature, w_conv, b_conv, bn_gamma, bn_beta)
    assert out.shape == (N, c_out, H - 2, W - 2), out.shape
    assert bool(jnp.all(jnp.isfinite(out)))
    # 2e-2 tolerance: MXU operands are bf16 (f32 accumulation), reference is f32.
    assert bool(jnp.allclose(out, ref, atol=2e-2, rtol=2e-2))

    print("KERNEL_OK")
</pallas_src>

<mosaic_0001>
module attributes {stable_mosaic.version = 11 : i64} {
  func.func @_conv_stats_kernel(%arg0: i32, %arg1: memref<1x16x16x8xf32, #tpu.memory_space<vmem>>, %arg2: memref<72x4xbf16, #tpu.memory_space<vmem>>, %arg3: memref<1x4x196xf32, #tpu.memory_space<vmem>>, %arg4: memref<1x2x4xf32, #tpu.memory_space<vmem>>) attributes {dimension_semantics = [#tpu.dimension_semantics<parallel>], iteration_bounds = array<i64: 2>, scalar_prefetch = 0 : i64, scratch_operands = 0 : i64, tpu.core_type = #tpu.core_type<tc>, window_params = [{transform_indices = @transform_0, window_bounds = array<i64: 1, 16, 16, 8>}, {pipeline_mode = #tpu.pipeline_mode<synchronous>, transform_indices = @transform_1, window_bounds = array<i64: 72, 4>}, {transform_indices = @transform_2, window_bounds = array<i64: 1, 4, 196>}, {transform_indices = @transform_3, window_bounds = array<i64: 1, 2, 4>}]} {
    %c0 = arith.constant 0 : index
    %c0_0 = arith.constant 0 : index
    %c0_1 = arith.constant 0 : index
    %c0_2 = arith.constant 0 : index
    %0 = vector.load %arg1[%c0, %c0_0, %c0_1, %c0_2] : memref<1x16x16x8xf32, #tpu.memory_space<vmem>>, vector<1x14x14x8xf32>
    %1 = vector.shape_cast %0 : vector<1x14x14x8xf32> to vector<14x14x8xf32>
    %2 = vector.shape_cast %1 : vector<14x14x8xf32> to vector<196x8xf32>
    %3 = arith.truncf %2 : vector<196x8xf32> to vector<196x8xbf16>
    %c0_3 = arith.constant 0 : index
    %c0_4 = arith.constant 0 : index
    %c1 = arith.constant 1 : index
    %c0_5 = arith.constant 0 : index
    %4 = vector.load %arg1[%c0_3, %c0_4, %c1, %c0_5] : memref<1x16x16x8xf32, #tpu.memory_space<vmem>>, vector<1x14x14x8xf32>
    %5 = vector.shape_cast %4 : vector<1x14x14x8xf32> to vector<14x14x8xf32>
    %6 = vector.shape_cast %5 : vector<14x14x8xf32> to vector<196x8xf32>
    %7 = arith.truncf %6 : vector<196x8xf32> to vector<196x8xbf16>
    %c0_6 = arith.constant 0 : index
    %c0_7 = arith.constant 0 : index
    %c2 = arith.constant 2 : index
    %c0_8 = arith.constant 0 : index
    %8 = vector.load %arg1[%c0_6, %c0_7, %c2, %c0_8] : memref<1x16x16x8xf32, #tpu.memory_space<vmem>>, vector<1x14x14x8xf32>
    %9 = vector.shape_cast %8 : vector<1x14x14x8xf32> to vector<14x14x8xf32>
    %10 = vector.shape_cast %9 : vector<14x14x8xf32> to vector<196x8xf32>
    %11 = arith.truncf %10 : vector<196x8xf32> to vector<196x8xbf16>
    %c0_9 = arith.constant 0 : index
    %c1_10 = arith.constant 1 : index
    %c0_11 = arith.constant 0 : index
    %c0_12 = arith.constant 0 : index
    %12 = vector.load %arg1[%c0_9, %c1_10, %c0_11, %c0_12] : memref<1x16x16x8xf32, #tpu.memory_space<vmem>>, vector<1x14x14x8xf32>
    %13 = vector.shape_cast %12 : vector<1x14x14x8xf32> to vector<14x14x8xf32>
    %14 = vector.shape_cast %13 : vector<14x14x8xf32> to vector<196x8xf32>
    %15 = arith.truncf %14 : vector<196x8xf32> to vector<196x8xbf16>
    %c0_13 = arith.constant 0 : index
    %c1_14 = arith.constant 1 : index
    %c1_15 = arith.constant 1 : index
    %c0_16 = arith.constant 0 : index
    %16 = vector.load %arg1[%c0_13, %c1_14, %c1_15, %c0_16] : memref<1x16x16x8xf32, #tpu.memory_space<vmem>>, vector<1x14x14x8xf32>
    %17 = vector.shape_cast %16 : vector<1x14x14x8xf32> to vector<14x14x8xf32>
    %18 = vector.shape_cast %17 : vector<14x14x8xf32> to vector<196x8xf32>
    %19 = arith.truncf %18 : vector<196x8xf32> to vector<196x8xbf16>
    %c0_17 = arith.constant 0 : index
    %c1_18 = arith.constant 1 : index
    %c2_19 = arith.constant 2 : index
    %c0_20 = arith.constant 0 : index
    %20 = vector.load %arg1[%c0_17, %c1_18, %c2_19, %c0_20] : memref<1x16x16x8xf32, #tpu.memory_space<vmem>>, vector<1x14x14x8xf32>
    %21 = vector.shape_cast %20 : vector<1x14x14x8xf32> to vector<14x14x8xf32>
    %22 = vector.shape_cast %21 : vector<14x14x8xf32> to vector<196x8xf32>
    %23 = arith.truncf %22 : vector<196x8xf32> to vector<196x8xbf16>
    %c0_21 = arith.constant 0 : index
    %c2_22 = arith.constant 2 : index
    %c0_23 = arith.constant 0 : index
    %c0_24 = arith.constant 0 : index
    %24 = vector.load %arg1[%c0_21, %c2_22, %c0_23, %c0_24] : memref<1x16x16x8xf32, #tpu.memory_space<vmem>>, vector<1x14x14x8xf32>
    %25 = vector.shape_cast %24 : vector<1x14x14x8xf32> to vector<14x14x8xf32>
    %26 = vector.shape_cast %25 : vector<14x14x8xf32> to vector<196x8xf32>
    %27 = arith.truncf %26 : vector<196x8xf32> to vector<196x8xbf16>
    %c0_25 = arith.constant 0 : index
    %c2_26 = arith.constant 2 : index
    %c1_27 = arith.constant 1 : index
    %c0_28 = arith.constant 0 : index
    %28 = vector.load %arg1[%c0_25, %c2_26, %c1_27, %c0_28] : memref<1x16x16x8xf32, #tpu.memory_space<vmem>>, vector<1x14x14x8xf32>
    %29 = vector.shape_cast %28 : vector<1x14x14x8xf32> to vector<14x14x8xf32>
    %30 = vector.shape_cast %29 : vector<14x14x8xf32> to vector<196x8xf32>
    %31 = arith.truncf %30 : vector<196x8xf32> to vector<196x8xbf16>
    %c0_29 = arith.constant 0 : index
    %c2_30 = arith.constant 2 : index
    %c2_31 = arith.constant 2 : index
    %c0_32 = arith.constant 0 : index
    %32 = vector.load %arg1[%c0_29, %c2_30, %c2_31, %c0_32] : memref<1x16x16x8xf32, #tpu.memory_space<vmem>>, vector<1x14x14x8xf32>
    %33 = vector.shape_cast %32 : vector<1x14x14x8xf32> to vector<14x14x8xf32>
    %34 = vector.shape_cast %33 : vector<14x14x8xf32> to vector<196x8xf32>
    %35 = arith.truncf %34 : vector<196x8xf32> to vector<196x8xbf16>
    %36 = tpu.concatenate %3, %7, %11, %15, %19, %23, %27, %31, %35 in 1 : vector<196x8xbf16>, vector<196x8xbf16>, vector<196x8xbf16>, vector<196x8xbf16>, vector<196x8xbf16>, vector<196x8xbf16>, vector<196x8xbf16>, vector<196x8xbf16>, vector<196x8xbf16> -> vector<196x72xbf16>
    %c0_33 = arith.constant 0 : index
    %c0_34 = arith.constant 0 : index
    %37 = vector.load %arg2[%c0_33, %c0_34] : memref<72x4xbf16, #tpu.memory_space<vmem>>, vector<72x4xbf16>
    %cst = arith.constant dense<0.000000e+00> : vector<196x4xf32>
    %38 = tpu.matmul %36, %37, %cst {dimension_numbers = #tpu.dot_dimension_numbers<[1], [0], [0], [1], [0, 0, 1, 1], [], []>} : vector<196x72xbf16>, vector<72x4xbf16>, vector<196x4xf32> -> vector<196x4xf32>
    %cst_35 = arith.constant dense<0.000000e+00> : vector<4xf32>
    %39 = vector.multi_reduction <add>, %38, %cst_35 [0] : vector<196x4xf32> to vector<4xf32>
    %40 = vector.shape_cast %39 : vector<4xf32> to vector<1x4xf32>
    %41 = arith.mulf %38, %38 : vector<196x4xf32>
    %cst_36 = arith.constant dense<0.000000e+00> : vector<4xf32>
    %42 = vector.multi_reduction <add>, %41, %cst_36 [0] : vector<196x4xf32> to vector<4xf32>
    %43 = vector.shape_cast %42 : vector<4xf32> to vector<1x4xf32>
    %44 = tpu.concatenate %40, %43 in 0 : vector<1x4xf32>, vector<1x4xf32> -> vector<2x4xf32>
    %c0_37 = arith.constant 0 : index
    %c0_38 = arith.constant 0 : index
    %c0_39 = arith.constant 0 : index
    %45 = vector.load %arg4[%c0_37, %c0_38, %c0_39] : memref<1x2x4xf32, #tpu.memory_space<vmem>>, vector<1x2x4xf32>
    %46 = vector.shape_cast %45 : vector<1x2x4xf32> to vector<2x4xf32>
    %47 = vector.shape_cast %44 : vector<2x4xf32> to vector<1x2x4xf32>
    tpu.vector_store %arg4[%c0_37, %c0_38, %c0_39], %47 {strides = array<i32>} : memref<1x2x4xf32, #tpu.memory_space<vmem>>, vector<1x2x4xf32>,
    %48 = tpu.transpose %38, [1, 0] : vector<196x4xf32> -> vector<4x196xf32>
    %c0_40 = arith.constant 0 : index
    %c0_41 = arith.constant 0 : index
    %c0_42 = arith.constant 0 : index
    %49 = vector.load %arg3[%c0_40, %c0_41, %c0_42] : memref<1x4x196xf32, #tpu.memory_space<vmem>>, vector<1x4x196xf32>
    %50 = vector.shape_cast %49 : vector<1x4x196xf32> to vector<4x196xf32>
    %51 = vector.shape_cast %48 : vector<4x196xf32> to vector<1x4x196xf32>
    tpu.vector_store %arg3[%c0_40, %c0_41, %c0_42], %51 {strides = array<i32>} : memref<1x4x196xf32, #tpu.memory_space<vmem>>, vector<1x4x196xf32>,
    return
  }
  func.func @transform_0(%arg0: i32) -> (i32, i32, i32, i32) {
    %c0_i32 = arith.constant 0 : i32
    %c0_i32_0 = arith.constant 0 : i32
    %c0_i32_1 = arith.constant 0 : i32
    %c0_i32_2 = arith.constant 0 : i32
    return %arg0, %c0_i32, %c0_i32_0, %c0_i32_1 : i32, i32, i32, i32
  }
  func.func @transform_1(%arg0: i32) -> (i32, i32) {
    %c0_i32 = arith.constant 0 : i32
    %c0_i32_0 = arith.constant 0 : i32
    %c0_i32_1 = arith.constant 0 : i32
    return %c0_i32, %c0_i32_0 : i32, i32
  }
  func.func @transform_2(%arg0: i32) -> (i32, i32, i32) {
    %c0_i32 = arith.constant 0 : i32
    %c0_i32_0 = arith.constant 0 : i32
    %c0_i32_1 = arith.constant 0 : i32
    return %arg0, %c0_i32, %c0_i32_0 : i32, i32, i32
  }
  func.func @transform_3(%arg0: i32) -> (i32, i32, i32) {
    %c0_i32 = arith.constant 0 : i32
    %c0_i32_0 = arith.constant 0 : i32
    %c0_i32_1 = arith.constant 0 : i32
    return %arg0, %c0_i32, %c0_i32_0 : i32, i32, i32
  }
}

</mosaic_0001>

<bundles_post_ra>
// kernel: tpu_custom_call.1
= control target key start
LH: loop header
LB: loop body
LE: loop exit
PB: predicated region body
PF: predicated region fallthrough
CT: control target
= control target key end

     0   :  { %9 = vsyncpa [#allocation3], 0  ;;  %s13637_s0 = inlined_call_operand.vmem [shape: f32[2,16,16,8], index: 0, kind: input, shape index: {}]   ;;  %s13638_s1 = inlined_call_operand.vmem [shape: bf16[72,4], index: 1, kind: input, shape index: {}]   ;;  %s13639_s2 = inlined_call_operand.hbm [shape: f32[2,4,196], index: 2, kind: output, shape index: {0}]   ;;  %s13640_s3 = inlined_call_operand.hbm [shape: f32[2,2,4], index: 3, kind: output, shape index: {1}]  }
   0x1   :  { %11 = vsyncpa [#allocation3 + $0x1], 0 }
   0x2   :  { %12 = vsyncpa [#allocation5], 0 }
   0x3   :  { %14 = vsyncpa [#allocation5 + $0x1], 0  ;;  %s10694_s12 = smov 0   ;;  %s10696_s13 = smov 0  }
   0x4   :  { %s10698_s14 = smov 0   ;;  %s10700_s15 = smov 0  }
   0x5 LB: > { %s10715_s16 = sadd.s32 4294967295, %s10659_s15   ;;  %s10011_s17 = sadd.s32 4294967294, %s10659_s15   ;;  %s10659_s15 = sphi %s10700_s15, %s13690_s15   ;;  %s10655_s14 = sphi %s10698_s14, %s13689_s14   ;;  %s10651_s13 = sphi %s10696_s13, %s13688_s13   ;;  %s10647_s12 = sphi %s10694_s12, %s13687_s12  }
   0x6   : > { %s10719_s18 = sadd.s32 1, %s10659_s15   ;;  %s74_s19 = sadd.s32 1, %s10655_s14 }
   0x7   : > { %s71_s20 = ssub.s32 %s10659_s15, %s10719_s18  ;;  %p84_p0 = scmp.ne.s32.totalorder %s10655_s14, %s10651_s13 }
   0x8   : > { %p72_p1 = scmp.eq.s32.totalorder %s71_s20, 0  ;;  %p85_p2 = scmp.eq.s32.totalorder %s10715_s16, 1 }
   0x9   : > { %p90_p3 = scmp.ne.s32.totalorder %s10651_s13, %s10647_s12  ;;  %p91_p4 = scmp.eq.s32.totalorder %s10011_s17, 1 }
   0xa   : > { %s10730_s21 = scalar_select %p72_p1, %s10655_s14, %s74_s19  }
   0xb   : > { %p10732_p5 = por %p85_p2, %p84_p0  ;;  %p10736_p6 = por %p91_p4, %p90_p3 }
   0xc   : > { %p10014_p7 = scmp.ge.s32.totalorder %s10659_s15, 1  ;;  %p146_p8 = scmp.lt.s32.totalorder %s10659_s15, 3 }
   0xe   : > { %p147_p9 = pnand %p10014_p7, %p146_p8 }
  0x10   : > { %150 = sbr.rel (%p147_p9) target bundleno = 974 (0x3ce), region = 28 }
  0x17   : > { %p175_p10 = scmp.lt.s32.totalorder %s10715_s16, 1  ;;  %v241_v0 = vlaneseq  ;;  %v10661_v1 = vmov 1983009808   ;;  %s10662_s29 = smov 24   ;;  %vm9243_vm0 = vcmask 64512   ;;  %vm9283_vm1 = vcmask 130048  }
  0x18   : > { %v239_v2 = vunpack.c.l.s4 %v10661_v1  ;;  %s10663_s30 = smov 8   ;;  %s10664_s4 = smov 32   ;;  %vm9310_vm2 = vcmask 195584   ;;  %vm9337_vm3 = vcmask 261120   ;;  %vm9364_vm4 = vcmask 326656  }
  0x19   : > { %s176_s24 = scalar_select %p175_p10, %s10715_s16, 1  ;;  %v242_v3 = vshrl.u32 %v241_v0, 7  ;;  %vm9535_vm5 = vcmask 1043456   ;;  %vm9391_vm6 = vcmask 392192   ;;  %vm9418_vm7 = vcmask 457728  }
  0x1a   : > { %v240_v4 = vunpack.c.0.s8 %v239_v2  ;;  %s10665_s5 = smov 16   ;;  %s10666_s6 = smov 48   ;;  %vm10671_vm8 = vmmov 0   ;;  %vm9445_vm9 = vcmask 523264   ;;  %vm9508_vm10 = vcmask 588800  }
  0x1b   : > { %s10212_s25 = sshll.u32 %s176_s24, 8  ;;  %s10667_s7 = smov 40   ;;  %vm9675_vm11 = vcmask 31744   ;;  %vm9723_vm12 = vcmask 27648   ;;  %vm9812_vm13 = vcmask 1040384   ;;  %vm9814_vm14 = vcmask 25600  }
  0x1c   : > { %s10747_s28 = scalar_lea.vmem %s13637_s0, %s10212_s25  ;;  %v10749_v5 = vsub.s32 %v240_v4, %v242_v3  ;;  %s10668_s8 = smov 64  }
  0x1d   : > { %v10019_v6 = vld [vmem:[%s10747_s28 + $0x10] sm:$0xff]  ;;  %v10020_v7 = vld [vmem:[%s10747_s28 + $0x18] sm:$0x3f]  ;;  %v10754_v8 = vld [vmem:[%s10747_s28 + $0x20] sm:$0xff]  ;;  %s10669_s9 = smov 56   ;;  %s10672_s17 = smov [#allocation4]  }
  0x1e   : > { %v3154_v9 = vcombine.high %v10019_v6, %v10019_v6  ;;  %v3161_v10 = vrot.slane %v10019_v6, %v10749_v5  ;;  %v3171_v11 = vcombine.high %v10020_v7, %v10020_v7  ;;  %v3178_v12 = vrot.slane %v10020_v7, %v10749_v5  ;;  %v1153_v13 = vld [vmem:[%s10747_s28 + $0x1] sm:$0xff]  ;;  %v1154_v14 = vld [vmem:[%s10747_s28 + $0x9] sm:$0x3f]  ;;  %v1155_v23 = vld [vmem:[%s10747_s28 + $0x11] sm:$0xff]  ;;  %s10569_s19 = sshll.u32 %s10672_s17, 4  ;;  %s10570_s19 = int_to_ptr.vmem [resolvable:$false] %s10569_s19 }
  0x1f   : > { %v3187_v15 = vcombine.high %v10754_v8, %v10754_v8  ;;  %v10764_v16 = vrot.slane %v10754_v8, %v10749_v5  ;;  %v1209_v17 = vcombine.high %v1153_v13, %v1153_v13  ;;  %v1216_v18 = vrot.slane %v1153_v13, %v10749_v5  ;;  %v10048_v36 = vld [vmem:[%s10747_s28 + $0x19] sm:$0x3f]  ;;  %v10785_v47 = vld [vmem:[%s10747_s28 + $0x21] sm:$0xff]  ;;  %v2126_v63 = vld [vmem:[%s10747_s28 + $0xa] sm:$0x3f]  ;;  %s10571_s20 = scalar_lea.vmem %s10570_s19, 64 }
  0x20   : > { %v3168_v19 = vrot.slane %v3154_v9, %v10749_v5  ;;  %v3169_v20 = vcombine.high %v3161_v10, %v3161_v10  ;;  %v3185_v21 = vrot.slane %v3171_v11, %v10749_v5  ;;  %v3186_v22 = vcombine.high %v3178_v12, %v3178_v12  ;;  %v2125_v58 = vld [vmem:[%s10747_s28 + $0x2] sm:$0xff]  ;;  %v2127_v13 = vld [vmem:[%s10747_s28 + $0x12] sm:$0xff] }
  0x21   : > { %v10772_v24 = vcombine.high %v10764_v16, %v10764_v16  ;;  %v1223_v25 = vrot.slane %v1209_v17, %v10749_v5  ;;  %v1224_v26 = vcombine.high %v1216_v18, %v1216_v18  ;;  %v1226_v27 = vcombine.high %v1154_v14, %v1154_v14 }
  0x22   : > { %v3170_v28 = vcombine.high %v3168_v19, %v3168_v19  ;;  %v3616_v29 = vcombine.low %v3161_v10, %v3169_v20  ;;  %v3633_v30 = vcombine.low %v3178_v12, %v3186_v22  ;;  %v3634_v31 = vcombine.low %v3185_v21, %v10764_v16  ;;  %v10104_v21 = vld [vmem:[%s10747_s28 + $0x28] sm:$0x3f] }
  0x23   : > { %v1225_v32 = vcombine.high %v1223_v25, %v1223_v25  ;;  %v1233_v33 = vrot.slane %v1154_v14, %v10749_v5  ;;  %v1240_v34 = vrot.slane %v1226_v27, %v10749_v5  ;;  %v1242_v35 = vcombine.high %v1155_v23, %v1155_v23 }
  0x24   : > { %v3617_v37 = vcombine.low %v3168_v19, %v3170_v28  ;;  %v3624_v38 = vrot.slane %v3616_v29, %v10749_v5  ;;  %v3641_v39 = vrot.slane %v3633_v30, %v10749_v5  ;;  %v3648_v40 = vrot.slane %v3634_v31, %v10749_v5 }
  0x25   : > { %v1241_v41 = vcombine.high %v1233_v33, %v1233_v33  ;;  %v1249_v42 = vrot.slane %v1155_v23, %v10749_v5  ;;  %v1671_v43 = vcombine.low %v1216_v18, %v1224_v26  ;;  %v1672_v44 = vcombine.low %v1223_v25, %v1225_v32 }
  0x26   : > { %v3631_v45 = vrot.slane %v3617_v37, %v10749_v5  ;;  %v3649_v46 = vcombine.low %v3641_v39, %v3648_v40  ;;  %v10788_v48 = vrot.slane %v1242_v35, %v10749_v5  ;;  %v4143_v49 = vcombine.high %v10048_v36, %v10048_v36 }
  0x27   : > { %v10790_v50 = vcombine.high %v1249_v42, %v1249_v42  ;;  %v1679_v51 = vrot.slane %v1671_v43, %v10749_v5  ;;  %v1686_v52 = vrot.slane %v1672_v44, %v10749_v5  ;;  %v1688_v53 = vcombine.low %v1233_v33, %v1241_v41  ;;  %v10826_v33 = vld [vmem:[%s10747_s28 + $0x30] sm:$0xff] }
  0x28   : > { %v3632_v54 = vcombine.low %v3624_v38, %v3631_v45  ;;  %v1689_v55 = vcombine.low %v1240_v34, %v1249_v42  ;;  %v10796_v56 = vcombine.high %v10788_v48, %v10788_v48  ;;  %v4150_v57 = vrot.slane %v10048_v36, %v10749_v5 }
  0x29   : > { %v1687_v59 = vcombine.low %v1679_v51, %v1686_v52  ;;  %v1696_v60 = vrot.slane %v1688_v53, %v10749_v5  ;;  %v4157_v61 = vrot.slane %v4143_v49, %v10749_v5  ;;  %v10804_v62 = vrot.slane %v10785_v47, %v10749_v5  ;;  %v10076_v52 = vld [vmem:[%s10747_s28 + $0x1a] sm:$0x3f] }
  0x2a   : > { %v4057_v0 = vpack.c.bf16 %v3649_v46, %v3632_v54  ;;  %v1703_v1 = vrot.slane %v1689_v55, %v10749_v5  ;;  %v4158_v2 = vcombine.high %v4150_v57, %v4150_v57  ;;  %v4588_v3 = vcombine.low %v1249_v42, %v10790_v50 }
  0x2b   : > { %v4589_v4 = vcombine.low %v10788_v48, %v10796_v56  ;;  %v4606_v6 = vcombine.low %v4157_v61, %v10804_v62  ;;  %v2181_v7 = vcombine.high %v2125_v58, %v2125_v58  ;;  %v2188_v9 = vrot.slane %v2125_v58, %v10749_v5  ;;  %v10077_v58 = vld [vmem:[%s10747_s28 + $0x22] sm:$0xff] }
  0x2c   : > { %9022 = vrot.lane.b32.xlu1 %v4057_v0, %s10662_s29  ;;  %v1704_v10 = vcombine.low %v1696_v60, %v1703_v1  ;;  %v4596_v11 = vrot.slane %v4588_v3, %v10749_v5  ;;  %v4605_v12 = vcombine.low %v4150_v57, %v4158_v2  ;;  %v2198_v14 = vcombine.high %v2126_v63, %v2126_v63 }
  0x2d   : > { %v4603_v17 = vrot.slane %v4589_v4, %v10749_v5  ;;  %v4620_v18 = vrot.slane %v4606_v6, %v10749_v5  ;;  %v2195_v19 = vrot.slane %v2181_v7, %v10749_v5  ;;  %v2196_v20 = vcombine.high %v2188_v9, %v2188_v9  ;;  %v10160_v4 = vld [vmem:[%s10747_s28 + $0x2a] sm:$0x3f] }
  0x2e   : > { %v2112_v22 = vpack.c.bf16 %v1704_v10, %v1687_v59  ;;  %v4613_v23 = vrot.slane %v4605_v12, %v10749_v5  ;;  %v2205_v25 = vrot.slane %v2126_v63, %v10749_v5  ;;  %v2212_v26 = vrot.slane %v2198_v14, %v10749_v5 }
  0x2f   : > { %v4604_v27 = vcombine.low %v4596_v11, %v4603_v17  ;;  %v2197_v28 = vcombine.high %v2195_v19, %v2195_v19  ;;  %v2221_v29 = vrot.slane %v2127_v13, %v10749_v5  ;;  %v2643_v30 = vcombine.low %v2188_v9, %v2196_v20 }
  0x30   : > { %8944 = vrot.lane.b32.xlu0 %v2112_v22, %s10663_s30  ;;  %v4621_v31 = vcombine.low %v4613_v23, %v4620_v18  ;;  %v2213_v32 = vcombine.high %v2205_v25, %v2205_v25  ;;  %v10832_v34 = vrot.slane %v3187_v15, %v10749_v5  ;;  %v6088_v35 = vcombine.high %v10104_v21, %v10104_v21  ;;  %v10878_v18 = vld [vmem:[%s10747_s28 + $0x32] sm:$0xff] }
  0x31   : > { %v2644_v36 = vcombine.low %v2195_v19, %v2197_v28  ;;  %v2651_v37 = vrot.slane %v2643_v30, %v10749_v5  ;;  %v2661_v38 = vcombine.low %v2212_v26, %v2221_v29  ;;  %v6095_v39 = vrot.slane %v10104_v21, %v10749_v5 }
  0x32   : > { %v5029_v40 = vpack.c.bf16 %v4621_v31, %v4604_v27  ;;  %v2660_v41 = vcombine.low %v2205_v25, %v2213_v32  ;;  %v10838_v42 = vcombine.high %v10832_v34, %v10832_v34  ;;  %v6102_v43 = vrot.slane %v6088_v35, %v10749_v5 }
  0x33   : > { %v2658_v8 = vrot.slane %v2644_v36, %v10749_v5  ;;  %v2675_v15 = vrot.slane %v2661_v38, %v10749_v5  ;;  %v6103_v44 = vcombine.high %v6095_v39, %v6095_v39  ;;  %v10845_v45 = vrot.slane %v10826_v33, %v10749_v5 }
  0x34   : > { %9061 = vrot.lane.b32.xlu1 %v5029_v40, %s10664_s4  ;;  %v2668_v46 = vrot.slane %v2660_v41, %v10749_v5  ;;  %v6533_v49 = vcombine.low %v10764_v16, %v10772_v24  ;;  %v6534_v51 = vcombine.low %v10832_v34, %v10838_v42  ;;  %v5098_v53 = vcombine.high %v2127_v13, %v2127_v13  ;;  %v10903_v41 = vld [vmem:[%s10747_s28 + $0x31] sm:$0xff] }
  0x35   : > { %v2659_v54 = vcombine.low %v2651_v37, %v2658_v8  ;;  %v6550_v55 = vcombine.low %v6095_v39, %v6103_v44  ;;  %v6551_v57 = vcombine.low %v6102_v43, %v10845_v45  ;;  %v10856_v59 = vcombine.high %v2221_v29, %v2221_v29  ;;  %v10132_v37 = vld [vmem:[%s10747_s28 + $0x29] sm:$0x3f] }
  0x36   : > { %v2676_v60 = vcombine.low %v2668_v46, %v2675_v15  ;;  %v6541_v61 = vrot.slane %v6533_v49, %v10749_v5  ;;  %v6548_v63 = vrot.slane %v6534_v51, %v10749_v5  ;;  %v10861_v16 = vrot.slane %v5098_v53, %v10749_v5 }
  0x37   : > { %v6558_v0 = vrot.slane %v6550_v55, %v10749_v5  ;;  %v6565_v1 = vrot.slane %v6551_v57, %v10749_v5  ;;  %v5115_v2 = vcombine.high %v10076_v52, %v10076_v52  ;;  %v5122_v3 = vrot.slane %v10076_v52, %v10749_v5 }
  0x38   : > { %v3084_v6 = vpack.c.bf16 %v2676_v60, %v2659_v54  ;;  %v6549_v7 = vcombine.low %v6541_v61, %v6548_v63  ;;  %v10869_v9 = vcombine.high %v10861_v16, %v10861_v16  ;;  %v5138_v10 = vrot.slane %v10077_v58, %v10749_v5  ;;  %v2128_v54 = vld [vmem:[%s10747_s28 + $0x1a] sm:$0x3f] }
  0x39   : > { %v6566_v11 = vcombine.low %v6558_v0, %v6565_v1  ;;  %v5129_v12 = vrot.slane %v5115_v2, %v10749_v5  ;;  %v5130_v13 = vcombine.high %v5122_v3, %v5122_v3  ;;  %v5560_v14 = vcombine.low %v2221_v29, %v10856_v59 }
  0x3a   : > { %8983 = vrot.lane.b32.xlu0 %v3084_v6, %s10665_s5  ;;  %v5561_v17 = vcombine.low %v10861_v16, %v10869_v9  ;;  %v8015_v19 = vcombine.high %v10077_v58, %v10077_v58  ;;  %v10880_v20 = vcombine.high %v5138_v10, %v5138_v10  ;;  %v8032_v21 = vcombine.high %v10160_v4, %v10160_v4 }
  0x3b   : > { %v6974_v22 = vpack.c.bf16 %v6566_v11, %v6549_v7  ;;  %v5568_v23 = vrot.slane %v5560_v14, %v10749_v5  ;;  %v5577_v25 = vcombine.low %v5122_v3, %v5130_v13  ;;  %v5578_v26 = vcombine.low %v5129_v12, %v5138_v10 }
  0x3c   : > { %v5575_v27 = vrot.slane %v5561_v17, %v10749_v5  ;;  %v10885_v28 = vrot.slane %v8015_v19, %v10749_v5  ;;  %v8039_v29 = vrot.slane %v10160_v4, %v10749_v5  ;;  %v8046_v30 = vrot.slane %v8032_v21, %v10749_v5  ;;  %v1156_v17 = vld [vmem:[%s10747_s28 + $0x19] sm:$0x3f] }
  0x3d   : > { %9139 = vrot.lane.b32.xlu1 %v6974_v22, %s10666_s6  ;;  %v5585_v31 = vrot.slane %v5577_v25, %v10749_v5  ;;  %v5592_v32 = vrot.slane %v5578_v26, %v10749_v5  ;;  %v10894_v35 = vrot.slane %v10878_v18, %v10749_v5  ;;  %v8477_v36 = vcombine.low %v5138_v10, %v10880_v20 }
  0x3e   : > { %v5576_v38 = vcombine.low %v5568_v23, %v5575_v27  ;;  %v10900_v39 = vcombine.high %v10885_v28, %v10885_v28  ;;  %v8047_v40 = vcombine.high %v8039_v29, %v8039_v29  ;;  %v7043_v43 = vcombine.high %v10785_v47, %v10785_v47 }
  0x3f   : > { %v5593_v8 = vcombine.low %v5585_v31, %v5592_v32  ;;  %v8485_v15 = vrot.slane %v8477_v36, %v10749_v5  ;;  %v8495_v44 = vcombine.low %v8046_v30, %v10894_v35  ;;  %v10911_v46 = vcombine.high %v10804_v62, %v10804_v62 }
  0x40   : > { %v8478_v49 = vcombine.low %v10885_v28, %v10900_v39  ;;  %v8494_v51 = vcombine.low %v8039_v29, %v8047_v40  ;;  %v10916_v52 = vrot.slane %v7043_v43, %v10749_v5  ;;  %v7060_v53 = vcombine.high %v10132_v37, %v10132_v37  ;;  %v10050_v40 = vld [vmem:[%s10747_s28 + $0x29] sm:$0x3f] }
  0x41   : > { %v6001_v55 = vpack.c.bf16 %v5593_v8, %v5576_v38  ;;  %v8509_v47 = vrot.slane %v8495_v44, %v10749_v5  ;;  %v7067_v57 = vrot.slane %v10132_v37, %v10749_v5  ;;  %v10923_v58 = vrot.slane %v10903_v41, %v10749_v5 }
  0x42   : > { %v10926_v60 = vrot.slane %v8478_v49, %v10749_v5  ;;  %v8502_v61 = vrot.slane %v8494_v51, %v10749_v5  ;;  %v10931_v63 = vcombine.high %v10916_v52, %v10916_v52  ;;  %v7074_v0 = vrot.slane %v7060_v53, %v10749_v5 }
  0x43   : > { %9100 = vrot.lane.b32.xlu0 %v6001_v55, %s10667_s7  ;;  %v7075_v1 = vcombine.high %v7067_v57, %v7067_v57  ;;  %v7505_v2 = vcombine.low %v10804_v62, %v10911_v46  ;;  %v2231_v3 = vcombine.high %v2128_v54, %v2128_v54  ;;  %v2238_v13 = vrot.slane %v2128_v54, %v10749_v5 }
  0x44   : > { %v8493_v4 = vcombine.low %v8485_v15, %v10926_v60  ;;  %v8510_v6 = vcombine.low %v8502_v61, %v8509_v47  ;;  %v7506_v7 = vcombine.low %v10916_v52, %v10931_v63  ;;  %v7523_v10 = vcombine.low %v7074_v0, %v10923_v58  ;;  %v10022_v61 = vld [vmem:[%s10747_s28 + $0x28] sm:$0x3f] }
  0x45   : > { %v7513_v11 = vrot.slane %v7505_v2, %v10749_v5  ;;  %v7522_v12 = vcombine.low %v7067_v57, %v7075_v1  ;;  %v2245_v14 = vrot.slane %v2231_v3, %v10749_v5  ;;  %v2246_v23 = vcombine.high %v2238_v13, %v2238_v13 }
  0x46   : > { %v8918_v19 = vpack.c.bf16 %v8510_v6, %v8493_v4  ;;  %v10946_v62 = vrot.slane %v7506_v7, %v10749_v5  ;;  %v7537_v21 = vrot.slane %v7523_v10, %v10749_v5  ;;  %v2677_v25 = vcombine.low %v10856_v59, %v10861_v16 }
  0x47   : > { %v7530_v22 = vrot.slane %v7522_v12, %v10749_v5  ;;  %v2678_v26 = vcombine.low %v10869_v9, %v2238_v13  ;;  %v1259_v29 = vcombine.high %v1156_v17, %v1156_v17  ;;  %v2694_v36 = vcombine.low %v2246_v23, %v2245_v14 }
  0x48   : > { %9217 = vrot.lane.b32.xlu1 %v8918_v19, %s10668_s8  ;;  %v7521_v27 = vcombine.low %v7513_v11, %v10946_v62  ;;  %v2685_v31 = vrot.slane %v2677_v25, %v10749_v5  ;;  %v1266_v37 = vrot.slane %v1156_v17, %v10749_v5  ;;  %v1705_v8 = vcombine.low %v10790_v50, %v10788_v48 }
  0x49   : > { %v7538_v30 = vcombine.low %v7530_v22, %v7537_v21  ;;  %v2692_v32 = vrot.slane %v2678_v26, %v10749_v5  ;;  %v1273_v38 = vrot.slane %v1259_v29, %v10749_v5  ;;  %v2702_v9 = vrot.slane %v2694_v36, %v10749_v5 }
  0x4a   : > { %v1274_v43 = vcombine.high %v1266_v37, %v1266_v37  ;;  %v1706_v44 = vcombine.low %v10796_v56, %v1266_v37  ;;  %v4176_v51 = vcombine.high %v10050_v40, %v10050_v40  ;;  %v4183_v53 = vrot.slane %v10050_v40, %v10749_v5 }
  0x4b   : > { %v7946_v59 = vpack.c.bf16 %v7538_v30, %v7521_v27  ;;  %v2693_v16 = vcombine.low %v2685_v31, %v2692_v32  ;;  %v2710_v49 = vcombine.low %v2702_v9, %v8485_v15  ;;  %v1713_v54 = vrot.slane %v1705_v8, %v10749_v5  ;;  %v10998_v30 = vld [vmem:[%s10747_s28 + $0x40] sm:$0xff] }
  0x4c   : > { %v1720_v55 = vrot.slane %v1706_v44, %v10749_v5  ;;  %v1722_v47 = vcombine.low %v1274_v43, %v1273_v38  ;;  %v10970_v57 = vcombine.high %v10923_v58, %v10923_v58  ;;  %v4190_v50 = vrot.slane %v4176_v51, %v10749_v5 }
  0x4d   : > { %9178 = vrot.lane.b32.xlu0 %v7946_v59, %s10669_s9  ;;  %v3085_v48 = vpack.c.bf16 %v2710_v49, %v2693_v16  ;;  %v4191_v56 = vcombine.high %v4183_v53, %v4183_v53  ;;  %v4622_v1 = vcombine.low %v10911_v46, %v10916_v52  ;;  %v4623_v2 = vcombine.low %v10931_v63, %v4183_v53  ;;  %v10106_v63 = vld [vmem:[%s10747_s28 + $0x38] sm:$0x3f] }
  0x4e   : > { %v1721_v0 = vcombine.low %v1713_v54, %v1720_v55  ;;  %v1730_v15 = vrot.slane %v1722_v47, %v10749_v5  ;;  %v4640_v4 = vcombine.low %v10923_v58, %v10970_v57  ;;  %v3204_v6 = vcombine.high %v10022_v61, %v10022_v61 }
  0x4f   : > { %8985 = vrot.lane.b32.xlu1 %v3085_v48, %s10665_s5  ;;  %v4639_v3 = vcombine.low %v4191_v56, %v4190_v50  ;;  %v4630_v10 = vrot.slane %v4622_v1, %v10749_v5  ;;  %v4637_v12 = vrot.slane %v4623_v2, %v10749_v5  ;;  %v3211_v13 = vrot.slane %v10022_v61, %v10749_v5 }
  0x50   : > { %v1738_v7 = vcombine.low %v1730_v15, %v7513_v11  ;;  %v4654_v46 = vrot.slane %v4640_v4, %v10749_v5  ;;  %v3218_v52 = vrot.slane %v3204_v6, %v10749_v5  ;;  %v3235_v11 = vcombine.high %v10845_v45, %v10845_v45  ;;  %v10134_v4 = vld [vmem:[%s10747_s28 + $0x39] sm:$0x3f] }
  0x51   : > { %v4647_v14 = vrot.slane %v4639_v3, %v10749_v5  ;;  %v4638_v19 = vcombine.low %v4630_v10, %v4637_v12  ;;  %v3219_v21 = vcombine.high %v3211_v13, %v3211_v13  ;;  %v3650_v23 = vcombine.low %v10772_v24, %v10832_v34  ;;  %v10078_v34 = vld [vmem:[%s10747_s28 + $0x2a] sm:$0x3f]  ;;  %v11048_v12 = vld [vmem:[%s10747_s28 + $0x41] sm:$0xff] }
  0x52   : > { %v2113_v17 = vpack.c.bf16 %v1738_v7, %v1721_v0  ;;  %v3651_v25 = vcombine.low %v10838_v42, %v3211_v13  ;;  %v6104_v26 = vcombine.high %v10826_v33, %v10826_v33  ;;  %v3668_v29 = vcombine.low %v10845_v45, %v3235_v11 }
  0x53   : > { %v4655_v22 = vcombine.low %v4647_v14, %v4654_v46  ;;  %v3667_v27 = vcombine.low %v3219_v21, %v3218_v52  ;;  %v6121_v31 = vcombine.high %v10106_v63, %v10106_v63  ;;  %v3658_v36 = vrot.slane %v3650_v23, %v10749_v5  ;;  %v1170_v23 = vld [vmem:[%s10747_s28 + $0x89] sm:$0x3f] }
  0x54   : > { %8946 = vrot.lane.b32.xlu0 %v2113_v17, %s10663_s30  ;;  %v3665_v37 = vrot.slane %v3651_v25, %v10749_v5  ;;  %v11003_v24 = vrot.slane %v6104_v26, %v10749_v5  ;;  %v3682_v33 = vrot.slane %v3668_v29, %v10749_v5  ;;  %v6128_v38 = vrot.slane %v10106_v63, %v10749_v5  ;;  %v1169_v17 = vld [vmem:[%s10747_s28 + $0x81] sm:$0xff] }
  0x55   : > { %v5030_v32 = vpack.c.bf16 %v4655_v22, %v4638_v19  ;;  %v3675_v42 = vrot.slane %v3667_v27, %v10749_v5  ;;  %v6135_v45 = vrot.slane %v6121_v31, %v10749_v5  ;;  %v11017_v16 = vrot.slane %v10998_v30, %v10749_v5 }
  0x56   : > { %v3666_v40 = vcombine.low %v3658_v36, %v3665_v37  ;;  %v11013_v59 = vcombine.high %v11003_v24, %v11003_v24  ;;  %v6567_v9 = vcombine.low %v3235_v11, %v11003_v24  ;;  %v6136_v8 = vcombine.high %v6128_v38, %v6128_v38  ;;  %v11079_v37 = vld [vmem:[%s10747_s28 + $0x91] sm:$0xff] }
  0x57   : > { %9063 = vrot.lane.b32.xlu1 %v5030_v32, %s10664_s4  ;;  %v3683_v43 = vcombine.low %v3675_v42, %v3682_v33  ;;  %v5148_v44 = vcombine.high %v10078_v34, %v10078_v34  ;;  %v11022_v49 = vcombine.high %v11017_v16, %v11017_v16  ;;  %v5155_v54 = vrot.slane %v10078_v34, %v10749_v5 }
  0x58   : > { %v6568_v51 = vcombine.low %v11013_v59, %v6128_v38  ;;  %v6575_v53 = vrot.slane %v6567_v9, %v10749_v5  ;;  %v6584_v47 = vcombine.low %v6136_v8, %v6135_v45  ;;  %v11030_v48 = vcombine.high %v10894_v35, %v10894_v35 }
  0x59   : > { %v4058_v55 = vpack.c.bf16 %v3683_v43, %v3666_v40  ;;  %v5162_v61 = vrot.slane %v5148_v44, %v10749_v5  ;;  %v6585_v56 = vcombine.low %v11017_v16, %v11022_v49  ;;  %v5163_v0 = vcombine.high %v5155_v54, %v5155_v54 }
  0x5a   : > { %v6582_v50 = vrot.slane %v6568_v51, %v10749_v5  ;;  %v5594_v15 = vcombine.low %v10880_v20, %v10885_v28  ;;  %v6592_v1 = vrot.slane %v6584_v47, %v10749_v5  ;;  %v5595_v2 = vcombine.low %v10900_v39, %v5155_v54  ;;  %v10162_v54 = vld [vmem:[%s10747_s28 + $0x3a] sm:$0x3f] }
  0x5b   : > { %9024 = vrot.lane.b32.xlu0 %v4058_v55, %s10662_s29  ;;  %v5612_v3 = vcombine.low %v10894_v35, %v11030_v48  ;;  %v7076_v6 = vcombine.high %v10903_v41, %v10903_v41  ;;  %v6599_v10 = vrot.slane %v6585_v56, %v10749_v5  ;;  %v5611_v28 = vcombine.low %v5163_v0, %v5162_v61 }
  0x5c   : > { %v6583_v7 = vcombine.low %v6575_v53, %v6582_v50  ;;  %v5602_v20 = vrot.slane %v5594_v15, %v10749_v5  ;;  %v5609_v13 = vrot.slane %v5595_v2, %v10749_v5  ;;  %v7093_v41 = vcombine.high %v10134_v4, %v10134_v4 }
  0x5d   : > { %v5626_v39 = vrot.slane %v5612_v3, %v10749_v5  ;;  %v11053_v14 = vrot.slane %v7076_v6, %v10749_v5  ;;  %v6600_v46 = vcombine.low %v6592_v1, %v6599_v10  ;;  %v5619_v52 = vrot.slane %v5611_v28, %v10749_v5 }
  0x5e   : > { %v7100_v63 = vrot.slane %v10134_v4, %v10749_v5  ;;  %v5610_v19 = vcombine.low %v5602_v20, %v5609_v13  ;;  %v11064_v11 = vrot.slane %v11048_v12, %v10749_v5  ;;  %v7107_v27 = vrot.slane %v7093_v41, %v10749_v5  ;;  %v11102_v4 = vld [vmem:[%s10747_s28 + $0x42] sm:$0xff] }
  0x5f   : > { %v11060_v21 = vcombine.high %v11053_v14, %v11053_v14  ;;  %v7539_v22 = vcombine.low %v10970_v57, %v11053_v14  ;;  %v6975_v25 = vpack.c.bf16 %v6600_v46, %v6583_v7  ;;  %v5627_v26 = vcombine.low %v5619_v52, %v5626_v39  ;;  %v2141_v13 = vld [vmem:[%s10747_s28 + $0x82] sm:$0xff] }
  0x60   : > { %v7108_v29 = vcombine.high %v7100_v63, %v7100_v63  ;;  %v11072_v31 = vcombine.high %v11064_v11, %v11064_v11  ;;  %v1473_v34 = vcombine.high %v1169_v17, %v1169_v17  ;;  %v1480_v33 = vrot.slane %v1169_v17, %v10749_v5 }
  0x61   : > { %v7540_v32 = vcombine.low %v11060_v21, %v7100_v63  ;;  %v11076_v36 = vrot.slane %v7539_v22, %v10749_v5  ;;  %9141 = vrot.lane.b32.xlu1 %v6975_v25, %s10666_s6  ;;  %v6002_v57 = vpack.c.bf16 %v5627_v26, %v5610_v19  ;;  %v1490_v38 = vcombine.high %v1170_v23, %v1170_v23  ;;  %v2142_v22 = vld [vmem:[%s10747_s28 + $0x8a] sm:$0x3f] }
  0x62   : > { %v7556_v42 = vcombine.low %v7108_v29, %v7107_v27  ;;  %v7557_v40 = vcombine.low %v11064_v11, %v11072_v31  ;;  %v1487_v9 = vrot.slane %v1473_v34, %v10749_v5  ;;  %v1497_v43 = vrot.slane %v1170_v23, %v10749_v5 }
  0x63   : > { %v7554_v45 = vrot.slane %v7540_v32, %v10749_v5  ;;  %9102 = vrot.lane.b32.xlu0 %v6002_v57, %s10667_s7  ;;  %v1488_v44 = vcombine.high %v1480_v33, %v1480_v33  ;;  %v1504_v51 = vrot.slane %v1490_v38, %v10749_v5  ;;  %v11093_v53 = vrot.slane %v11079_v37, %v10749_v5 }
  0x64   : > { %v7564_v8 = vrot.slane %v7556_v42, %v10749_v5  ;;  %v7571_v47 = vrot.slane %v7557_v40, %v10749_v5  ;;  %v1489_v61 = vcombine.high %v1487_v9, %v1487_v9  ;;  %v1505_v50 = vcombine.high %v1497_v43, %v1497_v43  ;;  %v10035_v40 = vld [vmem:[%s10747_s28 + $0x90] sm:$0xff] }
  0x65   : > { %v7555_v55 = vcombine.low %v11076_v36, %v7554_v45  ;;  %v1909_v56 = vcombine.low %v1480_v33, %v1488_v44  ;;  %v1927_v0 = vcombine.low %v1504_v51, %v11093_v53  ;;  %v8048_v15 = vcombine.high %v10878_v18, %v10878_v18 }
  0x66   : > { %v7572_v1 = vcombine.low %v7564_v8, %v7571_v47  ;;  %v1910_v2 = vcombine.low %v1487_v9, %v1489_v61  ;;  %v1926_v3 = vcombine.low %v1497_v43, %v1505_v50  ;;  %v8065_v6 = vcombine.high %v10162_v54, %v10162_v54  ;;  %v10036_v61 = vld [vmem:[%s10747_s28 + $0x98] sm:$0x3f] }
  0x67   : > { %v1917_v7 = vrot.slane %v1909_v56, %v10749_v5  ;;  %v1941_v10 = vrot.slane %v1927_v0, %v10749_v5  ;;  %v11107_v20 = vrot.slane %v8048_v15, %v10749_v5  ;;  %v8072_v28 = vrot.slane %v10162_v54, %v10749_v5 }
  0x68   : > { %v7947_v39 = vpack.c.bf16 %v7572_v1, %v7555_v55  ;;  %v1924_v18 = vrot.slane %v1910_v2, %v10749_v5  ;;  %v1934_v46 = vrot.slane %v1926_v3, %v10749_v5  ;;  %v8079_v52 = vrot.slane %v8065_v6, %v10749_v5 }
  0x69   : > { %v11116_v41 = vcombine.high %v11107_v20, %v11107_v20  ;;  %v8080_v63 = vcombine.high %v8072_v28, %v8072_v28  ;;  %v11120_v17 = vrot.slane %v11102_v4, %v10749_v5  ;;  %v8511_v19 = vcombine.low %v11030_v48, %v11107_v20  ;;  %v11136_v48 = vld [vmem:[%s10747_s28 + $0x92] sm:$0xff] }
  0x6a   : > { %9180 = vrot.lane.b32.xlu1 %v7947_v39, %s10669_s9  ;;  %v1925_v23 = vcombine.low %v1917_v7, %v1924_v18  ;;  %v1942_v25 = vcombine.low %v1934_v46, %v1941_v10  ;;  %v2445_v26 = vcombine.high %v2141_v13, %v2141_v13  ;;  %v2452_v27 = vrot.slane %v2141_v13, %v10749_v5 }
  0x6b   : > { %v11129_v29 = vcombine.high %v11120_v17, %v11120_v17  ;;  %v8512_v32 = vcombine.low %v11116_v41, %v8072_v28  ;;  %v11133_v34 = vrot.slane %v8511_v19, %v10749_v5  ;;  %v8528_v57 = vcombine.low %v8080_v63, %v8079_v52  ;;  %v11158_v28 = vld [vmem:[%s10747_s28 + $0xa0] sm:$0xff]  ;;  %v1158_v19 = vld [vmem:[%s10747_s28 + $0x29] sm:$0x3f] }
  0x6c   : > { %v2119_v42 = vpack.c.bf16 %v1942_v25, %v1925_v23  ;;  %v2459_v33 = vrot.slane %v2445_v26, %v10749_v5  ;;  %v2460_v38 = vcombine.high %v2452_v27, %v2452_v27  ;;  %v2462_v45 = vcombine.high %v2142_v22, %v2142_v22 }
  0x6d   : > { %v8526_v9 = vrot.slane %v8512_v32, %v10749_v5  ;;  %v8529_v43 = vcombine.low %v11120_v17, %v11129_v29  ;;  %v8536_v8 = vrot.slane %v8528_v57, %v10749_v5  ;;  %v2469_v44 = vrot.slane %v2142_v22, %v10749_v5 }
  0x6e   : > { %8958 = vrot.lane.b32.xlu0 %v2119_v42, %s10663_s30  ;;  %v2461_v51 = vcombine.high %v2459_v33, %v2459_v33  ;;  %v2476_v54 = vrot.slane %v2462_v45, %v10749_v5  ;;  %v11149_v55 = vrot.slane %v11136_v48, %v10749_v5  ;;  %v2881_v47 = vcombine.low %v2452_v27, %v2460_v38 }
  0x6f   : > { %v8527_v50 = vcombine.low %v11133_v34, %v8526_v9  ;;  %v8543_v56 = vrot.slane %v8529_v43, %v10749_v5  ;;  %v2477_v0 = vcombine.high %v2469_v44, %v2469_v44  ;;  %v3418_v15 = vcombine.high %v10035_v40, %v10035_v40 }
  0x70   : > { %v2882_v1 = vcombine.low %v2459_v33, %v2461_v51  ;;  %v2889_v2 = vrot.slane %v2881_v47, %v10749_v5  ;;  %v2899_v3 = vcombine.low %v2476_v54, %v11149_v55  ;;  %v3425_v6 = vrot.slane %v10035_v40, %v10749_v5 }
  0x71   : > { %v8544_v7 = vcombine.low %v8536_v8, %v8543_v56  ;;  %v2898_v10 = vcombine.low %v2469_v44, %v2477_v0  ;;  %v3432_v13 = vrot.slane %v3418_v15, %v10749_v5  ;;  %v3435_v39 = vcombine.high %v10036_v61, %v10036_v61  ;;  %v10064_v44 = vld [vmem:[%s10747_s28 + $0x99] sm:$0x3f]  ;;  %v11181_v56 = vld [vmem:[%s10747_s28 + $0xa1] sm:$0xff] }
  0x72   : > { %v2896_v18 = vrot.slane %v2882_v1, %v10749_v5  ;;  %v2913_v46 = vrot.slane %v2899_v3, %v10749_v5  ;;  %v3433_v52 = vcombine.high %v3425_v6, %v3425_v6  ;;  %v3442_v63 = vrot.slane %v10036_v61, %v10749_v5 }
  0x73   : > { %v8919_v22 = vpack.c.bf16 %v8544_v7, %v8527_v50  ;;  %v2906_v23 = vrot.slane %v2898_v10, %v10749_v5  ;;  %v3434_v25 = vcombine.high %v3432_v13, %v3432_v13  ;;  %v3449_v26 = vrot.slane %v3435_v39, %v10749_v5  ;;  %v2130_v10 = vld [vmem:[%s10747_s28 + $0x2a] sm:$0x3f] }
  0x74   : > { %v2897_v27 = vcombine.low %v2889_v2, %v2896_v18  ;;  %v3450_v32 = vcombine.high %v3442_v63, %v3442_v63  ;;  %v11169_v57 = vrot.slane %v11158_v28, %v10749_v5  ;;  %v3854_v42 = vcombine.low %v3425_v6, %v3433_v52 }
  0x75   : > { %9219 = vrot.lane.b32.xlu1 %v8919_v22, %s10668_s8  ;;  %v2914_v33 = vcombine.low %v2906_v23, %v2913_v46  ;;  %v3855_v38 = vcombine.low %v3432_v13, %v3434_v25  ;;  %v1292_v45 = vcombine.high %v1158_v19, %v1158_v19  ;;  %v1299_v40 = vrot.slane %v1158_v19, %v10749_v5 }
  0x76   : > { %v3862_v9 = vrot.slane %v3854_v42, %v10749_v5  ;;  %v3871_v43 = vcombine.low %v3442_v63, %v3450_v32  ;;  %v3872_v8 = vcombine.low %v3449_v26, %v11169_v57  ;;  %v4390_v51 = vcombine.high %v11079_v37, %v11079_v37 }
  0x77   : > { %v3091_v54 = vpack.c.bf16 %v2914_v33, %v2897_v27  ;;  %v3869_v47 = vrot.slane %v3855_v38, %v10749_v5  ;;  %v1306_v61 = vrot.slane %v1292_v45, %v10749_v5  ;;  %v1307_v50 = vcombine.high %v1299_v40, %v1299_v40 }
  0x78   : > { %v3879_v0 = vrot.slane %v3871_v43, %v10749_v5  ;;  %v3886_v15 = vrot.slane %v3872_v8, %v10749_v5  ;;  %v11186_v1 = vrot.slane %v4390_v51, %v10749_v5  ;;  %v11190_v2 = vcombine.high %v11093_v53, %v11093_v53  ;;  %v11221_v43 = vld [vmem:[%s10747_s28 + $0xa2] sm:$0xff] }
  0x79   : > { %8997 = vrot.lane.b32.xlu0 %v3091_v54, %s10665_s5  ;;  %v3870_v37 = vcombine.low %v3862_v9, %v3869_v47  ;;  %v1740_v3 = vcombine.low %v1299_v40, %v1307_v50  ;;  %v1756_v6 = vcombine.low %v1306_v61, %v10923_v58  ;;  %v4407_v7 = vcombine.high %v10064_v44, %v10064_v44  ;;  %v10092_v9 = vld [vmem:[%s10747_s28 + $0x9a] sm:$0x3f] }
  0x7a   : > { %v3887_v13 = vcombine.low %v3879_v0, %v3886_v15  ;;  %v11197_v39 = vcombine.high %v11186_v1, %v11186_v1  ;;  %v4414_v18 = vrot.slane %v10064_v44, %v10749_v5  ;;  %v11202_v46 = vrot.slane %v11181_v56, %v10749_v5  ;;  %v10024_v50 = vld [vmem:[%s10747_s28 + $0x38] sm:$0x3f] }
  0x7b   : > { %v1754_v52 = vrot.slane %v1740_v3, %v10749_v5  ;;  %v1764_v63 = vrot.slane %v1756_v6, %v10749_v5  ;;  %v4421_v58 = vrot.slane %v4407_v7, %v10749_v5  ;;  %v4826_v19 = vcombine.low %v11093_v53, %v11190_v2 }
  0x7c   : > { %v4064_v22 = vpack.c.bf16 %v3887_v13, %v3870_v37  ;;  %v4422_v23 = vcombine.high %v4414_v18, %v4414_v18  ;;  %v4827_v25 = vcombine.low %v11186_v1, %v11197_v39  ;;  %v2264_v26 = vcombine.high %v2130_v10, %v2130_v10 }
  0x7d   : > { %v1755_v27 = vcombine.low %v10946_v62, %v1754_v52  ;;  %v1772_v32 = vcombine.low %v1764_v63, %v11076_v36  ;;  %v4834_v42 = vrot.slane %v4826_v19, %v10749_v5  ;;  %v4844_v33 = vcombine.low %v4421_v58, %v11202_v46 }
  0x7e   : > { %9036 = vrot.lane.b32.xlu1 %v4064_v22, %s10662_s29  ;;  %v4841_v38 = vrot.slane %v4827_v25, %v10749_v5  ;;  %v4843_v53 = vcombine.low %v4414_v18, %v4422_v23  ;;  %v2271_v45 = vrot.slane %v2130_v10, %v10749_v5  ;;  %v2278_v40 = vrot.slane %v2264_v26, %v10749_v5 }
  0x7f   : > { %v2114_v62 = vpack.c.bf16 %v1772_v32, %v1755_v27  ;;  %v4858_v36 = vrot.slane %v4844_v33, %v10749_v5  ;;  %v5362_v8 = vcombine.high %v11136_v48, %v11136_v48  ;;  %v11228_v44 = vcombine.high %v11149_v55, %v11149_v55 }
  0x80   : > { %v4842_v51 = vcombine.low %v4834_v42, %v4841_v38  ;;  %v4851_v54 = vrot.slane %v4843_v53, %v10749_v5  ;;  %v2279_v47 = vcombine.high %v2271_v45, %v2271_v45  ;;  %v2728_v61 = vcombine.low %v2278_v40, %v10894_v35  ;;  %v10120_v40 = vld [vmem:[%s10747_s28 + $0xa8] sm:$0x3f] }
  0x81   : > { %8948 = vrot.lane.b32.xlu0 %v2114_v62, %s10663_s30  ;;  %v11235_v0 = vrot.slane %v5362_v8, %v10749_v5  ;;  %v5379_v15 = vcombine.high %v10092_v9, %v10092_v9  ;;  %v5386_v37 = vrot.slane %v10092_v9, %v10749_v5  ;;  %v11240_v48 = vrot.slane %v11221_v43, %v10749_v5 }
  0x82   : > { %v4859_v3 = vcombine.low %v4851_v54, %v4858_v36  ;;  %v2712_v6 = vcombine.low %v2271_v45, %v2279_v47  ;;  %v2736_v7 = vrot.slane %v2728_v61, %v10749_v5  ;;  %v5798_v35 = vcombine.low %v11149_v55, %v11228_v44 }
  0x83   : > { %v11247_v10 = vcombine.high %v11235_v0, %v11235_v0  ;;  %v5393_v13 = vrot.slane %v5379_v15, %v10749_v5  ;;  %v5394_v18 = vcombine.high %v5386_v37, %v5386_v37  ;;  %v3237_v52 = vcombine.high %v10024_v50, %v10024_v50 }
  0x84   : > { %v5036_v63 = vpack.c.bf16 %v4859_v3, %v4842_v51  ;;  %v2726_v58 = vrot.slane %v2712_v6, %v10749_v5  ;;  %v2744_v19 = vcombine.low %v2736_v7, %v11133_v34  ;;  %v5806_v22 = vrot.slane %v5798_v35, %v10749_v5 }
  0x85   : > { %v5799_v23 = vcombine.low %v11235_v0, %v11247_v10  ;;  %v5815_v55 = vcombine.low %v5386_v37, %v5394_v18  ;;  %v5816_v25 = vcombine.low %v5393_v13, %v11240_v48  ;;  %v3244_v26 = vrot.slane %v10024_v50, %v10749_v5  ;;  %v10052_v50 = vld [vmem:[%s10747_s28 + $0x39] sm:$0x3f] }
  0x86   : > { %9075 = vrot.lane.b32.xlu1 %v5036_v63, %s10664_s4  ;;  %v2727_v27 = vcombine.low %v10926_v60, %v2726_v58  ;;  %v3251_v32 = vrot.slane %v3237_v52, %v10749_v5  ;;  %v3253_v34 = vcombine.high %v10998_v30, %v10998_v30  ;;  %v3684_v42 = vcombine.low %v11003_v24, %v11013_v59  ;;  %v11274_v59 = vld [vmem:[%s10747_s28 + $0xb0] sm:$0xff] }
  0x87   : > { %v5813_v33 = vrot.slane %v5799_v23, %v10749_v5  ;;  %v5823_v38 = vrot.slane %v5815_v55, %v10749_v5  ;;  %v5830_v53 = vrot.slane %v5816_v25, %v10749_v5  ;;  %v3252_v45 = vcombine.high %v3244_v26, %v3244_v26 }
  0x88   : > { %v3086_v9 = vpack.c.bf16 %v2744_v19, %v2727_v27  ;;  %v11269_v60 = vrot.slane %v3253_v34, %v10749_v5  ;;  %v3692_v62 = vrot.slane %v3684_v42, %v10749_v5  ;;  %v3701_v30 = vcombine.low %v3251_v32, %v11017_v16 }
  0x89   : > { %v5814_v36 = vcombine.low %v5806_v22, %v5813_v33  ;;  %v5831_v8 = vcombine.low %v5823_v38, %v5830_v53  ;;  %v3685_v24 = vcombine.low %v3244_v26, %v3252_v45  ;;  %v6335_v51 = vcombine.high %v11158_v28, %v11158_v28 }
  0x8a   : > { %8987 = vrot.lane.b32.xlu0 %v3086_v9, %s10665_s5  ;;  %v3702_v54 = vcombine.low %v11022_v49, %v11269_v60  ;;  %v3709_v47 = vrot.slane %v3701_v30, %v10749_v5  ;;  %v11284_v61 = vcombine.high %v11169_v57, %v11169_v57  ;;  %v6352_v16 = vcombine.high %v10120_v40, %v10120_v40 }
  0x8b   : > { %v6008_v15 = vpack.c.bf16 %v5831_v8, %v5814_v36  ;;  %v3699_v37 = vrot.slane %v3685_v24, %v10749_v5  ;;  %v11289_v3 = vrot.slane %v6335_v51, %v10749_v5  ;;  %v6359_v28 = vrot.slane %v10120_v40, %v10749_v5  ;;  %v10148_v40 = vld [vmem:[%s10747_s28 + $0xa9] sm:$0x3f] }
  0x8c   : > { %v3716_v6 = vrot.slane %v3702_v54, %v10749_v5  ;;  %v6366_v49 = vrot.slane %v6352_v16, %v10749_v5  ;;  %v11296_v7 = vrot.slane %v11274_v59, %v10749_v5  ;;  %v6771_v35 = vcombine.low %v11169_v57, %v11284_v61 }
  0x8d   : > { %9114 = vrot.lane.b32.xlu1 %v6008_v15, %s10667_s7  ;;  %v3700_v13 = vcombine.low %v3692_v62, %v3699_v37  ;;  %v11303_v18 = vcombine.high %v11289_v3, %v11289_v3  ;;  %v6367_v52 = vcombine.high %v6359_v28, %v6359_v28  ;;  %v4209_v63 = vcombine.high %v10052_v50, %v10052_v50  ;;  %v11326_v62 = vld [vmem:[%s10747_s28 + $0xb1] sm:$0xff] }
  0x8e   : > { %v3717_v58 = vcombine.low %v3709_v47, %v3716_v6  ;;  %v6779_v19 = vrot.slane %v6771_v35, %v10749_v5  ;;  %v6789_v22 = vcombine.low %v6366_v49, %v11296_v7  ;;  %v4216_v23 = vrot.slane %v10052_v50, %v10749_v5 }
  0x8f   : > { %v6772_v57 = vcombine.low %v11289_v3, %v11303_v18  ;;  %v6788_v55 = vcombine.low %v6359_v28, %v6367_v52  ;;  %v4223_v25 = vrot.slane %v4209_v63, %v10749_v5  ;;  %v4225_v26 = vcombine.high %v11048_v12, %v11048_v12 }
  0x90   : > { %v4059_v27 = vpack.c.bf16 %v3717_v58, %v3700_v13  ;;  %v6803_v32 = vrot.slane %v6789_v22, %v10749_v5  ;;  %v4224_v34 = vcombine.high %v4216_v23, %v4216_v23  ;;  %v4656_v42 = vcombine.low %v11053_v14, %v11060_v21 }
  0x91   : > { %v6786_v33 = vrot.slane %v6772_v57, %v10749_v5  ;;  %v6796_v38 = vrot.slane %v6788_v55, %v10749_v5  ;;  %v11319_v53 = vrot.slane %v4225_v26, %v10749_v5  ;;  %v4673_v45 = vcombine.low %v4223_v25, %v11064_v11 }
  0x92   : > { %9026 = vrot.lane.b32.xlu0 %v4059_v27, %s10662_s29  ;;  %v4657_v12 = vcombine.low %v4216_v23, %v4224_v34  ;;  %v4664_v9 = vrot.slane %v4656_v42, %v10749_v5  ;;  %v7307_v14 = vcombine.high %v11181_v56, %v11181_v56  ;;  %v11332_v30 = vcombine.high %v11202_v46, %v11202_v46  ;;  %v10080_v56 = vld [vmem:[%s10747_s28 + $0x3a] sm:$0x3f] }
  0x93   : > { %v6787_v36 = vcombine.low %v6779_v19, %v6786_v33  ;;  %v6804_v8 = vcombine.low %v6796_v38, %v6803_v32  ;;  %v4674_v11 = vcombine.low %v11072_v31, %v11319_v53  ;;  %v4681_v24 = vrot.slane %v4673_v45, %v10749_v5  ;;  %v10176_v33 = vld [vmem:[%s10747_s28 + $0xaa] sm:$0x3f] }
  0x94   : > { %v4671_v51 = vrot.slane %v4657_v12, %v10749_v5  ;;  %v11339_v54 = vrot.slane %v7307_v14, %v10749_v5  ;;  %v7324_v47 = vcombine.high %v10148_v40, %v10148_v40  ;;  %v7331_v16 = vrot.slane %v10148_v40, %v10749_v5 }
  0x95   : > { %v6981_v50 = vpack.c.bf16 %v6804_v8, %v6787_v36  ;;  %v4688_v15 = vrot.slane %v4674_v11, %v10749_v5  ;;  %v11346_v37 = vrot.slane %v11326_v62, %v10749_v5  ;;  %v7743_v31 = vcombine.low %v11202_v46, %v11332_v30 }
  0x96   : > { %v4672_v28 = vcombine.low %v4664_v9, %v4671_v51  ;;  %v11352_v6 = vcombine.high %v11339_v54, %v11339_v54  ;;  %v7338_v49 = vrot.slane %v7324_v47, %v10749_v5  ;;  %v7339_v35 = vcombine.high %v7331_v16, %v7331_v16 }
  0x97   : > { %9153 = vrot.lane.b32.xlu1 %v6981_v50, %s10666_s6  ;;  %v4689_v13 = vcombine.low %v4681_v24, %v4688_v15  ;;  %v11357_v52 = vrot.slane %v7743_v31, %v10749_v5  ;;  %v5181_v63 = vcombine.high %v10080_v56, %v10080_v56  ;;  %v5188_v58 = vrot.slane %v10080_v56, %v10749_v5  ;;  %v10108_v24 = vld [vmem:[%s10747_s28 + $0x48] sm:$0x3f] }
  0x98   : > { %v7744_v46 = vcombine.low %v11339_v54, %v11352_v6  ;;  %v7760_v19 = vcombine.low %v7331_v16, %v7339_v35  ;;  %v7761_v22 = vcombine.low %v7338_v49, %v11346_v37  ;;  %v5197_v23 = vcombine.high %v11102_v4, %v11102_v4 }
  0x99   : > { %v5031_v57 = vpack.c.bf16 %v4689_v13, %v4672_v28  ;;  %v5195_v55 = vrot.slane %v5181_v63, %v10749_v5  ;;  %v5196_v25 = vcombine.high %v5188_v58, %v5188_v58  ;;  %v5628_v26 = vcombine.low %v11107_v20, %v11116_v41  ;;  %v11381_v20 = vld [vmem:[%s10747_s28 + $0xb2] sm:$0xff] }
  0x9a   : > { %v11369_v27 = vrot.slane %v7744_v46, %v10749_v5  ;;  %v7768_v32 = vrot.slane %v7760_v19, %v10749_v5  ;;  %v7775_v34 = vrot.slane %v7761_v22, %v10749_v5  ;;  %v11374_v42 = vrot.slane %v5197_v23, %v10749_v5  ;;  %v10109_v28 = vld [vmem:[%s10747_s28 + $0x50] sm:$0xff] }
  0x9b   : > { %9065 = vrot.lane.b32.xlu0 %v5031_v57, %s10664_s4  ;;  %v5629_v4 = vcombine.low %v5188_v58, %v5196_v25  ;;  %v5636_v38 = vrot.slane %v5628_v26, %v10749_v5  ;;  %v5645_v45 = vcombine.low %v5195_v55, %v11120_v17  ;;  %v8279_v40 = vcombine.high %v11221_v43, %v11221_v43 }
  0x9c   : > { %v7759_v12 = vcombine.low %v11357_v52, %v11369_v27  ;;  %v7776_v9 = vcombine.low %v7768_v32, %v7775_v34  ;;  %v5646_v14 = vcombine.low %v11129_v29, %v11374_v42  ;;  %v11391_v36 = vcombine.high %v11240_v48, %v11240_v48 }
  0x9d   : > { %v5643_v8 = vrot.slane %v5629_v4, %v10749_v5  ;;  %v5653_v17 = vrot.slane %v5645_v45, %v10749_v5  ;;  %v11396_v11 = vrot.slane %v8279_v40, %v10749_v5  ;;  %v8296_v43 = vcombine.high %v10176_v33, %v10176_v33  ;;  %v10137_v40 = vld [vmem:[%s10747_s28 + $0x51] sm:$0xff] }
  0x9e   : > { %v7953_v51 = vpack.c.bf16 %v7776_v9, %v7759_v12  ;;  %v5660_v47 = vrot.slane %v5646_v14, %v10749_v5  ;;  %v8303_v16 = vrot.slane %v10176_v33, %v10749_v5  ;;  %v11403_v29 = vrot.slane %v11381_v20, %v10749_v5  ;;  %v10136_v33 = vld [vmem:[%s10747_s28 + $0x49] sm:$0x3f] }
  0x9f   : > { %v5644_v56 = vcombine.low %v5636_v38, %v5643_v8  ;;  %v11407_v50 = vcombine.high %v11396_v11, %v11396_v11  ;;  %v8310_v15 = vrot.slane %v8296_v43, %v10749_v5  ;;  %v8715_v31 = vcombine.low %v11240_v48, %v11391_v36 }
  0xa0   : > { %9192 = vrot.lane.b32.xlu1 %v7953_v51, %s10669_s9  ;;  %v5661_v49 = vcombine.low %v5653_v17, %v5660_v47  ;;  %v8311_v35 = vcombine.high %v8303_v16, %v8303_v16  ;;  %v11416_v13 = vcombine.high %v11269_v60, %v11269_v60  ;;  %v6154_v63 = vcombine.high %v10108_v24, %v10108_v24 }
  0xa1   : > { %v8716_v58 = vcombine.low %v11396_v11, %v11407_v50  ;;  %v11421_v46 = vrot.slane %v8715_v31, %v10749_v5  ;;  %v8733_v48 = vcombine.low %v8310_v15, %v11403_v29  ;;  %v6161_v19 = vrot.slane %v10108_v24, %v10749_v5 }
  0xa2   : > { %v6003_v22 = vpack.c.bf16 %v5661_v49, %v5644_v56  ;;  %v8732_v23 = vcombine.low %v8303_v16, %v8311_v35  ;;  %v6168_v57 = vrot.slane %v6154_v63, %v10749_v5  ;;  %v6170_v55 = vcombine.high %v10109_v28, %v10109_v28  ;;  %v1172_v63 = vld [vmem:[%s10747_s28 + $0x99] sm:$0x3f] }
  0xa3   : > { %v11427_v25 = vrot.slane %v8716_v58, %v10749_v5  ;;  %v8747_v26 = vrot.slane %v8733_v48, %v10749_v5  ;;  %v6169_v32 = vcombine.high %v6161_v19, %v6161_v19  ;;  %v11431_v34 = vrot.slane %v10109_v28, %v10749_v5 }
  0xa4   : > { %9104 = vrot.lane.b32.xlu0 %v6003_v22, %s10667_s7  ;;  %v8740_v4 = vrot.slane %v8732_v23, %v10749_v5  ;;  %v11437_v38 = vrot.slane %v6170_v55, %v10749_v5  ;;  %v6601_v45 = vcombine.low %v11269_v60, %v11416_v13  ;;  %v11444_v12 = vcombine.high %v11319_v53, %v11319_v53 }
  0xa5   : > { %v8731_v9 = vcombine.low %v11421_v46, %v11427_v25  ;;  %v11450_v14 = vcombine.high %v11431_v34, %v11431_v34  ;;  %v6602_v8 = vcombine.low %v6161_v19, %v6169_v32  ;;  %v6618_v17 = vcombine.low %v6168_v57, %v11431_v34 }
  0xa6   : > { %v8748_v43 = vcombine.low %v8740_v4, %v8747_v26  ;;  %v6609_v24 = vrot.slane %v6601_v45, %v10749_v5  ;;  %v7126_v60 = vcombine.high %v10136_v33, %v10136_v33  ;;  %v7133_v51 = vrot.slane %v10136_v33, %v10749_v5 }
  0xa7   : > { %v6616_v47 = vrot.slane %v6602_v8, %v10749_v5  ;;  %v6619_v16 = vcombine.low %v11450_v14, %v11437_v38  ;;  %v6626_v56 = vrot.slane %v6618_v17, %v10749_v5  ;;  %v7142_v15 = vcombine.high %v10137_v40, %v10137_v40 }
  0xa8   : > { %v8925_v31 = vpack.c.bf16 %v8748_v43, %v8731_v9  ;;  %v7140_v28 = vrot.slane %v7126_v60, %v10749_v5  ;;  %v7141_v49 = vcombine.high %v7133_v51, %v7133_v51  ;;  %v11461_v35 = vrot.slane %v10137_v40, %v10749_v5  ;;  %v10164_v9 = vld [vmem:[%s10747_s28 + $0x4a] sm:$0x3f] }
  0xa9   : > { %v6617_v58 = vcombine.low %v6609_v24, %v6616_v47  ;;  %v6633_v48 = vrot.slane %v6619_v16, %v10749_v5  ;;  %v11466_v19 = vrot.slane %v7142_v15, %v10749_v5  ;;  %v7573_v22 = vcombine.low %v11319_v53, %v11444_v12  ;;  %v10165_v16 = vld [vmem:[%s10747_s28 + $0x52] sm:$0xff] }
  0xaa   : > { %9231 = vrot.lane.b32.xlu1 %v8925_v31, %s10668_s8  ;;  %v11473_v23 = vcombine.high %v11461_v35, %v11461_v35  ;;  %v7574_v57 = vcombine.low %v7133_v51, %v7141_v49  ;;  %v7590_v55 = vcombine.low %v7140_v28, %v11461_v35  ;;  %v1523_v33 = vcombine.high %v1172_v63, %v1172_v63 }
  0xab   : > { %v6634_v26 = vcombine.low %v6626_v56, %v6633_v48  ;;  %v7581_v32 = vrot.slane %v7573_v22, %v10749_v5  ;;  %v1530_v4 = vrot.slane %v1172_v63, %v10749_v5  ;;  %v1943_v24 = vcombine.low %v11190_v2, %v11186_v1  ;;  %v2144_v22 = vld [vmem:[%s10747_s28 + $0x9a] sm:$0x3f] }
  0xac   : > { %v7588_v45 = vrot.slane %v7574_v57, %v10749_v5  ;;  %v7591_v53 = vcombine.low %v11473_v23, %v11466_v19  ;;  %v7598_v40 = vrot.slane %v7590_v55, %v10749_v5  ;;  %v1537_v17 = vrot.slane %v1523_v33, %v10749_v5 }
  0xad   : > { %v6976_v8 = vpack.c.bf16 %v6634_v26, %v6617_v58  ;;  %v1538_v43 = vcombine.high %v1530_v4, %v1530_v4  ;;  %v1944_v47 = vcombine.low %v11197_v39, %v1530_v4  ;;  %v1951_v56 = vrot.slane %v1943_v24, %v10749_v5  ;;  %v10038_v24 = vld [vmem:[%s10747_s28 + $0xa8] sm:$0x3f] }
  0xae   : > { %v7589_v60 = vcombine.low %v7581_v32, %v7588_v45  ;;  %v11487_v51 = vrot.slane %v7591_v53, %v10749_v5  ;;  %v11495_v31 = vcombine.high %v11374_v42, %v11374_v42  ;;  %v8098_v28 = vcombine.high %v10164_v9, %v10164_v9 }
  0xaf   : > { %9143 = vrot.lane.b32.xlu0 %v6976_v8, %s10666_s6  ;;  %v1960_v15 = vcombine.low %v1538_v43, %v1537_v17  ;;  %v1958_v2 = vrot.slane %v1944_v47, %v10749_v5  ;;  %v8105_v49 = vrot.slane %v10164_v9, %v10749_v5  ;;  %v8114_v58 = vcombine.high %v10165_v16, %v10165_v16 }
  0xb0   : > { %v7606_v1 = vcombine.low %v7598_v40, %v11487_v51  ;;  %v8112_v39 = vrot.slane %v8098_v28, %v10749_v5  ;;  %v11503_v48 = vrot.slane %v10165_v16, %v10749_v5  ;;  %v8545_v32 = vcombine.low %v11374_v42, %v11495_v31 }
  0xb1   : > { %v1968_v63 = vrot.slane %v1960_v15, %v10749_v5  ;;  %v1959_v55 = vcombine.low %v1951_v56, %v1958_v2  ;;  %v8113_v26 = vcombine.high %v8105_v49, %v8105_v49  ;;  %v11510_v4 = vrot.slane %v8114_v58, %v10749_v5 }
  0xb2   : > { %v7948_v57 = vpack.c.bf16 %v7606_v1, %v7589_v60  ;;  %v11514_v45 = vcombine.high %v11503_v48, %v11503_v48  ;;  %v8562_v53 = vcombine.low %v8112_v39, %v11503_v48  ;;  %v8553_v9 = vrot.slane %v8545_v32, %v10749_v5 }
  0xb3   : > { %v1976_v33 = vcombine.low %v1968_v63, %v11357_v52  ;;  %v8546_v40 = vcombine.low %v8105_v49, %v8113_v26  ;;  %v2495_v8 = vcombine.high %v2144_v22, %v2144_v22  ;;  %v2502_v43 = vrot.slane %v2144_v22, %v10749_v5 }
  0xb4   : > { %9182 = vrot.lane.b32.xlu1 %v7948_v57, %s10669_s9  ;;  %v8563_v42 = vcombine.low %v11514_v45, %v11510_v4  ;;  %v8570_v52 = vrot.slane %v8562_v53, %v10749_v5  ;;  %v2915_v16 = vcombine.low %v11228_v44, %v11235_v0  ;;  %v3468_v49 = vcombine.high %v10038_v24, %v10038_v24  ;;  %v1160_v57 = vld [vmem:[%s10747_s28 + $0x39] sm:$0x3f]  ;;  %v1161_v53 = vld [vmem:[%s10747_s28 + $0x41] sm:$0xff] }
  0xb5   : > { %v2120_v17 = vpack.c.bf16 %v1976_v33, %v1959_v55  ;;  %v8560_v60 = vrot.slane %v8546_v40, %v10749_v5  ;;  %v2509_v47 = vrot.slane %v2495_v8, %v10749_v5  ;;  %v2510_v15 = vcombine.high %v2502_v43, %v2502_v43 }
  0xb6   : > { %v11530_v56 = vrot.slane %v8563_v42, %v10749_v5  ;;  %v2916_v28 = vcombine.low %v11247_v10, %v2502_v43  ;;  %v2923_v2 = vrot.slane %v2915_v16, %v10749_v5  ;;  %v3475_v44 = vrot.slane %v10038_v24, %v10749_v5 }
  0xb7   : > { %8960 = vrot.lane.b32.xlu0 %v2120_v17, %s10663_s30  ;;  %v8561_v1 = vcombine.low %v8553_v9, %v8560_v60  ;;  %v2932_v58 = vcombine.low %v2510_v15, %v2509_v47  ;;  %v3482_v0 = vrot.slane %v3468_v49, %v10749_v5  ;;  %v11540_v22 = vcombine.high %v11296_v7, %v11296_v7  ;;  %v10066_v60 = vld [vmem:[%s10747_s28 + $0xa9] sm:$0x3f] }
  0xb8   : > { %v8578_v63 = vcombine.low %v8570_v52, %v11530_v56  ;;  %v2930_v39 = vrot.slane %v2916_v28, %v10749_v5  ;;  %v3888_v10 = vcombine.low %v11284_v61, %v11289_v3  ;;  %v3483_v33 = vcombine.high %v3475_v44, %v3475_v44 }
  0xb9   : > { %v2940_v32 = vrot.slane %v2932_v58, %v10749_v5  ;;  %v3889_v40 = vcombine.low %v11303_v18, %v3475_v44  ;;  %v3906_v8 = vcombine.low %v11296_v7, %v11540_v22  ;;  %v1325_v3 = vcombine.high %v1160_v57, %v1160_v57 }
  0xba   : > { %v8920_v55 = vpack.c.bf16 %v8578_v63, %v8561_v1  ;;  %v2931_v26 = vcombine.low %v2923_v2, %v2930_v39  ;;  %v3896_v9 = vrot.slane %v3888_v10, %v10749_v5  ;;  %v3905_v61 = vcombine.low %v3483_v33, %v3482_v0 }
  0xbb   : > { %v2948_v17 = vcombine.low %v2940_v32, %v11421_v46  ;;  %v1332_v42 = vrot.slane %v1160_v57, %v10749_v5  ;;  %v3903_v52 = vrot.slane %v3889_v40, %v10749_v5  ;;  %v3920_v43 = vrot.slane %v3906_v8, %v10749_v5  ;;  %v2132_v32 = vld [vmem:[%s10747_s28 + $0x3a] sm:$0x3f]  ;;  %v2133_v8 = vld [vmem:[%s10747_s28 + $0x42] sm:$0xff] }
  0xbc   : > { %9221 = vrot.lane.b32.xlu1 %v8920_v55, %s10668_s8  ;;  %v1341_v24 = vcombine.high %v1161_v53, %v1161_v53  ;;  %v1348_v18 = vrot.slane %v1161_v53, %v10749_v5  ;;  %v3913_v16 = vrot.slane %v3905_v61, %v10749_v5  ;;  %v1339_v7 = vrot.slane %v1325_v3, %v10749_v5 }
  0xbd   : > { %v3092_v47 = vpack.c.bf16 %v2948_v17, %v2931_v26  ;;  %v1340_v15 = vcombine.high %v1332_v42, %v1332_v42  ;;  %v3904_v28 = vcombine.low %v3896_v9, %v3903_v52  ;;  %v1773_v2 = vcombine.low %v11060_v21, %v1332_v42 }
  0xbe   : > { %v1355_v46 = vrot.slane %v1341_v24, %v10749_v5  ;;  %v1356_v1 = vcombine.high %v1348_v18, %v1348_v18  ;;  %v3921_v49 = vcombine.low %v3913_v16, %v3920_v43  ;;  %v4440_v39 = vcombine.high %v10066_v60, %v10066_v60 }
  0xbf   : > { %8999 = vrot.lane.b32.xlu0 %v3092_v47, %s10665_s5  ;;  %v1774_v63 = vcombine.low %v1340_v15, %v1339_v7  ;;  %v1781_v44 = vrot.slane %v1773_v2, %v10749_v5  ;;  %v4447_v10 = vrot.slane %v10066_v60, %v10749_v5  ;;  %v11569_v21 = vcombine.high %v11346_v37, %v11346_v37  ;;  %v10094_v15 = vld [vmem:[%s10747_s28 + $0xaa] sm:$0x3f] }
  0xc0   : > { %v1357_v58 = vcombine.high %v1355_v46, %v1355_v46  ;;  %v1790_v0 = vcombine.low %v1348_v18, %v1356_v1  ;;  %v4065_v57 = vpack.c.bf16 %v3921_v49, %v3904_v28  ;;  %v4454_v26 = vrot.slane %v4440_v39, %v10749_v5 }
  0xc1   : > { %v1788_v55 = vrot.slane %v1774_v63, %v10749_v5  ;;  %v4455_v40 = vcombine.high %v4447_v10, %v4447_v10  ;;  %v4860_v9 = vcombine.low %v11332_v30, %v11339_v54  ;;  %v4861_v61 = vcombine.low %v11352_v6, %v4447_v10 }
  0xc2   : > { %v1791_v33 = vcombine.low %v1355_v46, %v1357_v58  ;;  %v1798_v53 = vrot.slane %v1790_v0, %v10749_v5  ;;  %9038 = vrot.lane.b32.xlu1 %v4065_v57, %s10662_s29  ;;  %v4878_v3 = vcombine.low %v11346_v37, %v11569_v21  ;;  %v2297_v24 = vcombine.high %v2132_v32, %v2132_v32 }
  0xc3   : > { %v1789_v17 = vcombine.low %v1781_v44, %v1788_v55  ;;  %v4868_v52 = vrot.slane %v4860_v9, %v10749_v5  ;;  %v4877_v43 = vcombine.low %v4455_v40, %v4454_v26  ;;  %v4875_v18 = vrot.slane %v4861_v61, %v10749_v5  ;;  %v10026_v9 = vld [vmem:[%s10747_s28 + $0x48] sm:$0x3f] }
  0xc4   : > { %v1805_v42 = vrot.slane %v1791_v33, %v10749_v5  ;;  %v4892_v30 = vrot.slane %v4878_v3, %v10749_v5  ;;  %v2304_v54 = vrot.slane %v2132_v32, %v10749_v5  ;;  %v2313_v60 = vcombine.high %v2133_v8, %v2133_v8 }
  0xc5   : > { %v4885_v16 = vrot.slane %v4877_v43, %v10749_v5  ;;  %v2311_v6 = vrot.slane %v2297_v24, %v10749_v5  ;;  %v2320_v7 = vrot.slane %v2133_v8, %v10749_v5  ;;  %v4876_v28 = vcombine.low %v4868_v52, %v4875_v18 }
  0xc6   : > { %v1806_v47 = vcombine.low %v1798_v53, %v1805_v42  ;;  %v2312_v46 = vcombine.high %v2304_v54, %v2304_v54  ;;  %v2327_v1 = vrot.slane %v2313_v60, %v10749_v5  ;;  %v2745_v2 = vcombine.low %v11116_v41, %v2304_v54 }
  0xc7   : > { %v4893_v63 = vcombine.low %v4885_v16, %v4892_v30  ;;  %v2328_v39 = vcombine.high %v2320_v7, %v2320_v7  ;;  %v5412_v10 = vcombine.high %v10094_v15, %v10094_v15  ;;  %v5419_v26 = vrot.slane %v10094_v15, %v10749_v5 }
  0xc8   : > { %v2115_v49 = vpack.c.bf16 %v1806_v47, %v1789_v17  ;;  %v2329_v58 = vcombine.high %v2327_v1, %v2327_v1  ;;  %v2746_v44 = vcombine.low %v2312_v46, %v2311_v6  ;;  %v2753_v0 = vrot.slane %v2745_v2, %v10749_v5 }
  0xc9   : > { %v5037_v57 = vpack.c.bf16 %v4893_v63, %v4876_v28  ;;  %v2762_v55 = vcombine.low %v2320_v7, %v2328_v39  ;;  %v11596_v32 = vcombine.high %v11403_v29, %v11403_v29  ;;  %v5426_v53 = vrot.slane %v5412_v10, %v10749_v5  ;;  %v10122_v7 = vld [vmem:[%s10747_s28 + $0xb8] sm:$0x3f] }
  0xca   : > { %8950 = vrot.lane.b32.xlu0 %v2115_v49, %s10663_s30  ;;  %v2760_v41 = vrot.slane %v2746_v44, %v10749_v5  ;;  %v2763_v33 = vcombine.low %v2327_v1, %v2329_v58  ;;  %v5832_v40 = vcombine.low %v11391_v36, %v11396_v11  ;;  %v5427_v17 = vcombine.high %v5419_v26, %v5419_v26  ;;  %v11628_v49 = vld [vmem:[%s10747_s28 + $0xc0] sm:$0xff] }
  0xcb   : > { %9077 = vrot.lane.b32.xlu1 %v5037_v57, %s10664_s4  ;;  %v2770_v8 = vrot.slane %v2762_v55, %v10749_v5  ;;  %v5833_v61 = vcombine.low %v11407_v50, %v5419_v26  ;;  %v5850_v3 = vcombine.low %v11403_v29, %v11596_v32  ;;  %v3270_v18 = vcombine.high %v10026_v9, %v10026_v9  ;;  %v10054_v57 = vld [vmem:[%s10747_s28 + $0x49] sm:$0x3f] }
  0xcc   : > { %v2761_v42 = vcombine.low %v2753_v0, %v2760_v41  ;;  %v2777_v52 = vrot.slane %v2763_v33, %v10749_v5  ;;  %v5840_v43 = vrot.slane %v5832_v40, %v10749_v5  ;;  %v5849_v36 = vcombine.low %v5427_v17, %v5426_v53 }
  0xcd   : > { %v5847_v24 = vrot.slane %v5833_v61, %v10749_v5  ;;  %v5864_v11 = vrot.slane %v5850_v3, %v10749_v5  ;;  %v3277_v54 = vrot.slane %v10026_v9, %v10749_v5  ;;  %v11615_v50 = vcombine.high %v11437_v38, %v11437_v38 }
  0xce   : > { %v2778_v30 = vcombine.low %v2770_v8, %v2777_v52  ;;  %v3735_v60 = vcombine.low %v11431_v34, %v11450_v14  ;;  %v5857_v16 = vrot.slane %v5849_v36, %v10749_v5  ;;  %v3284_v6 = vrot.slane %v3270_v18, %v10749_v5 }
  0xcf   : > { %v5848_v47 = vcombine.low %v5840_v43, %v5847_v24  ;;  %v6368_v15 = vcombine.high %v11274_v59, %v11274_v59  ;;  %v3285_v46 = vcombine.high %v3277_v54, %v3277_v54  ;;  %v3718_v1 = vcombine.low %v11416_v13, %v3277_v54 }
  0xd0   : > { %v3087_v28 = vpack.c.bf16 %v2778_v30, %v2761_v42  ;;  %v3736_v2 = vcombine.low %v11437_v38, %v11615_v50  ;;  %v5865_v34 = vcombine.low %v5857_v16, %v5864_v11  ;;  %v3743_v14 = vrot.slane %v3735_v60, %v10749_v5  ;;  %v10150_v30 = vld [vmem:[%s10747_s28 + $0xb9] sm:$0x3f] }
  0xd1   : > { %v11632_v63 = vrot.slane %v6368_v15, %v10749_v5  ;;  %v3719_v39 = vcombine.low %v3285_v46, %v3284_v6  ;;  %v3726_v59 = vrot.slane %v3718_v1, %v10749_v5  ;;  %v6385_v44 = vcombine.high %v10122_v7, %v10122_v7 }
  0xd2   : > { %8989 = vrot.lane.b32.xlu0 %v3087_v28, %s10665_s5  ;;  %v3750_v58 = vrot.slane %v3736_v2, %v10749_v5  ;;  %v6009_v13 = vpack.c.bf16 %v5865_v34, %v5848_v47  ;;  %v6392_v0 = vrot.slane %v10122_v7, %v10749_v5  ;;  %v11644_v10 = vrot.slane %v11628_v49, %v10749_v5  ;;  %v11678_v28 = vld [vmem:[%s10747_s28 + $0xc1] sm:$0xff] }
  0xd3   : > { %v11639_v38 = vcombine.high %v11632_v63, %v11632_v63  ;;  %v3733_v55 = vrot.slane %v3719_v39, %v10749_v5  ;;  %v6399_v41 = vrot.slane %v6385_v44, %v10749_v5  ;;  %v6805_v33 = vcombine.low %v11540_v22, %v11632_v63 }
  0xd4   : > { %v3751_v26 = vcombine.low %v3743_v14, %v3750_v58  ;;  %9116 = vrot.lane.b32.xlu1 %v6009_v13, %s10667_s7  ;;  %v6400_v53 = vcombine.high %v6392_v0, %v6392_v0  ;;  %v11654_v40 = vcombine.high %v11644_v10, %v11644_v10  ;;  %v4242_v61 = vcombine.high %v10054_v57, %v10054_v57 }
  0xd5   : > { %v6806_v9 = vcombine.low %v11639_v38, %v6392_v0  ;;  %v3734_v8 = vcombine.low %v3726_v59, %v3733_v55  ;;  %v6813_v17 = vrot.slane %v6805_v33, %v10749_v5  ;;  %v4249_v3 = vrot.slane %v10054_v57, %v10749_v5  ;;  %v10082_v59 = vld [vmem:[%s10747_s28 + $0x4a] sm:$0x3f] }
  0xd6   : > { %v6822_v52 = vcombine.low %v6400_v53, %v6399_v41  ;;  %v6823_v22 = vcombine.low %v11644_v10, %v11654_v40  ;;  %v11664_v43 = vcombine.high %v11466_v19, %v11466_v19  ;;  %v4256_v36 = vrot.slane %v4242_v61, %v10749_v5 }
  0xd7   : > { %v6820_v42 = vrot.slane %v6806_v9, %v10749_v5  ;;  %v4060_v24 = vpack.c.bf16 %v3751_v26, %v3734_v8  ;;  %v4257_v11 = vcombine.high %v4249_v3, %v4249_v3  ;;  %v4690_v18 = vcombine.low %v11444_v12, %v4249_v3 }
  0xd8   : > { %v6830_v60 = vrot.slane %v6822_v52, %v10749_v5  ;;  %v6837_v47 = vrot.slane %v6823_v22, %v10749_v5  ;;  %v4707_v16 = vcombine.low %v11461_v35, %v11473_v23  ;;  %v4708_v15 = vcombine.low %v11466_v19, %v11664_v43 }
  0xd9   : > { %v6821_v54 = vcombine.low %v6813_v17, %v6820_v42  ;;  %9028 = vrot.lane.b32.xlu0 %v4060_v24, %s10662_s29  ;;  %v4691_v6 = vcombine.low %v4257_v11, %v4256_v36  ;;  %v4698_v7 = vrot.slane %v4690_v18, %v10749_v5  ;;  %v7340_v12 = vcombine.high %v11326_v62, %v11326_v62 }
  0xda   : > { %v6838_v46 = vcombine.low %v6830_v60, %v6837_v47  ;;  %v4715_v1 = vrot.slane %v4707_v16, %v10749_v5  ;;  %v7357_v2 = vcombine.high %v10150_v30, %v10150_v30  ;;  %v4722_v23 = vrot.slane %v4708_v15, %v10749_v5  ;;  %v11729_v60 = vld [vmem:[%s10747_s28 + $0xc2] sm:$0xff] }
  0xdb   : > { %v4705_v34 = vrot.slane %v4691_v6, %v10749_v5  ;;  %v11686_v14 = vrot.slane %v7340_v12, %v10749_v5  ;;  %v7364_v39 = vrot.slane %v10150_v30, %v10749_v5  ;;  %v11693_v62 = vrot.slane %v11678_v28, %v10749_v5 }
  0xdc   : > { %v6982_v19 = vpack.c.bf16 %v6838_v46, %v6821_v54  ;;  %v7371_v58 = vrot.slane %v7357_v2, %v10749_v5  ;;  %v4723_v13 = vcombine.low %v4715_v1, %v4722_v23  ;;  %v5214_v41 = vcombine.high %v10082_v59, %v10082_v59  ;;  %v10178_v54 = vld [vmem:[%s10747_s28 + $0xba] sm:$0x3f] }
  0xdd   : > { %v4706_v44 = vcombine.low %v4698_v7, %v4705_v34  ;;  %v11697_v0 = vcombine.high %v11686_v14, %v11686_v14  ;;  %v7372_v57 = vcombine.high %v7364_v39, %v7364_v39  ;;  %v11702_v55 = vcombine.high %v11693_v62, %v11693_v62  ;;  %v10110_v1 = vld [vmem:[%s10747_s28 + $0x58] sm:$0x3f] }
  0xde   : > { %9155 = vrot.lane.b32.xlu1 %v6982_v19, %s10666_s6  ;;  %v7777_v26 = vcombine.low %v11569_v21, %v11686_v14  ;;  %v5221_v33 = vrot.slane %v10082_v59, %v10749_v5  ;;  %v11710_v17 = vcombine.high %v11510_v4, %v11510_v4  ;;  %v5228_v21 = vrot.slane %v5214_v41, %v10749_v5  ;;  %v10111_v59 = vld [vmem:[%s10747_s28 + $0x60] sm:$0xff] }
  0xdf   : > { %v5032_v53 = vpack.c.bf16 %v4723_v13, %v4706_v44  ;;  %v7778_v9 = vcombine.low %v11697_v0, %v7364_v39  ;;  %v7794_v8 = vcombine.low %v7372_v57, %v7371_v58  ;;  %v7795_v3 = vcombine.low %v11693_v62, %v11702_v55 }
  0xe0   : > { %v11713_v61 = vrot.slane %v7777_v26, %v10749_v5  ;;  %v5229_v42 = vcombine.high %v5221_v33, %v5221_v33  ;;  %v5662_v24 = vcombine.low %v11495_v31, %v5221_v33  ;;  %v5679_v36 = vcombine.low %v11503_v48, %v11514_v45 }
  0xe1   : > { %9067 = vrot.lane.b32.xlu0 %v5032_v53, %s10664_s4  ;;  %v7792_v52 = vrot.slane %v7778_v9, %v10749_v5  ;;  %v7802_v22 = vrot.slane %v7794_v8, %v10749_v5  ;;  %v7809_v11 = vrot.slane %v7795_v3, %v10749_v5  ;;  %v5680_v30 = vcombine.low %v11510_v4, %v11710_v17 }
  0xe2   : > { %v5663_v18 = vcombine.low %v5229_v42, %v5228_v21  ;;  %v8312_v47 = vcombine.high %v11381_v20, %v11381_v20  ;;  %v5670_v31 = vrot.slane %v5662_v24, %v10749_v5  ;;  %v5687_v45 = vrot.slane %v5679_v36, %v10749_v5 }
  0xe3   : > { %v7793_v16 = vcombine.low %v11713_v61, %v7792_v52  ;;  %v7810_v6 = vcombine.low %v7802_v22, %v7809_v11  ;;  %v5694_v15 = vrot.slane %v5680_v30, %v10749_v5  ;;  %v8329_v12 = vcombine.high %v10178_v54, %v10178_v54  ;;  %v10138_v22 = vld [vmem:[%s10747_s28 + $0x59] sm:$0x3f]  ;;  %v10139_v30 = vld [vmem:[%s10747_s28 + $0x61] sm:$0xff] }
  0xe4   : > { %v5677_v7 = vrot.slane %v5663_v18, %v10749_v5  ;;  %v11739_v4 = vrot.slane %v8312_v47, %v10749_v5  ;;  %v8336_v46 = vrot.slane %v10178_v54, %v10749_v5  ;;  %v11744_v20 = vrot.slane %v11729_v60, %v10749_v5 }
  0xe5   : > { %v7954_v2 = vpack.c.bf16 %v7810_v6, %v7793_v16  ;;  %v5695_v23 = vcombine.low %v5687_v45, %v5694_v15  ;;  %v8343_v19 = vrot.slane %v8329_v12, %v10749_v5  ;;  %v6187_v41 = vcombine.high %v10110_v1, %v10110_v1 }
  0xe6   : > { %v5678_v34 = vcombine.low %v5670_v31, %v5677_v7  ;;  %v11749_v39 = vcombine.high %v11739_v4, %v11739_v4  ;;  %v8344_v58 = vcombine.high %v8336_v46, %v8336_v46  ;;  %v11755_v44 = vcombine.high %v11744_v20, %v11744_v20 }
  0xe7   : > { %v8749_v13 = vcombine.low %v11596_v32, %v11739_v4  ;;  %9194 = vrot.lane.b32.xlu1 %v7954_v2, %s10669_s9  ;;  %v6194_v33 = vrot.slane %v10110_v1, %v10749_v5  ;;  %v6203_v3 = vcombine.high %v10111_v59, %v10111_v59  ;;  %v6201_v21 = vrot.slane %v6187_v41, %v10749_v5  ;;  %v1174_v1 = vld [vmem:[%s10747_s28 + $0xa9] sm:$0x3f] }
  0xe8   : > { %v6004_v57 = vpack.c.bf16 %v5695_v23, %v5678_v34  ;;  %v8750_v26 = vcombine.low %v11749_v39, %v8336_v46  ;;  %v8766_v9 = vcombine.low %v8344_v58, %v8343_v19  ;;  %v8767_v8 = vcombine.low %v11744_v20, %v11755_v44 }
  0xe9   : > { %v11763_v53 = vrot.slane %v8749_v13, %v10749_v5  ;;  %v6202_v42 = vcombine.high %v6194_v33, %v6194_v33  ;;  %v11771_v52 = vrot.slane %v10111_v59, %v10749_v5  ;;  %v11777_v11 = vrot.slane %v6203_v3, %v10749_v5 }
  0xea   : > { %9106 = vrot.lane.b32.xlu0 %v6004_v57, %s10667_s7  ;;  %v8764_v32 = vrot.slane %v8750_v26, %v10749_v5  ;;  %v8774_v24 = vrot.slane %v8766_v9, %v10749_v5  ;;  %v8781_v36 = vrot.slane %v8767_v8, %v10749_v5  ;;  %v6635_v18 = vcombine.low %v11615_v50, %v6194_v33  ;;  %v10166_v8 = vld [vmem:[%s10747_s28 + $0x5a] sm:$0x3f] }
  0xeb   : > { %v11784_v47 = vcombine.high %v11771_v52, %v11771_v52  ;;  %v6636_v16 = vcombine.low %v6202_v42, %v6201_v21  ;;  %v11788_v45 = vcombine.high %v11777_v11, %v11777_v11  ;;  %v7159_v7 = vcombine.high %v10138_v22, %v10138_v22 }
  0xec   : > { %v8765_v54 = vcombine.low %v11763_v53, %v8764_v32  ;;  %v8782_v31 = vcombine.low %v8774_v24, %v8781_v36  ;;  %v6643_v6 = vrot.slane %v6635_v18, %v10749_v5  ;;  %v7166_v12 = vrot.slane %v10138_v22, %v10749_v5 }
  0xed   : > { %v6650_v15 = vrot.slane %v6636_v16, %v10749_v5  ;;  %v6652_v50 = vcombine.low %v11771_v52, %v11784_v47  ;;  %v7175_v46 = vcombine.high %v10139_v30, %v10139_v30  ;;  %v6653_v34 = vcombine.low %v11777_v11, %v11788_v45  ;;  %v10167_v16 = vld [vmem:[%s10747_s28 + $0x62] sm:$0xff] }
  0xee   : > { %v8926_v2 = vpack.c.bf16 %v8782_v31, %v8765_v54  ;;  %v7173_v23 = vrot.slane %v7159_v7, %v10749_v5  ;;  %v11800_v59 = vrot.slane %v10139_v30, %v10749_v5  ;;  %v7174_v13 = vcombine.high %v7166_v12, %v7166_v12 }
  0xef   : > { %v6651_v19 = vcombine.low %v6643_v6, %v6650_v15  ;;  %v6660_v58 = vrot.slane %v6652_v50, %v10749_v5  ;;  %v11804_v57 = vrot.slane %v7175_v46, %v10749_v5  ;;  %v6667_v26 = vrot.slane %v6653_v34, %v10749_v5 }
  0xf0   : > { %9233 = vrot.lane.b32.xlu1 %v8926_v2, %s10668_s8  ;;  %v11810_v41 = vcombine.high %v11800_v59, %v11800_v59  ;;  %v7607_v33 = vcombine.low %v11664_v43, %v7166_v12  ;;  %v1556_v9 = vcombine.high %v1174_v1, %v1174_v1  ;;  %v7608_v32 = vcombine.low %v7174_v13, %v7173_v23  ;;  %v2146_v12 = vld [vmem:[%s10747_s28 + $0xaa] sm:$0x3f] }
  0xf1   : > { %v11816_v3 = vcombine.high %v11804_v57, %v11804_v57  ;;  %v1563_v21 = vrot.slane %v1174_v1, %v10749_v5  ;;  %v6668_v42 = vcombine.low %v6660_v58, %v6667_v26  ;;  %v8131_v31 = vcombine.high %v10166_v8, %v10166_v8 }
  0xf2   : > { %v7615_v22 = vrot.slane %v7607_v33, %v10749_v5  ;;  %v7624_v24 = vcombine.low %v11800_v59, %v11810_v41  ;;  %v1570_v36 = vrot.slane %v1556_v9, %v10749_v5  ;;  %v7622_v18 = vrot.slane %v7608_v32, %v10749_v5 }
  0xf3   : > { %v7625_v30 = vcombine.low %v11804_v57, %v11816_v3  ;;  %v1571_v54 = vcombine.high %v1563_v21, %v1563_v21  ;;  %v6977_v6 = vpack.c.bf16 %v6668_v42, %v6651_v19  ;;  %v8138_v50 = vrot.slane %v10166_v8, %v10749_v5 }
  0xf4   : > { %v7632_v7 = vrot.slane %v7624_v24, %v10749_v5  ;;  %v1994_v15 = vcombine.low %v1570_v36, %v11346_v37  ;;  %v7623_v46 = vcombine.low %v7615_v22, %v7622_v18  ;;  %v8145_v34 = vrot.slane %v8131_v31, %v10749_v5  ;;  %v10040_v22 = vld [vmem:[%s10747_s28 + $0xb8] sm:$0x3f] }
  0xf5   : > { %v7639_v1 = vrot.slane %v7625_v30, %v10749_v5  ;;  %v1978_v2 = vcombine.low %v1563_v21, %v1571_v54  ;;  %9145 = vrot.lane.b32.xlu0 %v6977_v6, %s10666_s6  ;;  %v8146_v58 = vcombine.high %v8138_v50, %v8138_v50  ;;  %v8147_v19 = vcombine.high %v10167_v16, %v10167_v16 }
  0xf6   : > { %v2002_v23 = vrot.slane %v1994_v15, %v10749_v5  ;;  %v11836_v13 = vrot.slane %v10167_v16, %v10749_v5  ;;  %v8579_v33 = vcombine.low %v11710_v17, %v8138_v50  ;;  %v2528_v9 = vcombine.high %v2146_v12, %v2146_v12  ;;  %v1162_v50 = vld [vmem:[%s10747_s28 + $0x49] sm:$0x3f] }
  0xf7   : > { %v7640_v37 = vcombine.low %v7632_v7, %v7639_v1  ;;  %v1992_v26 = vrot.slane %v1978_v2, %v10749_v5  ;;  %v11842_v32 = vrot.slane %v8147_v19, %v10749_v5  ;;  %v8580_v42 = vcombine.low %v8146_v58, %v8145_v34 }
  0xf8   : > { %v2010_v8 = vcombine.low %v2002_v23, %v11713_v61  ;;  %v11846_v21 = vcombine.high %v11836_v13, %v11836_v13  ;;  %v8587_v18 = vrot.slane %v8579_v33, %v10749_v5  ;;  %v2535_v30 = vrot.slane %v2146_v12, %v10749_v5 }
  0xf9   : > { %v7949_v24 = vpack.c.bf16 %v7640_v37, %v7623_v46  ;;  %v1993_v36 = vcombine.low %v11369_v27, %v1992_v26  ;;  %v11854_v61 = vcombine.high %v11842_v32, %v11842_v32  ;;  %v8594_v54 = vrot.slane %v8580_v42, %v10749_v5 }
  0xfa   : > { %v8596_v16 = vcombine.low %v11836_v13, %v11846_v21  ;;  %v2542_v31 = vrot.slane %v2528_v9, %v10749_v5  ;;  %v2543_v7 = vcombine.high %v2535_v30, %v2535_v30  ;;  %v3501_v27 = vcombine.high %v10040_v22, %v10040_v22 }
  0xfb   : > { %9184 = vrot.lane.b32.xlu1 %v7949_v24, %s10669_s9  ;;  %v2121_v6 = vpack.c.bf16 %v2010_v8, %v1993_v36  ;;  %v3508_v15 = vrot.slane %v10040_v22, %v10749_v5  ;;  %v8595_v12 = vcombine.low %v8587_v18, %v8594_v54  ;;  %v8597_v46 = vcombine.low %v11842_v32, %v11854_v61  ;;  %v11881_v24 = vld [vmem:[%s10747_s28 + $0x59] sm:$0x3f] }
  0xfc   : > { %v8604_v1 = vrot.slane %v8596_v16, %v10749_v5  ;;  %v2966_v2 = vcombine.low %v2542_v31, %v11403_v29  ;;  %v2950_v34 = vcombine.low %v2535_v30, %v2543_v7  ;;  %v3515_v23 = vrot.slane %v3501_v27, %v10749_v5  ;;  %v10068_v54 = vld [vmem:[%s10747_s28 + $0xb9] sm:$0x3f] }
  0xfd   : > { %8962 = vrot.lane.b32.xlu0 %v2121_v6, %s10663_s30  ;;  %v3516_v58 = vcombine.high %v3508_v15, %v3508_v15  ;;  %v3517_v19 = vcombine.high %v11628_v49, %v11628_v49  ;;  %v8611_v37 = vrot.slane %v8597_v46, %v10749_v5  ;;  %v3922_v33 = vcombine.low %v11632_v63, %v11639_v38 }
  0xfe   : > { %v2974_v26 = vrot.slane %v2966_v2, %v10749_v5  ;;  %v1358_v9 = vcombine.high %v1162_v50, %v1162_v50  ;;  %v2964_v29 = vrot.slane %v2950_v34, %v10749_v5  ;;  %v3939_v22 = vcombine.low %v3515_v23, %v11644_v10 }
  0xff   : > { %v11877_v8 = vrot.slane %v3517_v19, %v10749_v5  ;;  %v3923_v42 = vcombine.low %v3508_v15, %v3516_v58  ;;  %v8612_v36 = vcombine.low %v8604_v1, %v8611_v37  ;;  %v3930_v18 = vrot.slane %v3922_v33, %v10749_v5  ;;  %v2134_v19 = vld [vmem:[%s10747_s28 + $0x4a] sm:$0x3f]  ;;  %v11914_v33 = vld [vmem:[%s10747_s28 + $0x5a] sm:$0x3f] }
 0x100   : > { %v2982_v49 = vcombine.low %v2974_v26, %v11763_v53  ;;  %v1365_v30 = vrot.slane %v1162_v50, %v10749_v5  ;;  %v2965_v63 = vcombine.low %v11427_v25, %v2964_v29  ;;  %v3947_v31 = vrot.slane %v3939_v22, %v10749_v5  ;;  %v10096_v22 = vld [vmem:[%s10747_s28 + $0xba] sm:$0x3f] }
 0x101   : > { %v3937_v38 = vrot.slane %v3923_v42, %v10749_v5  ;;  %v3940_v16 = vcombine.low %v11654_v40, %v11877_v8  ;;  %v8921_v10 = vpack.c.bf16 %v8612_v36, %v8595_v12  ;;  %v1372_v6 = vrot.slane %v1358_v9, %v10749_v5 }
 0x102   : > { %v1373_v7 = vcombine.high %v1365_v30, %v1365_v30  ;;  %v11895_v53 = vrot.slane %v11881_v24, %v10749_v5  ;;  %v3093_v27 = vpack.c.bf16 %v2982_v49, %v2965_v63  ;;  %v4473_v50 = vcombine.high %v10068_v54, %v10068_v54 }
 0x103   : > { %v3938_v15 = vcombine.low %v3930_v18, %v3937_v38  ;;  %v3954_v25 = vrot.slane %v3940_v16, %v10749_v5  ;;  %9223 = vrot.lane.b32.xlu1 %v8921_v10, %s10668_s8  ;;  %v1808_v46 = vcombine.low %v1372_v6, %v11461_v35  ;;  %v4480_v1 = vrot.slane %v10068_v54, %v10749_v5 }
 0x104   : > { %v1807_v40 = vcombine.low %v1365_v30, %v1373_v7  ;;  %v1825_v12 = vcombine.low %v11664_v43, %v11895_v53  ;;  %9001 = vrot.lane.b32.xlu0 %v3093_v27, %s10665_s5  ;;  %v4487_v34 = vrot.slane %v4473_v50, %v10749_v5  ;;  %v4489_v23 = vcombine.high %v11678_v28, %v11678_v28 }
 0x105   : > { %v3955_v2 = vcombine.low %v3947_v31, %v3954_v25  ;;  %v4894_v58 = vcombine.low %v11686_v14, %v11697_v0  ;;  %v1822_v37 = vrot.slane %v1808_v46, %v10749_v5  ;;  %v4488_v26 = vcombine.high %v4480_v1, %v4480_v1 }
 0x106   : > { %v1815_v35 = vrot.slane %v1807_v40, %v10749_v5  ;;  %v1839_v43 = vrot.slane %v1825_v12, %v10749_v5  ;;  %v11917_v29 = vrot.slane %v4489_v23, %v10749_v5  ;;  %v4911_v28 = vcombine.low %v4487_v34, %v11693_v62 }
 0x107   : > { %v4066_v9 = vpack.c.bf16 %v3955_v2, %v3938_v15  ;;  %v4902_v42 = vrot.slane %v4894_v58, %v10749_v5  ;;  %v4895_v49 = vcombine.low %v4480_v1, %v4488_v26  ;;  %v2330_v18 = vcombine.high %v2134_v19, %v2134_v19  ;;  %v10028_v2 = vld [vmem:[%s10747_s28 + $0x58] sm:$0x3f]  ;;  %v11953_v58 = vld [vmem:[%s10747_s28 + $0x68] sm:$0x3f] }
 0x108   : > { %v1823_v14 = vcombine.low %v1815_v35, %v1822_v37  ;;  %v1840_v36 = vcombine.low %v11487_v51, %v1839_v43  ;;  %v4912_v30 = vcombine.low %v11702_v55, %v11917_v29  ;;  %v4919_v54 = vrot.slane %v4911_v28, %v10749_v5 }
 0x109   : > { %9040 = vrot.lane.b32.xlu1 %v4066_v9, %s10662_s29  ;;  %v2337_v63 = vrot.slane %v2134_v19, %v10749_v5  ;;  %v11930_v38 = vrot.slane %v11914_v33, %v10749_v5  ;;  %v4909_v16 = vrot.slane %v4895_v49, %v10749_v5  ;;  %v2344_v51 = vrot.slane %v2330_v18, %v10749_v5  ;;  %v10124_v49 = vld [vmem:[%s10747_s28 + $0xc8] sm:$0x3f] }
 0x10a   : > { %v2116_v62 = vpack.c.bf16 %v1840_v36, %v1823_v14  ;;  %v5445_v31 = vcombine.high %v10096_v22, %v10096_v22  ;;  %v4926_v10 = vrot.slane %v4912_v30, %v10749_v5  ;;  %v5452_v7 = vrot.slane %v10096_v22, %v10749_v5 }
 0x10b   : > { %v2345_v6 = vcombine.high %v2337_v63, %v2337_v63  ;;  %v2797_v55 = vcombine.low %v11710_v17, %v11930_v38  ;;  %v4910_v27 = vcombine.low %v4902_v42, %v4909_v16  ;;  %v2780_v15 = vcombine.low %v2344_v51, %v11503_v48  ;;  %v10125_v16 = vld [vmem:[%s10747_s28 + $0xd0] sm:$0xff] }
 0x10c   : > { %8952 = vrot.lane.b32.xlu0 %v2116_v62, %s10663_s30  ;;  %v5459_v25 = vrot.slane %v5445_v31, %v10749_v5  ;;  %v5461_v50 = vcombine.high %v11729_v60, %v11729_v60  ;;  %v4927_v40 = vcombine.low %v4919_v54, %v4926_v10  ;;  %v5460_v1 = vcombine.high %v5452_v7, %v5452_v7 }
 0x10d   : > { %v2779_v46 = vcombine.low %v2337_v63, %v2345_v6  ;;  %v2811_v12 = vrot.slane %v2797_v55, %v10749_v5  ;;  %v2794_v17 = vrot.slane %v2780_v15, %v10749_v5  ;;  %v5866_v23 = vcombine.low %v11739_v4, %v11749_v39  ;;  %v10451_v4 = vld [vmem:[%s13638_s1] sm:$0xff]  }
 0x10e   : > { %v11947_v34 = vrot.slane %v5461_v50, %v10749_v5  ;;  %v5883_v48 = vcombine.low %v5459_v25, %v11744_v20  ;;  %v5038_v19 = vpack.c.bf16 %v4927_v40, %v4910_v27  ;;  %v5867_v37 = vcombine.low %v5452_v7, %v5460_v1  ;;  %v10056_v7 = vld [vmem:[%s10747_s28 + $0x59] sm:$0x3f] }
 0x10f   : > { %v2787_v60 = vrot.slane %v2779_v46, %v10749_v5  ;;  %v2812_v35 = vcombine.low %v11530_v56, %v2811_v12  ;;  %v5874_v43 = vrot.slane %v5866_v23, %v10749_v5  ;;  %v3303_v42 = vcombine.high %v10028_v2, %v10028_v2 }
 0x110   : > { %v5884_v26 = vcombine.low %v11755_v44, %v11947_v34  ;;  %v5891_v9 = vrot.slane %v5883_v48, %v10749_v5  ;;  %9079 = vrot.lane.b32.xlu1 %v5038_v19, %s10664_s4  ;;  %v5881_v28 = vrot.slane %v5867_v37, %v10749_v5  ;;  %v3310_v56 = vrot.slane %v10028_v2, %v10749_v5  ;;  %v12001_v2 = vld [vmem:[%s10747_s28 + $0x69] sm:$0x3f] }
 0x111   : > { %v2795_v20 = vcombine.low %v2787_v60, %v2794_v17  ;;  %v11969_v22 = vrot.slane %v11953_v58, %v10749_v5  ;;  %v3317_v14 = vrot.slane %v3303_v42, %v10749_v5  ;;  %v3769_v36 = vcombine.low %v11784_v47, %v11777_v11 }
 0x112   : > { %v5898_v44 = vrot.slane %v5884_v26, %v10749_v5  ;;  %v5882_v30 = vcombine.low %v5874_v43, %v5881_v28  ;;  %v3318_v54 = vcombine.high %v3310_v56, %v3310_v56  ;;  %v13641_v62 = vmov 0.0   ;;  %v12019_v26 = vld [vmem:[%s13638_s1 + $0x10] sm:$0xff]   ;;  %v181_v28 = vld [vmem:[%s10747_s28] sm:$0xff] }
 0x113   : > { %v3088_v18 = vpack.c.bf16 %v2812_v35, %v2795_v20  ;;  %v3770_v63 = vcombine.low %v11788_v45, %v11969_v22  ;;  %10232 = vmatprep.subr.bf16.mxu0 %v13641_v62  ;;  %v3753_v31 = vcombine.low %v3317_v14, %v11771_v52  ;;  %v3777_v10 = vrot.slane %v3769_v36, %v10749_v5  ;;  %v10455_v52 = vld [vmem:[%s13638_s1 + $0x8] sm:$0xff]  }
 0x114   : > { %v5899_v51 = vcombine.low %v5891_v9, %v5898_v44  ;;  %10233 = vmatpush3.bf16.msra.mxu0 %v10451_v4  ;;  %v11984_v11 = vcombine.high %v11877_v8, %v11877_v8  ;;  %v3752_v47 = vcombine.low %v3310_v56, %v3318_v54  ;;  %v6418_v6 = vcombine.high %v10124_v49, %v10124_v49 }
 0x115   : > { %8991 = vrot.lane.b32.xlu0 %v3088_v18, %s10665_s5  ;;  %v3784_v45 = vrot.slane %v3770_v63, %v10749_v5  ;;  %v6425_v55 = vrot.slane %v10124_v49, %v10749_v5  ;;  %v3767_v15 = vrot.slane %v3753_v31, %v10749_v5  ;;  %v6434_v25 = vcombine.high %v10125_v16, %v10125_v16  ;;  %v182_v63 = vld [vmem:[%s10747_s28 + $0x8] sm:$0x3f]  ;;  %v12043_v31 = vld [vmem:[%s10747_s28 + $0x10] sm:$0xff] }
 0x116   : > { %v6010_v27 = vpack.c.bf16 %v5899_v51, %v5882_v30  ;;  %v11995_v50 = vrot.slane %v10125_v16, %v10749_v5  ;;  %10234 = vmatprep.subr.bf16.mxu0 %v13641_v62  ;;  %v3760_v40 = vrot.slane %v3752_v47, %v10749_v5  ;;  %v6432_v12 = vrot.slane %v6418_v6, %v10749_v5 }
 0x117   : > { %v3785_v46 = vcombine.low %v3777_v10, %v3784_v45  ;;  %v6433_v1 = vcombine.high %v6425_v55, %v6425_v55  ;;  %10294 = vmatprep.subr.bf16.mxu1 %v13641_v62  ;;  %v12006_v17 = vrot.slane %v6434_v25, %v10749_v5  ;;  %v6839_v48 = vcombine.low %v11877_v8, %v11984_v11 }
 0x118   : > { %9118 = vrot.lane.b32.xlu1 %v6010_v27, %s10667_s7  ;;  %v12010_v23 = vcombine.high %v11995_v50, %v11995_v50  ;;  %v4275_v19 = vcombine.high %v10056_v7, %v10056_v7  ;;  %v3768_v60 = vcombine.low %v3760_v40, %v3767_v15  ;;  %v6856_v37 = vcombine.low %v6432_v12, %v11995_v50 }
 0x119   : > { %v6840_v35 = vcombine.low %v6425_v55, %v6433_v1  ;;  %v4282_v43 = vrot.slane %v10056_v7, %v10749_v5  ;;  %10235 = vmatpush3.bf16.msra.mxu0 %v10455_v52  ;;  %v6847_v9 = vrot.slane %v6839_v48, %v10749_v5  ;;  %v12027_v20 = vrot.slane %v12001_v2, %v10749_v5  ;;  %v10152_v7 = vld [vmem:[%s10747_s28 + $0xc9] sm:$0x3f] }
 0x11a   : > { %v6857_v42 = vcombine.low %v12010_v23, %v12006_v17  ;;  %v4289_v8 = vrot.slane %v4275_v19, %v10749_v5  ;;  %10236 = vmatprep.subr.bf16.mxu0 %v13641_v62  ;;  %v4061_v56 = vpack.c.bf16 %v3785_v46, %v3768_v60  ;;  %v6864_v14 = vrot.slane %v6856_v37, %v10749_v5  ;;  %v10153_v19 = vld [vmem:[%s10747_s28 + $0xd1] sm:$0xff] }
 0x11b   : > { %v6854_v44 = vrot.slane %v6840_v35, %v10749_v5  ;;  %v4290_v36 = vcombine.high %v4282_v43, %v4282_v43  ;;  %10299 = vmatpush3.bf16.msra.mxu1 %v10451_v4  ;;  %v4741_v30 = vcombine.low %v11810_v41, %v11804_v57  ;;  %v4742_v54 = vcombine.low %v11816_v3, %v12027_v20 }
 0x11c   : > { %v6871_v49 = vrot.slane %v6857_v42, %v10749_v5  ;;  %v4725_v18 = vcombine.low %v4289_v8, %v11800_v59  ;;  %10295 = vmatprep.subr.bf16.mxu1 %v13641_v62  ;;  %9030 = vrot.lane.b32.xlu0 %v4061_v56, %s10662_s29  ;;  %v237_v4 = vcombine.high %v181_v28, %v181_v28  ;;  %v10466_v59 = vld [vmem:[%s13638_s1 + $0x18] sm:$0xff]  }
 0x11d   : > { %v6855_v16 = vcombine.low %v6847_v9, %v6854_v44  ;;  %v4724_v51 = vcombine.low %v4282_v43, %v4290_v36  ;;  %10237 = vmatpush3.bf16.msra.mxu0 %v12019_v26  ;;  %v4749_v3 = vrot.slane %v4741_v30, %v10749_v5  ;;  %v4756_v10 = vrot.slane %v4742_v54, %v10749_v5 }
 0x11e   : > { %v6872_v57 = vcombine.low %v6864_v14, %v6871_v49  ;;  %v4739_v41 = vrot.slane %v4725_v18, %v10749_v5  ;;  %10238 = vmatprep.subr.bf16.mxu0 %v13641_v62  ;;  %v244_v45 = vrot.slane %v181_v28, %v10749_v5  ;;  %v251_v6 = vrot.slane %v237_v4, %v10749_v5  ;;  %v8945_v28 = vpop.permute.xlu0 %8944  ;;  %v10084_v49 = vld [vmem:[%s10747_s28 + $0x5a] sm:$0x3f] }
 0x11f   : > { %v4732_v47 = vrot.slane %v4724_v51, %v10749_v5  ;;  %v254_v55 = vcombine.high %v182_v63, %v182_v63  ;;  %10300 = vmatpush3.bf16.msra.mxu1 %v10455_v52  ;;  %v4757_v15 = vcombine.low %v4749_v3, %v4756_v10  ;;  %v261_v25 = vrot.slane %v182_v63, %v10749_v5 }
 0x120   : > { %v6983_v27 = vpack.c.bf16 %v6872_v57, %v6855_v16  ;;  %v12060_v40 = vrot.slane %v12043_v31, %v10749_v5  ;;  %10296 = vmatprep.subr.bf16.mxu1 %v13641_v62  ;;  %v252_v12 = vcombine.high %v244_v45, %v244_v45  ;;  %v253_v1 = vcombine.high %v251_v6, %v251_v6  ;;  %v12090_v57 = vld [vmem:[%s10747_s28 + $0x6a] sm:$0x3f] }
 0x121   : > { %v4740_v46 = vcombine.low %v4732_v47, %v4739_v41  ;;  %v268_v48 = vrot.slane %v254_v55, %v10749_v5  ;;  %10239 = vmatpush3.bf16.msra.mxu0 %v10466_v59  ;;  %v269_v52 = vcombine.high %v261_v25, %v261_v25  ;;  %v12068_v60 = vcombine.high %v11917_v29, %v11917_v29 }
 0x122   : > { %9157 = vrot.lane.b32.xlu1 %v6983_v27, %s10666_s6  ;;  %v7390_v35 = vcombine.high %v10152_v7, %v10152_v7  ;;  %v7397_v37 = vrot.slane %v10152_v7, %v10749_v5  ;;  %v699_v9 = vcombine.low %v244_v45, %v252_v12  ;;  %v700_v42 = vcombine.low %v251_v6, %v253_v1 }
 0x123   : > { %v5033_v43 = vpack.c.bf16 %v4757_v15, %v4740_v46  ;;  %v717_v8 = vcombine.low %v268_v48, %v12060_v40  ;;  %10240 = vmatprep.subr.bf16.mxu0 %v13641_v62  ;;  %v716_v56 = vcombine.low %v261_v25, %v269_v52  ;;  %v7406_v36 = vcombine.high %v10153_v19, %v10153_v19  ;;  %v8984_v48 = vpop.permute.xlu0 %8983 }
 0x124   : > { %v7404_v44 = vrot.slane %v7390_v35, %v10749_v5  ;;  %v7405_v14 = vcombine.high %v7397_v37, %v7397_v37  ;;  %10301 = vmatpush3.bf16.msra.mxu1 %v12019_v26  ;;  %v707_v18 = vrot.slane %v699_v9, %v10749_v5  ;;  %v714_v30 = vrot.slane %v700_v42, %v10749_v5 }
 0x125   : > { %9069 = vrot.lane.b32.xlu0 %v5033_v43, %s10664_s4  ;;  %v731_v54 = vrot.slane %v717_v8, %v10749_v5  ;;  %v12081_v63 = vrot.slane %v10153_v19, %v10749_v5  ;;  %v724_v16 = vrot.slane %v716_v56, %v10749_v5  ;;  %v12085_v51 = vrot.slane %v7406_v36, %v10749_v5  ;;  %v10181_v8 = vld [vmem:[%s10747_s28 + $0xd2] sm:$0xff]  ;;  %v9023_v56 = vpop.permute.xlu1 %9022 }
 0x126   : > { %v7811_v4 = vcombine.low %v11917_v29, %v12068_v60  ;;  %v7812_v26 = vcombine.low %v7397_v37, %v7405_v14  ;;  %10297 = vmatprep.subr.bf16.mxu1 %v13641_v62  ;;  %v715_v41 = vcombine.low %v707_v18, %v714_v30  ;;  %v5247_v47 = vcombine.high %v10084_v49, %v10084_v49  ;;  %v10180_v37 = vld [vmem:[%s10747_s28 + $0xca] sm:$0x3f] }
 0x127   : > { %v12095_v3 = vcombine.high %v12081_v63, %v12081_v63  ;;  %v7828_v10 = vcombine.low %v7404_v44, %v12081_v63  ;;  %v732_v45 = vcombine.low %v724_v16, %v731_v54  ;;  %v5254_v29 = vrot.slane %v10084_v49, %v10749_v5  ;;  %v10112_v49 = vld [vmem:[%s10747_s28 + $0x68] sm:$0x3f]  ;;  %10242 = vmatprep.mubr.msk.bf16.mxu0 %vm10671_vm8, %v13641_v62 }
 0x128   : > { %v7819_v6 = vrot.slane %v7811_v4, %v10749_v5  ;;  %v7826_v55 = vrot.slane %v7812_v26, %v10749_v5  ;;  %10302 = vmatpush3.bf16.msra.mxu1 %v10466_v59  ;;  %v5261_v15 = vrot.slane %v5247_v47, %v10749_v5  ;;  %v12107_v25 = vrot.slane %v12090_v57, %v10749_v5  ;;  %v10113_v47 = vld [vmem:[%s10747_s28 + $0x70] sm:$0xff] }
 0x129   : > { %v7829_v7 = vcombine.low %v12095_v3, %v12085_v51  ;;  %v7836_v27 = vrot.slane %v7828_v10, %v10749_v5  ;;  %10298 = vmatprep.subr.bf16.mxu1 %v13641_v62  ;;  %v1140_v46 = vpack.c.bf16 %v732_v45, %v715_v41  ;;  %v5262_v1 = vcombine.high %v5254_v29, %v5254_v29 }
 0x12a   : > { %v7827_v12 = vcombine.low %v7819_v6, %v7826_v55  ;;  %v5713_v59 = vcombine.low %v11846_v21, %v11842_v32  ;;  %v5697_v52 = vcombine.low %v5261_v15, %v11836_v13  ;;  %v5714_v35 = vcombine.low %v11854_v61, %v12107_v25  ;;  %v12143_v55 = vld [vmem:[%s10747_s28 + $0x78] sm:$0x3f]  ;;  %10270 = vmatprep.mubr.msk.bf16.mxu1 %vm10671_vm8, %v13641_v62 }
 0x12b   : > { %v7843_v19 = vrot.slane %v7829_v7, %v10749_v5  ;;  %v9246_v43 = vsel %vm9243_vm0, %v1140_v46, %v8945_v28  ;;  %v5696_v9 = vcombine.low %v5254_v29, %v5262_v1  ;;  %v12127_v28 = vcombine.high %v11947_v34, %v11947_v34 }
 0x12c   : > { %v5721_v42 = vrot.slane %v5713_v59, %v10749_v5  ;;  %v5711_v21 = vrot.slane %v5697_v52, %v10749_v5  ;;  %v5728_v13 = vrot.slane %v5714_v35, %v10749_v5  ;;  %v9285_v44 = vsel %vm9283_vm1, %v9246_v43, %v8984_v48 }
 0x12d   : > { %v7844_v32 = vcombine.low %v7836_v27, %v7843_v19  ;;  %v5704_v61 = vrot.slane %v5696_v9, %v10749_v5  ;;  %v9312_v14 = vsel %vm9310_vm2, %v9285_v44, %v9023_v56  ;;  %v8362_v36 = vcombine.high %v10180_v37, %v10180_v37  ;;  %v9062_v56 = vpop.permute.xlu1 %9061  ;;  %v10140_v44 = vld [vmem:[%s10747_s28 + $0x69] sm:$0x3f] }
 0x12e   : > { %v5729_v30 = vcombine.low %v5721_v42, %v5728_v13  ;;  %v8369_v54 = vrot.slane %v10180_v37, %v10749_v5  ;;  %v8378_v16 = vcombine.high %v10181_v8, %v10181_v8  ;;  %v12133_v41 = vrot.slane %v10181_v8, %v10749_v5  ;;  %v9101_v8 = vpop.permute.xlu0 %9100 }
 0x12f   : > { %v7955_v18 = vpack.c.bf16 %v7844_v32, %v7827_v12  ;;  %v5712_v4 = vcombine.low %v5704_v61, %v5711_v21  ;;  %v8376_v26 = vrot.slane %v8362_v36, %v10749_v5  ;;  %v8783_v10 = vcombine.low %v11947_v34, %v12127_v28  ;;  %v10141_v61 = vld [vmem:[%s10747_s28 + $0x71] sm:$0xff] }
 0x130   : > { %v8377_v45 = vcombine.high %v8369_v54, %v8369_v54  ;;  %v12140_v6 = vrot.slane %v8378_v16, %v10749_v5  ;;  %v6220_v29 = vcombine.high %v10112_v49, %v10112_v49  ;;  %v6227_v7 = vrot.slane %v10112_v49, %v10749_v5 }
 0x131   : > { %9196 = vrot.lane.b32.xlu1 %v7955_v18, %s10669_s9  ;;  %v6005_v27 = vpack.c.bf16 %v5729_v30, %v5712_v4  ;;  %v12148_v15 = vcombine.high %v12133_v41, %v12133_v41  ;;  %v8791_v46 = vrot.slane %v8783_v10, %v10749_v5  ;;  %v8800_v34 = vcombine.low %v8376_v26, %v12133_v41 }
 0x132   : > { %v8784_v12 = vcombine.low %v8369_v54, %v8377_v45  ;;  %v6234_v1 = vrot.slane %v6220_v29, %v10749_v5  ;;  %v6235_v59 = vcombine.high %v6227_v7, %v6227_v7  ;;  %v6236_v48 = vcombine.high %v10113_v47, %v10113_v47 }
 0x133   : > { %9108 = vrot.lane.b32.xlu0 %v6005_v27, %s10667_s7  ;;  %v8801_v19 = vcombine.low %v12148_v15, %v12140_v6  ;;  %v8808_v52 = vrot.slane %v8800_v34, %v10749_v5  ;;  %v12158_v35 = vrot.slane %v10113_v47, %v10749_v5  ;;  %v12162_v37 = vrot.slane %v12143_v55, %v10749_v5  ;;  %v12189_v47 = vld [vmem:[%s10747_s28 + $0x79] sm:$0x3f] }
 0x134   : > { %v8798_v43 = vrot.slane %v8784_v12, %v10749_v5  ;;  %v12166_v9 = vrot.slane %v6236_v48, %v10749_v5  ;;  %v6669_v42 = vcombine.low %v6227_v7, %v6235_v59  ;;  %v9339_v30 = vsel %vm9337_vm3, %v9312_v14, %v9062_v56  ;;  %v1176_v27 = vld [vmem:[%s10747_s28 + $0xb9] sm:$0x3f] }
 0x135   : > { %v8815_v32 = vrot.slane %v8801_v19, %v10749_v5  ;;  %v12171_v21 = vcombine.high %v12158_v35, %v12158_v35  ;;  %v6670_v13 = vcombine.low %v6234_v1, %v12158_v35  ;;  %v9366_v26 = vsel %vm9364_vm4, %v9339_v30, %v9101_v8 }
 0x136   : > { %v8799_v36 = vcombine.low %v8791_v46, %v8798_v43  ;;  %v12178_v49 = vcombine.high %v12166_v9, %v12166_v9  ;;  %v6677_v18 = vrot.slane %v6669_v42, %v10749_v5  ;;  %v7192_v45 = vcombine.high %v10140_v44, %v10140_v44 }
 0x137   : > { %v8816_v54 = vcombine.low %v8808_v52, %v8815_v32  ;;  %v6684_v16 = vrot.slane %v6670_v13, %v10749_v5  ;;  %v6686_v4 = vcombine.low %v12171_v21, %v12166_v9  ;;  %v7199_v29 = vrot.slane %v10140_v44, %v10749_v5  ;;  %v1177_v52 = vld [vmem:[%s10747_s28 + $0xc1] sm:$0xff] }
 0x138   : > { %v6687_v10 = vcombine.low %v12178_v49, %v12162_v37  ;;  %v7208_v7 = vcombine.high %v10141_v61, %v10141_v61  ;;  %v12195_v12 = vrot.slane %v10141_v61, %v10749_v5  ;;  %v7206_v59 = vrot.slane %v7192_v45, %v10749_v5 }
 0x139   : > { %v8927_v14 = vpack.c.bf16 %v8816_v54, %v8799_v36  ;;  %v6685_v46 = vcombine.low %v6677_v18, %v6684_v16  ;;  %v6694_v34 = vrot.slane %v6686_v4, %v10749_v5  ;;  %v7207_v48 = vcombine.high %v7199_v29, %v7199_v29  ;;  %v10471_v54 = vld [vmem:[%s13638_s1 + $0x20] ss:$0 sps:$4 sm:$0xff]  }
 0x13a   : > { %v6701_v1 = vrot.slane %v6687_v10, %v10749_v5  ;;  %v12200_v19 = vrot.slane %v7208_v7, %v10749_v5  ;;  %v12206_v43 = vcombine.high %v12195_v12, %v12195_v12  ;;  %v12210_v42 = vrot.slane %v12189_v47, %v10749_v5 }
 0x13b   : > { %9235 = vrot.lane.b32.xlu1 %v8927_v14, %s10668_s8  ;;  %v1589_v8 = vcombine.high %v1176_v27, %v1176_v27  ;;  %v7641_v13 = vcombine.low %v7199_v29, %v7207_v48  ;;  %v7642_v44 = vcombine.low %v7206_v59, %v12195_v12  ;;  %v1596_v36 = vrot.slane %v1176_v27, %v10749_v5  ;;  %v9140_v59 = vpop.permute.xlu1 %9139 }
 0x13c   : > { %v6702_v56 = vcombine.low %v6694_v34, %v6701_v1  ;;  %v12214_v32 = vcombine.high %v12200_v19, %v12200_v19  ;;  %v7658_v61 = vcombine.low %v12206_v43, %v12200_v19  ;;  %v1605_v30 = vcombine.high %v1177_v52, %v1177_v52 }
 0x13d   : > { %v1603_v18 = vrot.slane %v1589_v8, %v10749_v5  ;;  %v7649_v4 = vrot.slane %v7641_v13, %v10749_v5  ;;  %v7656_v10 = vrot.slane %v7642_v44, %v10749_v5  ;;  %v1604_v7 = vcombine.high %v1596_v36, %v1596_v36  ;;  %v10168_v44 = vld [vmem:[%s10747_s28 + $0x6a] sm:$0x3f] }
 0x13e   : > { %v6978_v16 = vpack.c.bf16 %v6702_v56, %v6685_v46  ;;  %v7659_v45 = vcombine.low %v12214_v32, %v12210_v42  ;;  %v7666_v29 = vrot.slane %v7658_v61, %v10749_v5  ;;  %v1612_v27 = vrot.slane %v1177_v52, %v10749_v5 }
 0x13f   : > { %v1619_v14 = vrot.slane %v1605_v30, %v10749_v5  ;;  %v7657_v34 = vcombine.low %v7649_v4, %v7656_v10  ;;  %v2011_v1 = vcombine.low %v11697_v0, %v1596_v36  ;;  %v2012_v56 = vcombine.low %v1604_v7, %v1603_v18  ;;  %v9179_v30 = vpop.permute.xlu0 %9178  ;;  %v10169_v4 = vld [vmem:[%s10747_s28 + $0x72] sm:$0xff] }
 0x140   : > { %9147 = vrot.lane.b32.xlu0 %v6978_v16, %s10666_s6  ;;  %v7673_v46 = vrot.slane %v7659_v45, %v10749_v5  ;;  %v1620_v48 = vcombine.high %v1612_v27, %v1612_v27  ;;  %v9537_v13 = vsel %vm9535_vm5, %v10471_v54, 0  ;;  %v9393_v18 = vsel %vm9391_vm6, %v9366_v26, %v9140_v59  ;;  %v12241_v54 = vld [vmem:[%s10747_s28 + $0x7a] sm:$0x3f]  ;;  %v2149_v59 = vld [vmem:[%s10747_s28 + $0xc2] sm:$0xff] }
 0x141   : > { %v1621_v8 = vcombine.high %v1619_v14, %v1619_v14  ;;  %v2019_v61 = vrot.slane %v2011_v1, %v10749_v5  ;;  %10241 = vmatpush3.bf16.msra.mxu0 %v9537_v13  ;;  %10303 = vmatpush3.bf16.msra.mxu1 %v9537_v13  ;;  %v2026_v0 = vrot.slane %v2012_v56, %v10749_v5 }
 0x142   : > { %v7674_v52 = vcombine.low %v7666_v29, %v7673_v46  ;;  %v2028_v36 = vcombine.low %v1612_v27, %v1620_v48  ;;  %13658 = vst [vmem:[#allocation8_spill] sm:$0xff] %v12241_v54  ;;  %v8164_v45 = vcombine.high %v10168_v44, %v10168_v44  ;;  %v2148_v29 = vld [vmem:[%s10747_s28 + $0xba] sm:$0x3f]  ;;  %v9420_v13 = vsel %vm9418_vm7, %v9393_v18, %v9179_v30 }
 0x143   : > { %v2029_v16 = vcombine.low %v1619_v14, %v1621_v8  ;;  %v2027_v7 = vcombine.low %v2019_v61, %v2026_v0  ;;  %v8171_v27 = vrot.slane %v10168_v44, %v10749_v5  ;;  %v8180_v14 = vcombine.high %v10169_v4, %v10169_v4 }
 0x144   : > { %v7950_v10 = vpack.c.bf16 %v7674_v52, %v7657_v34  ;;  %v2036_v46 = vrot.slane %v2028_v36, %v10749_v5  ;;  %v8178_v26 = vrot.slane %v8164_v45, %v10749_v5  ;;  %v12253_v34 = vrot.slane %v10169_v4, %v10749_v5 }
 0x145   : > { %v2043_v1 = vrot.slane %v2029_v16, %v10749_v5  ;;  %v12258_v8 = vrot.slane %v12241_v54, %v10749_v5  ;;  %v2561_v56 = vcombine.high %v2148_v29, %v2148_v29  ;;  %v8179_v52 = vcombine.high %v8171_v27, %v8171_v27  ;;  %v184_v54 = vld [vmem:[%s10747_s28 + $0x18] sm:$0x3f] }
 0x146   : > { %9186 = vrot.lane.b32.xlu1 %v7950_v10, %s10669_s9  ;;  %v12263_v61 = vrot.slane %v8180_v14, %v10749_v5  ;;  %v12267_v44 = vcombine.high %v12253_v34, %v12253_v34  ;;  %v8614_v30 = vcombine.low %v8178_v26, %v12253_v34  ;;  %v2568_v36 = vrot.slane %v2148_v29, %v10749_v5 }
 0x147   : > { %v2044_v48 = vcombine.low %v2036_v46, %v2043_v1  ;;  %13659 = vst [vmem:[#allocation9_spill] sm:$0xff] %v12258_v8  ;;  %v2575_v16 = vrot.slane %v2561_v56, %v10749_v5  ;;  %v2577_v4 = vcombine.high %v2149_v59, %v2149_v59  ;;  %v8613_v18 = vcombine.low %v8171_v27, %v8179_v52  ;;  %v9218_v1 = vpop.permute.xlu1 %9217 }
 0x148   : > { %v12274_v10 = vcombine.high %v12263_v61, %v12263_v61  ;;  %v8628_v45 = vrot.slane %v8614_v30, %v10749_v5  ;;  %v8630_v46 = vcombine.low %v12267_v44, %v12263_v61  ;;  %v2584_v29 = vrot.slane %v2149_v59, %v10749_v5 }
 0x149   : > { %v2122_v0 = vpack.c.bf16 %v2044_v48, %v2027_v7  ;;  %v2576_v7 = vcombine.high %v2568_v36, %v2568_v36  ;;  %v2591_v26 = vrot.slane %v2577_v4, %v10749_v5  ;;  %v2983_v14 = vcombine.low %v11749_v39, %v2568_v36 }
 0x14a   : > { %v8621_v48 = vrot.slane %v8613_v18, %v10749_v5  ;;  %v8631_v27 = vcombine.low %v12274_v10, %v12258_v8  ;;  %v8638_v56 = vrot.slane %v8630_v46, %v10749_v5  ;;  %v2592_v52 = vcombine.high %v2584_v29, %v2584_v29  ;;  %v12294_v46 = vld [vmem:[%s10747_s28 + $0x20] sm:$0xff] }
 0x14b   : > { %8964 = vrot.lane.b32.xlu0 %v2122_v0, %s10663_s30  ;;  %v2593_v30 = vcombine.high %v2591_v26, %v2591_v26  ;;  %v2984_v0 = vcombine.low %v2576_v7, %v2575_v16  ;;  %v2991_v62 = vrot.slane %v2983_v14, %v10749_v5  ;;  %v9447_v39 = vsel %vm9445_vm9, %v9420_v13, %v9218_v1 }
 0x14c   : > { %v8629_v59 = vcombine.low %v8621_v48, %v8628_v45  ;;  %v8645_v4 = vrot.slane %v8631_v27, %v10749_v5  ;;  %v3000_v18 = vcombine.low %v2584_v29, %v2592_v52  ;;  %10243 = vmatmul.mubr.msk.bf16.vlgmr.msra.gmra.mrb[0].mxu0 %vm9508_vm10, %v9447_v39  ;;  %v270_v16 = vcombine.high %v12043_v31, %v12043_v31  ;;  %v10042_v52 = vld [vmem:[%s10747_s28 + $0xc8] sm:$0x3f] }
 0x14d   : > { %v2998_v36 = vrot.slane %v2984_v0, %v10749_v5  ;;  %v3001_v8 = vcombine.low %v2591_v26, %v2593_v30  ;;  %v285_v45 = vcombine.high %v12060_v40, %v12060_v40  ;;  %v287_v14 = vcombine.high %v184_v54, %v184_v54 }
 0x14e   : > { %v8646_v7 = vcombine.low %v8638_v56, %v8645_v4  ;;  %v294_v13 = vrot.slane %v184_v54, %v10749_v5  ;;  %v13660_v1 = vmov 0.0   ;;  %v3008_v29 = vrot.slane %v3000_v18, %v10749_v5 }
 0x14f   : > { %10246 = vmatprep.mubr.msk.bf16.mxu0 %vm10671_vm8, %v13660_v1  ;;  %v2999_v48 = vcombine.low %v2991_v62, %v2998_v36  ;;  %v3015_v26 = vrot.slane %v3001_v8, %v10749_v5  ;;  %v284_v27 = vrot.slane %v270_v16, %v10749_v5  ;;  %v301_v31 = vrot.slane %v287_v14, %v10749_v5 }
 0x150   : > { %v8922_v30 = vpack.c.bf16 %v8646_v7, %v8629_v59  ;;  %v302_v56 = vcombine.high %v294_v13, %v294_v13  ;;  %v310_v40 = vrot.slane %v12294_v46, %v10749_v5  ;;  %v3534_v36 = vcombine.high %v10042_v52, %v10042_v52 }
 0x151   : > { %v3016_v0 = vcombine.low %v3008_v29, %v3015_v26  ;;  %v286_v54 = vcombine.high %v284_v27, %v284_v27  ;;  %v733_v4 = vcombine.low %v285_v45, %v284_v27  ;;  %v3541_v8 = vrot.slane %v10042_v52, %v10749_v5  ;;  %v8947_v27 = vpop.permute.xlu0 %8946 }
 0x152   : > { %9225 = vrot.lane.b32.xlu1 %v8922_v30, %s10668_s8  ;;  %v318_v62 = vcombine.high %v310_v40, %v310_v40  ;;  %v750_v39 = vcombine.low %v302_v56, %v301_v31  ;;  %v12315_v7 = vcombine.high %v12006_v17, %v12006_v17  ;;  %v3548_v29 = vrot.slane %v3534_v36, %v10749_v5  ;;  %v1165_v31 = vld [vmem:[%s10747_s28 + $0x61] sm:$0xff] }
 0x153   : > { %v3094_v18 = vpack.c.bf16 %v3016_v0, %v2999_v48  ;;  %v734_v16 = vcombine.low %v286_v54, %v294_v13  ;;  %v741_v59 = vrot.slane %v733_v4, %v10749_v5  ;;  %v3549_v26 = vcombine.high %v3541_v8, %v3541_v8  ;;  %v12329_v0 = vld [vmem:[%s10747_s28 + $0x69] sm:$0x3f] }
 0x154   : > { %v751_v14 = vcombine.low %v310_v40, %v318_v62  ;;  %v758_v45 = vrot.slane %v750_v39, %v10749_v5  ;;  %v3956_v13 = vcombine.low %v11984_v11, %v3541_v8  ;;  %v3973_v48 = vcombine.low %v11995_v50, %v12010_v23  ;;  %13661 = vst [vmem:[#allocation10_spill] sm:$0xff] %v12329_v0 }
 0x155   : > { %9003 = vrot.lane.b32.xlu0 %v3094_v18, %s10665_s5  ;;  %v748_v52 = vrot.slane %v734_v16, %v10749_v5  ;;  %v3974_v30 = vcombine.low %v12006_v17, %v12315_v7  ;;  %v3957_v40 = vcombine.low %v3549_v26, %v3548_v29  ;;  %v1391_v54 = vcombine.high %v11881_v24, %v11881_v24  ;;  %v10070_v18 = vld [vmem:[%s10747_s28 + $0xc9] sm:$0x3f] }
 0x156   : > { %v765_v56 = vrot.slane %v751_v14, %v10749_v5  ;;  %v1406_v4 = vcombine.high %v11895_v53, %v11895_v53  ;;  %v3964_v62 = vrot.slane %v3956_v13, %v10749_v5  ;;  %v3981_v50 = vrot.slane %v3973_v48, %v10749_v5  ;;  %v9025_v48 = vpop.permute.xlu0 %9024 }
 0x157   : > { %v749_v11 = vcombine.low %v741_v59, %v748_v52  ;;  %v3988_v23 = vrot.slane %v3974_v30, %v10749_v5  ;;  %v3971_v39 = vrot.slane %v3957_v40, %v10749_v5  ;;  %v1405_v36 = vrot.slane %v1391_v54, %v10749_v5  ;;  %v8986_v59 = vpop.permute.xlu1 %8985 }
 0x158   : > { %v766_v17 = vcombine.low %v758_v45, %v765_v56  ;;  %v1407_v8 = vcombine.high %v1165_v31, %v1165_v31  ;;  %v1414_v24 = vrot.slane %v1165_v31, %v10749_v5  ;;  %v1431_v53 = vrot.slane %v12329_v0, %v10749_v5 }
 0x159   : > { %v3989_v16 = vcombine.low %v3981_v50, %v3988_v23  ;;  %v3972_v29 = vcombine.low %v3964_v62, %v3971_v39  ;;  %v1841_v52 = vcombine.low %v1406_v4, %v1405_v36  ;;  %v4506_v30 = vcombine.high %v10070_v18, %v10070_v18 }
 0x15a   : > { %v1141_v14 = vpack.c.bf16 %v766_v17, %v749_v11  ;;  %v1421_v26 = vrot.slane %v1407_v8, %v10749_v5  ;;  %v1422_v13 = vcombine.high %v1414_v24, %v1414_v24  ;;  %v1439_v45 = vcombine.high %v1431_v53, %v1431_v53 }
 0x15b   : > { %v4513_v56 = vrot.slane %v10070_v18, %v10749_v5  ;;  %v4067_v54 = vpack.c.bf16 %v3989_v16, %v3972_v29  ;;  %v1849_v31 = vrot.slane %v1841_v52, %v10749_v5  ;;  %v4520_v4 = vrot.slane %v4506_v30, %v10749_v5  ;;  %v2137_v29 = vld [vmem:[%s10747_s28 + $0x62] sm:$0xff]  ;;  %v9103_v30 = vpop.permute.xlu0 %9102 }
 0x15c   : > { %v9249_v40 = vsel %vm9243_vm0, %v1141_v14, %v8947_v27  ;;  %v1423_v50 = vcombine.high %v1421_v26, %v1421_v26  ;;  %v1842_v23 = vcombine.low %v1414_v24, %v1422_v13  ;;  %v1859_v0 = vcombine.low %v1431_v53, %v1439_v45  ;;  %v9064_v53 = vpop.permute.xlu1 %9063 }
 0x15d   : > { %v9287_v11 = vsel %vm9283_vm1, %v9249_v40, %v8986_v59  ;;  %9042 = vrot.lane.b32.xlu1 %v4067_v54, %s10662_s29  ;;  %v4521_v39 = vcombine.high %v4513_v56, %v4513_v56  ;;  %v12354_v27 = vcombine.high %v12085_v51, %v12085_v51  ;;  %v4928_v18 = vcombine.low %v12068_v60, %v4513_v56 }
 0x15e   : > { %v1858_v62 = vcombine.low %v1421_v26, %v1423_v50  ;;  %v9314_v17 = vsel %vm9310_vm2, %v9287_v11, %v9025_v48  ;;  %v1856_v36 = vrot.slane %v1842_v23, %v10749_v5  ;;  %v1873_v8 = vrot.slane %v1859_v0, %v10749_v5  ;;  %v12366_v26 = vld [vmem:[%s10747_s28 + $0x6a] sm:$0x3f] }
 0x15f   : > { %v4945_v16 = vcombine.low %v12081_v63, %v12095_v3  ;;  %v4929_v59 = vcombine.low %v4521_v39, %v4520_v4  ;;  %v4946_v14 = vcombine.low %v12085_v51, %v12354_v27  ;;  %v2363_v52 = vcombine.high %v11914_v33, %v11914_v33  ;;  %v10098_v50 = vld [vmem:[%s10747_s28 + $0xca] sm:$0x3f] }
 0x160   : > { %v1866_v24 = vrot.slane %v1858_v62, %v10749_v5  ;;  %v1857_v0 = vcombine.low %v1849_v31, %v1856_v36  ;;  %v4936_v60 = vrot.slane %v4928_v18, %v10749_v5  ;;  %v2378_v63 = vcombine.high %v11930_v38, %v11930_v38 }
 0x161   : > { %v4953_v13 = vrot.slane %v4945_v16, %v10749_v5  ;;  %v4943_v45 = vrot.slane %v4929_v59, %v10749_v5  ;;  %v4960_v51 = vrot.slane %v4946_v14, %v10749_v5  ;;  %v2377_v48 = vrot.slane %v2363_v52, %v10749_v5  ;;  %v9142_v59 = vpop.permute.xlu1 %9141 }
 0x162   : > { %v1874_v3 = vcombine.low %v1866_v24, %v1873_v8  ;;  %v2379_v56 = vcombine.high %v2137_v29, %v2137_v29  ;;  %v2386_v40 = vrot.slane %v2137_v29, %v10749_v5  ;;  %v2403_v33 = vrot.slane %v12366_v26, %v10749_v5 }
 0x163   : > { %v9341_v54 = vsel %vm9337_vm3, %v9314_v17, %v9064_v53  ;;  %v4944_v23 = vcombine.low %v4936_v60, %v4943_v45  ;;  %v4961_v38 = vcombine.low %v4953_v13, %v4960_v51  ;;  %v2813_v11 = vcombine.low %v2378_v63, %v2377_v48  ;;  %v12400_v51 = vld [vmem:[%s10747_s28 + $0x78] sm:$0x3f] }
 0x164   : > { %v2117_v31 = vpack.c.bf16 %v1874_v3, %v1857_v0  ;;  %v2393_v4 = vrot.slane %v2379_v56, %v10749_v5  ;;  %v2394_v62 = vcombine.high %v2386_v40, %v2386_v40  ;;  %v2411_v39 = vcombine.high %v2403_v33, %v2403_v33 }
 0x165   : > { %v9368_v36 = vsel %vm9364_vm4, %v9341_v54, %v9103_v30  ;;  %v5039_v8 = vpack.c.bf16 %v4961_v38, %v4944_v23  ;;  %v2821_v18 = vrot.slane %v2813_v11, %v10749_v5  ;;  %v5478_v16 = vcombine.high %v10098_v50, %v10098_v50 }
 0x166   : > { %8954 = vrot.lane.b32.xlu0 %v2117_v31, %s10663_s30  ;;  %v2395_v24 = vcombine.high %v2393_v4, %v2393_v4  ;;  %v2814_v17 = vcombine.low %v2386_v40, %v2394_v62  ;;  %v2831_v53 = vcombine.low %v2403_v33, %v2411_v39  ;;  %v5485_v14 = vrot.slane %v10098_v50, %v10749_v5 }
 0x167   : > { %9081 = vrot.lane.b32.xlu1 %v5039_v8, %s10664_s4  ;;  %v5492_v29 = vrot.slane %v5478_v16, %v10749_v5  ;;  %v12391_v52 = vcombine.high %v12140_v6, %v12140_v6  ;;  %v5917_v0 = vcombine.low %v12133_v41, %v12148_v15  ;;  %v3336_v60 = vcombine.high %v11953_v58, %v11953_v58  ;;  %v198_v16 = vld [vmem:[%s10747_s28 + $0x88] sm:$0x3f] }
 0x168   : > { %v2828_v13 = vrot.slane %v2814_v17, %v10749_v5  ;;  %v2830_v63 = vcombine.low %v2393_v4, %v2395_v24  ;;  %v2845_v3 = vrot.slane %v2831_v53, %v10749_v5  ;;  %v5493_v45 = vcombine.high %v5485_v14, %v5485_v14  ;;  %v9181_v4 = vpop.permute.xlu1 %9180  ;;  %v12426_v53 = vld [vmem:[%s10747_s28 + $0x90] sm:$0xff] }
 0x169   : > { %v5900_v48 = vcombine.low %v12127_v28, %v5485_v14  ;;  %v5918_v30 = vcombine.low %v12140_v6, %v12391_v52  ;;  %v5925_v56 = vrot.slane %v5917_v0, %v10749_v5  ;;  %v3350_v41 = vrot.slane %v3336_v60, %v10749_v5  ;;  %v10126_v0 = vld [vmem:[%s10747_s28 + $0xd8] sm:$0x3f] }
 0x16a   : > { %v2829_v15 = vcombine.low %v2821_v18, %v2828_v13  ;;  %v2838_v58 = vrot.slane %v2830_v63, %v10749_v5  ;;  %v5901_v40 = vcombine.low %v5493_v45, %v5492_v29  ;;  %v3351_v33 = vcombine.high %v11969_v22, %v11969_v22  ;;  %v197_v22 = vld [vmem:[%s10747_s28 + $0x80] sm:$0xff] }
 0x16b   : > { %v5908_v54 = vrot.slane %v5900_v48, %v10749_v5  ;;  %v5932_v28 = vrot.slane %v5918_v30, %v10749_v5  ;;  %v3376_v6 = vrot.slane %v12400_v51, %v10749_v5  ;;  %v3787_v50 = vcombine.low %v12158_v35, %v12171_v21  ;;  %v10127_v30 = vld [vmem:[%s10747_s28 + $0xe0] sm:$0xff] }
 0x16c   : > { %v2846_v31 = vcombine.low %v2838_v58, %v2845_v3  ;;  %v5915_v23 = vrot.slane %v5901_v40, %v10749_v5  ;;  %v3786_v38 = vcombine.low %v3351_v33, %v3350_v41  ;;  %v3803_v11 = vcombine.low %v12166_v9, %v12178_v49  ;;  %v9220_v58 = vpop.permute.xlu1 %9219 }
 0x16d   : > { %v5933_v62 = vcombine.low %v5925_v56, %v5932_v28  ;;  %v3384_v39 = vcombine.high %v3376_v6, %v3376_v6  ;;  %v3801_v8 = vrot.slane %v3787_v50, %v10749_v5  ;;  %v9395_v18 = vsel %vm9391_vm6, %v9368_v36, %v9142_v59 }
 0x16e   : > { %v3089_v24 = vpack.c.bf16 %v2846_v31, %v2829_v15  ;;  %v5916_v35 = vcombine.low %v5908_v54, %v5915_v23  ;;  %v3794_v21 = vrot.slane %v3786_v38, %v10749_v5  ;;  %v3811_v17 = vrot.slane %v3803_v11, %v10749_v5  ;;  %v8959_v11 = vpop.permute.xlu0 %8958 }
 0x16f   : > { %v3804_v9 = vcombine.low %v3376_v6, %v3384_v39  ;;  %v12429_v49 = vsel %vm9418_vm7, %v9395_v18, %v9181_v4  ;;  %v501_v14 = vcombine.high %v197_v22, %v197_v22  ;;  %v12432_v29 = vrot.slane %v197_v22, %v10749_v5 }
 0x170   : > { %8993 = vrot.lane.b32.xlu0 %v3089_v24, %s10665_s5  ;;  %v6011_v36 = vpack.c.bf16 %v5933_v62, %v5916_v35  ;;  %v3802_v59 = vcombine.low %v3794_v21, %v3801_v8  ;;  %v518_v60 = vcombine.high %v198_v16, %v198_v16  ;;  %v525_v13 = vrot.slane %v198_v16, %v10749_v5 }
 0x171   : > { %v3818_v63 = vrot.slane %v3804_v9, %v10749_v5  ;;  %v12439_v3 = vrot.slane %v501_v14, %v10749_v5  ;;  %v12443_v45 = vcombine.high %v12432_v29, %v12432_v29  ;;  %v12447_v48 = vrot.slane %v12426_v53, %v10749_v5 }
 0x172   : > { %9120 = vrot.lane.b32.xlu1 %v6011_v36, %s10667_s7  ;;  %v532_v56 = vrot.slane %v518_v60, %v10749_v5  ;;  %v533_v41 = vcombine.high %v525_v13, %v525_v13  ;;  %v6451_v15 = vcombine.high %v10126_v0, %v10126_v0  ;;  %v6458_v28 = vrot.slane %v10126_v0, %v10749_v5  ;;  %v12494_v60 = vpop.permute.xlu1 %9036 }
 0x173   : > { %v3819_v40 = vcombine.low %v3811_v17, %v3818_v63  ;;  %v12454_v33 = vcombine.high %v12439_v3, %v12439_v3  ;;  %v937_v54 = vcombine.low %v12432_v29, %v12443_v45  ;;  %v6467_v23 = vcombine.high %v10127_v30, %v10127_v30  ;;  %v12480_v17 = vld [vmem:[%s10747_s28 + $0x79] sm:$0x3f] }
 0x174   : > { %v954_v6 = vcombine.low %v525_v13, %v533_v41  ;;  %v955_v50 = vcombine.low %v532_v56, %v12447_v48  ;;  %v6465_v31 = vrot.slane %v6451_v15, %v10749_v5  ;;  %v6466_v62 = vcombine.high %v6458_v28, %v6458_v28 }
 0x175   : > { %v4062_v38 = vpack.c.bf16 %v3819_v40, %v3802_v59  ;;  %v938_v4 = vcombine.low %v12439_v3, %v12454_v33  ;;  %v12464_v22 = vrot.slane %v937_v54, %v10749_v5  ;;  %v12469_v18 = vrot.slane %v10127_v30, %v10749_v5 }
 0x176   : > { %v962_v39 = vrot.slane %v954_v6, %v10749_v5  ;;  %v969_v8 = vrot.slane %v955_v50, %v10749_v5  ;;  %v12472_v16 = vrot.slane %v6467_v23, %v10749_v5  ;;  %v6873_v35 = vcombine.low %v12315_v7, %v6458_v28  ;;  %v8998_v6 = vpop.permute.xlu0 %8997 }
 0x177   : > { %9032 = vrot.lane.b32.xlu0 %v4062_v38, %s10662_s29  ;;  %v12476_v24 = vrot.slane %v938_v4, %v10749_v5  ;;  %v6874_v21 = vcombine.low %v6466_v62, %v6465_v31  ;;  %v4308_v9 = vcombine.high %v12001_v2, %v12001_v2  ;;  %v12486_v0 = vcombine.high %v12469_v18, %v12469_v18  ;;  %v10154_v4 = vld [vmem:[%s10747_s28 + $0xd9] sm:$0x3f]  ;;  %v10155_v62 = vld [vmem:[%s10747_s28 + $0xe1] sm:$0xff] }
 0x178   : > { %v970_v14 = vcombine.low %v962_v39, %v969_v8  ;;  %v12490_v36 = vcombine.high %v12472_v16, %v12472_v16  ;;  %v4323_v59 = vcombine.high %v12027_v20, %v12027_v20  ;;  %v6881_v13 = vrot.slane %v6873_v35, %v10749_v5 }
 0x179   : > { %v953_v7 = vcombine.low %v12464_v22, %v12476_v24  ;;  %v6888_v2 = vrot.slane %v6874_v21, %v10749_v5  ;;  %v4322_v63 = vrot.slane %v4308_v9, %v10749_v5  ;;  %v6890_v30 = vcombine.low %v12469_v18, %v12486_v0  ;;  %v12523_v21 = vpop.permute.xlu1 %9075 }
 0x17a   : > { %v6891_v56 = vcombine.low %v12472_v16, %v12490_v36  ;;  %v4348_v20 = vrot.slane %v12480_v17, %v10749_v5  ;;  %v4759_v41 = vcombine.low %v12195_v12, %v12206_v43  ;;  %v4775_v28 = vcombine.low %v12200_v19, %v12214_v32 }
 0x17b   : > { %v1147_v15 = vpack.c.bf16 %v970_v14, %v953_v7  ;;  %v6889_v40 = vcombine.low %v6881_v13, %v6888_v2  ;;  %v4758_v54 = vcombine.low %v4323_v59, %v4322_v63  ;;  %v6898_v50 = vrot.slane %v6890_v30, %v10749_v5 }
 0x17c   : > { %v6905_v31 = vrot.slane %v6891_v56, %v10749_v5  ;;  %v4356_v23 = vcombine.high %v4348_v20, %v4348_v20  ;;  %v4773_v38 = vrot.slane %v4759_v41, %v10749_v5  ;;  %v4783_v43 = vrot.slane %v4775_v28, %v10749_v5 }
 0x17d   : > { %v9267_v39 = vsel %vm9243_vm0, %v1147_v15, %v8959_v11  ;;  %v4766_v12 = vrot.slane %v4758_v54, %v10749_v5  ;;  %v9449_v19 = vsel %vm9445_vm9, %v12429_v49, %v9220_v58  ;;  %v7423_v14 = vcombine.high %v10154_v4, %v10154_v4  ;;  %v12533_v58 = vld [vmem:[%s10747_s28 + $0x7a] sm:$0x3f]  ;;  %v12550_v54 = vpop.permute.xlu0 %8948 }
 0x17e   : > { %v6906_v32 = vcombine.low %v6898_v50, %v6905_v31  ;;  %v4776_v8 = vcombine.low %v4348_v20, %v4356_v23  ;;  %v9299_v35 = vsel %vm9283_vm1, %v9267_v39, %v8998_v6  ;;  %10247 = vmatmul.mubr.msk.bf16.gmra.mrb[4].mxu0 %vm9508_vm10, %v9449_v19  ;;  %v7430_v11 = vrot.slane %v10154_v4, %v10749_v5  ;;  %v12563_v4 = vpop.permute.xlu1 %9114  ;;  %v186_v19 = vld [vmem:[%s10747_s28 + $0x28] sm:$0x3f] }
 0x17f   : > { %v4774_v9 = vcombine.low %v4766_v12, %v4773_v38  ;;  %v7439_v59 = vcombine.high %v10155_v62, %v10155_v62  ;;  %10250 = vmatprep.mubr.msk.bf16.mxu0 %vm10671_vm8, %v13660_v1  ;;  %v12530_v49 = vrot.slane %v10155_v62, %v10749_v5  ;;  %v5280_v2 = vcombine.high %v12090_v57, %v12090_v57 }
 0x180   : > { %v6984_v7 = vpack.c.bf16 %v6906_v32, %v6889_v40  ;;  %v4790_v13 = vrot.slane %v4776_v8, %v10749_v5  ;;  %v7437_v63 = vrot.slane %v7423_v14, %v10749_v5  ;;  %v7438_v30 = vcombine.high %v7430_v11, %v7430_v11 }
 0x181   : > { %v12539_v56 = vrot.slane %v7439_v59, %v10749_v5  ;;  %v7845_v20 = vcombine.low %v12354_v27, %v7430_v11  ;;  %v12545_v15 = vcombine.high %v12530_v49, %v12530_v49  ;;  %v5294_v40 = vrot.slane %v5280_v2, %v10749_v5 }
 0x182   : > { %9159 = vrot.lane.b32.xlu1 %v6984_v7, %s10666_s6  ;;  %v4791_v41 = vcombine.low %v4783_v43, %v4790_v13  ;;  %v5295_v57 = vcombine.high %v12107_v25, %v12107_v25  ;;  %v7846_v27 = vcombine.low %v7438_v30, %v7437_v63  ;;  %v5320_v50 = vrot.slane %v12533_v58, %v10749_v5  ;;  %v12583_v63 = vpop.permute.xlu0 %8987 }
 0x183   : > { %v12554_v28 = vcombine.high %v12539_v56, %v12539_v56  ;;  %v7853_v6 = vrot.slane %v7845_v20, %v10749_v5  ;;  %v7862_v23 = vcombine.low %v12530_v49, %v12545_v15  ;;  %v5731_v25 = vcombine.low %v12253_v34, %v12267_v44 }
 0x184   : > { %v5034_v31 = vpack.c.bf16 %v4791_v41, %v4774_v9  ;;  %v5730_v38 = vcombine.low %v5295_v57, %v5294_v40  ;;  %v7860_v62 = vrot.slane %v7846_v27, %v10749_v5  ;;  %v5328_v12 = vcombine.high %v5320_v50, %v5320_v50  ;;  %v187_v9 = vld [vmem:[%s10747_s28 + $0x30] sm:$0xff]  ;;  %v10182_v41 = vld [vmem:[%s10747_s28 + $0xda] sm:$0x3f] }
 0x185   : > { %v7863_v39 = vcombine.low %v12539_v56, %v12554_v28  ;;  %v5747_v43 = vcombine.low %v12263_v61, %v12274_v10  ;;  %v7870_v32 = vrot.slane %v7862_v23, %v10749_v5  ;;  %v5745_v34 = vrot.slane %v5731_v25, %v10749_v5 }
 0x186   : > { %9071 = vrot.lane.b32.xlu0 %v5034_v31, %s10664_s4  ;;  %v5738_v8 = vrot.slane %v5730_v38, %v10749_v5  ;;  %v9326_v44 = vsel %vm9310_vm2, %v9299_v35, %v12494_v60  ;;  %v7861_v14 = vcombine.low %v7853_v6, %v7860_v62  ;;  %v5748_v59 = vcombine.low %v5320_v50, %v5328_v12  ;;  %v10183_v6 = vld [vmem:[%s10747_s28 + $0xe2] sm:$0xff]  ;;  %v12591_v50 = vpop.permute.xlu1 %9153 }
 0x187   : > { %v7877_v11 = vrot.slane %v7863_v39, %v10749_v5  ;;  %v5755_v61 = vrot.slane %v5747_v43, %v10749_v5  ;;  %v303_v7 = vcombine.high %v12294_v46, %v12294_v46  ;;  %v320_v13 = vcombine.high %v186_v19, %v186_v19 }
 0x188   : > { %v5746_v10 = vcombine.low %v5738_v8, %v5745_v34  ;;  %v327_v2 = vrot.slane %v186_v19, %v10749_v5  ;;  %v5762_v60 = vrot.slane %v5748_v59, %v10749_v5  ;;  %v336_v35 = vcombine.high %v187_v9, %v187_v9  ;;  %v12602_v59 = vpop.permute.xlu0 %9026 }
 0x189   : > { %v7878_v30 = vcombine.low %v7870_v32, %v7877_v11  ;;  %v343_v20 = vrot.slane %v187_v9, %v10749_v5  ;;  %v317_v40 = vrot.slane %v303_v7, %v10749_v5  ;;  %v334_v57 = vrot.slane %v320_v13, %v10749_v5 }
 0x18a   : > { %v335_v27 = vcombine.high %v327_v2, %v327_v2  ;;  %v5763_v31 = vcombine.low %v5755_v61, %v5762_v60  ;;  %v12594_v23 = vrot.slane %v336_v35, %v10749_v5  ;;  %v8395_v12 = vcombine.high %v10182_v41, %v10182_v41 }
 0x18b   : > { %v7956_v46 = vpack.c.bf16 %v7878_v30, %v7861_v14  ;;  %v351_v38 = vcombine.high %v343_v20, %v343_v20  ;;  %v319_v25 = vcombine.high %v317_v40, %v317_v40  ;;  %v784_v39 = vcombine.low %v334_v57, %v343_v20 }
 0x18c   : > { %13662 = vst [vmem:[#allocation11_spill] sm:$0xff] %v12594_v23  ;;  %v768_v62 = vcombine.low %v327_v2, %v335_v27  ;;  %v6006_v43 = vpack.c.bf16 %v5763_v31, %v5746_v10  ;;  %v8402_v32 = vrot.slane %v10182_v41, %v10749_v5  ;;  %v8411_v8 = vcombine.high %v10183_v6, %v10183_v6  ;;  %v12613_v2 = vld [vmem:[%s10747_s28 + $0x88] sm:$0x3f]  ;;  %v12621_v41 = vpop.permute.xlu1 %9192 }
 0x18d   : > { %9198 = vrot.lane.b32.xlu1 %v7956_v46, %s10669_s9  ;;  %v785_v19 = vcombine.low %v351_v38, %v12594_v23  ;;  %v767_v34 = vcombine.low %v317_v40, %v319_v25  ;;  %v792_v14 = vrot.slane %v784_v39, %v10749_v5  ;;  %v8409_v11 = vrot.slane %v8395_v12, %v10749_v5 }
 0x18e   : > { %v782_v9 = vrot.slane %v768_v62, %v10749_v5  ;;  %9110 = vrot.lane.b32.xlu0 %v6006_v43, %s10667_s7  ;;  %v8410_v7 = vcombine.high %v8402_v32, %v8402_v32  ;;  %v12607_v10 = vrot.slane %v10183_v6, %v10749_v5  ;;  %v12610_v13 = vrot.slane %v8411_v8, %v10749_v5  ;;  %v12645_v8 = vpop.permute.xlu0 %9065 }
 0x18f   : > { %v799_v61 = vrot.slane %v785_v19, %v10749_v5  ;;  %13663 = vst [vmem:[#allocation12_spill] sm:$0xff] %v12613_v2  ;;  %v775_v30 = vrot.slane %v767_v34, %v10749_v5  ;;  %v8817_v60 = vcombine.low %v12391_v52, %v8402_v32  ;;  %v6253_v35 = vcombine.high %v12143_v55, %v12143_v55  ;;  %v10143_v19 = vld [vmem:[%s10747_s28 + $0x81] sm:$0xff] }
 0x190   : > { %v6268_v20 = vcombine.high %v12162_v37, %v12162_v37  ;;  %v12625_v57 = vcombine.high %v12607_v10, %v12607_v10  ;;  %v12629_v27 = vcombine.high %v12610_v13, %v12610_v13  ;;  %v8818_v6 = vcombine.low %v8410_v7, %v8409_v11  ;;  %v12650_v11 = vld [vmem:[%s10747_s28 + $0x89] sm:$0x3f] }
 0x191   : > { %v800_v40 = vcombine.low %v792_v14, %v799_v61  ;;  %v783_v52 = vcombine.low %v775_v30, %v782_v9  ;;  %v8825_v46 = vrot.slane %v8817_v60, %v10749_v5  ;;  %v6267_v55 = vrot.slane %v6253_v35, %v10749_v5  ;;  %13664 = vst [vmem:[#allocation13_spill] sm:$0xff] %v12650_v11  ;;  %v1178_v30 = vld [vmem:[%s10747_s28 + $0xc9] sm:$0x3f]  ;;  %v12659_v60 = vpop.permute.xlu1 %9231 }
 0x192   : > { %v6293_v37 = vrot.slane %v12613_v2, %v10749_v5  ;;  %v8832_v31 = vrot.slane %v8818_v6, %v10749_v5  ;;  %v8834_v38 = vcombine.low %v12607_v10, %v12625_v57  ;;  %v8835_v25 = vcombine.low %v12610_v13, %v12629_v27 }
 0x193   : > { %v9353_v62 = vsel %vm9337_vm3, %v9326_v44, %v12523_v21  ;;  %v1142_v39 = vpack.c.bf16 %v800_v40, %v783_v52  ;;  %v6703_v43 = vcombine.low %v6268_v20, %v6267_v55  ;;  %v7225_v32 = vcombine.high %v12189_v47, %v12189_v47  ;;  %v1179_v55 = vld [vmem:[%s10747_s28 + $0xd1] sm:$0xff] }
 0x194   : > { %v6301_v12 = vcombine.high %v6293_v37, %v6293_v37  ;;  %v8833_v34 = vcombine.low %v8825_v46, %v8832_v31  ;;  %v8842_v9 = vrot.slane %v8834_v38, %v10749_v5  ;;  %v8849_v14 = vrot.slane %v8835_v25, %v10749_v5 }
 0x195   : > { %v7240_v21 = vcombine.high %v12210_v42, %v12210_v42  ;;  %v9252_v44 = vsel %vm9243_vm0, %v1142_v39, %v12550_v54  ;;  %v6711_v61 = vrot.slane %v6703_v43, %v10749_v5  ;;  %v7239_v47 = vrot.slane %v7225_v32, %v10749_v5 }
 0x196   : > { %v6721_v7 = vcombine.low %v6293_v37, %v6301_v12  ;;  %v8850_v35 = vcombine.low %v8842_v9, %v8849_v14  ;;  %v9289_v20 = vsel %vm9283_vm1, %v9252_v44, %v12583_v63  ;;  %v7241_v40 = vcombine.high %v10143_v19, %v10143_v19  ;;  %v12681_v12 = vld [vmem:[%s10747_s28 + $0xd9] sm:$0x3f] }
 0x197   : > { %v12664_v6 = vrot.slane %v10143_v19, %v10749_v5  ;;  %v6719_v42 = vcombine.low %v6711_v61, %v12464_v22  ;;  %v7265_v52 = vrot.slane %v12650_v11, %v10749_v5  ;;  %v7675_v46 = vcombine.low %v7240_v21, %v7239_v47  ;;  %13665 = vst [vmem:[#allocation14_spill] sm:$0xff] %v12681_v12  ;;  %v12684_v19 = vpop.permute.xlu0 %9104 }
 0x198   : > { %v6735_v54 = vrot.slane %v6721_v7, %v10749_v5  ;;  %v8928_v37 = vpack.c.bf16 %v8850_v35, %v8833_v34  ;;  %v12672_v31 = vrot.slane %v7241_v40, %v10749_v5  ;;  %v1622_v38 = vcombine.high %v1178_v30, %v1178_v30  ;;  %v12695_v7 = vpop.permute.xlu1 %9182 }
 0x199   : > { %v12676_v63 = vcombine.high %v12664_v6, %v12664_v6  ;;  %v7273_v39 = vcombine.high %v7265_v52, %v7265_v52  ;;  %v7683_v22 = vrot.slane %v7675_v46, %v10749_v5  ;;  %v1629_v43 = vrot.slane %v1178_v30, %v10749_v5 }
 0x19a   : > { %v6736_v25 = vcombine.low %v12476_v24, %v6735_v54  ;;  %9237 = vrot.lane.b32.xlu1 %v8928_v37, %s10668_s8  ;;  %v12689_v32 = vcombine.high %v12672_v31, %v12672_v31  ;;  %v1636_v24 = vrot.slane %v1622_v38, %v10749_v5  ;;  %v1638_v9 = vcombine.high %v1179_v55, %v1179_v55 }
 0x19b   : > { %v7676_v34 = vcombine.low %v12664_v6, %v12676_v63  ;;  %v7693_v21 = vcombine.low %v7265_v52, %v7273_v39  ;;  %v1637_v44 = vcombine.high %v1629_v43, %v1629_v43  ;;  %v1645_v61 = vrot.slane %v1179_v55, %v10749_v5  ;;  %v10171_v39 = vld [vmem:[%s10747_s28 + $0x82] sm:$0xff] }
 0x19c   : > { %v6979_v14 = vpack.c.bf16 %v6736_v25, %v6719_v42  ;;  %v7692_v30 = vcombine.low %v12672_v31, %v12689_v32  ;;  %v1652_v35 = vrot.slane %v1638_v9, %v10749_v5  ;;  %v12703_v40 = vrot.slane %v12681_v12, %v10749_v5 }
 0x19d   : > { %v7690_v47 = vrot.slane %v7676_v34, %v10749_v5  ;;  %v7707_v42 = vrot.slane %v7693_v21, %v10749_v5  ;;  %v1653_v54 = vcombine.high %v1645_v61, %v1645_v61  ;;  %v2045_v52 = vcombine.low %v1629_v43, %v1637_v44  ;;  %v12716_v43 = vld [vmem:[%s10747_s28 + $0x8a] sm:$0x3f] }
 0x19e   : > { %13666 = vst [vmem:[#allocation15_spill] sm:$0xff] %v12703_v40  ;;  %9149 = vrot.lane.b32.xlu0 %v6979_v14, %s10666_s6  ;;  %v2046_v46 = vcombine.low %v1636_v24, %v1645_v61  ;;  %v7700_v37 = vrot.slane %v7692_v30, %v10749_v5  ;;  %v1654_v38 = vcombine.high %v1652_v35, %v1652_v35  ;;  %13667 = vst [vmem:[#allocation16_spill] sm:$0xff] %v12716_v43  ;;  %v12718_v24 = vpop.permute.xlu0 %9143  ;;  %v13668_v61 = vld [vmem:[#allocation8_spill] sm:$0xff]  ;;  %v2150_v30 = vld [vmem:[%s10747_s28 + $0xca] sm:$0x3f] }
 0x19f   : > { %v7691_v55 = vcombine.low %v7683_v22, %v7690_v47  ;;  %v9380_v25 = vsel %vm9364_vm4, %v9353_v62, %v12563_v4  ;;  %v2053_v34 = vrot.slane %v2045_v52, %v10749_v5  ;;  %v2062_v14 = vcombine.low %v1653_v54, %v1652_v35  ;;  %v13669_v62 = vld [vmem:[#allocation9_spill] sm:$0xff] }
 0x1a0   : > { %v2060_v9 = vrot.slane %v2046_v46, %v10749_v5  ;;  %v9316_v21 = vsel %vm9310_vm2, %v9289_v20, %v12602_v59  ;;  %v7708_v22 = vcombine.low %v7700_v37, %v7707_v42  ;;  %v2063_v44 = vcombine.low %v1654_v38, %v12703_v40  ;;  %v2151_v20 = vld [vmem:[%s10747_s28 + $0xd2] sm:$0xff]  ;;  %v12731_v46 = vpop.permute.xlu1 %9221 }
 0x1a1   : > { %v8197_v4 = vcombine.high %v13668_v61, %v13668_v61  ;;  %v8212_v47 = vcombine.high %v13669_v62, %v13669_v62  ;;  %v2070_v35 = vrot.slane %v2062_v14, %v10749_v5  ;;  %v8213_v54 = vcombine.high %v10171_v39, %v10171_v39  ;;  %v12747_v62 = vld [vmem:[%s10747_s28 + $0xda] sm:$0x3f] }
 0x1a2   : > { %v2061_v52 = vcombine.low %v2053_v34, %v2060_v9  ;;  %v12728_v59 = vrot.slane %v10171_v39, %v10749_v5  ;;  %v7951_v42 = vpack.c.bf16 %v7708_v22, %v7691_v55  ;;  %v2077_v37 = vrot.slane %v2063_v44, %v10749_v5  ;;  %13671 = vst [vmem:[#allocation9_spill] sm:$0xff] %v12747_v62 }
 0x1a3   : > { %v8211_v38 = vrot.slane %v8197_v4, %v10749_v5  ;;  %v8237_v61 = vrot.slane %v12716_v43, %v10749_v5  ;;  %v12738_v34 = vrot.slane %v8213_v54, %v10749_v5  ;;  %v2594_v39 = vcombine.high %v2150_v30, %v2150_v30 }
 0x1a4   : > { %v12742_v9 = vcombine.high %v12728_v59, %v12728_v59  ;;  %v2601_v14 = vrot.slane %v2150_v30, %v10749_v5  ;;  %9188 = vrot.lane.b32.xlu1 %v7951_v42, %s10669_s9  ;;  %v2078_v55 = vcombine.low %v2070_v35, %v2077_v37  ;;  %v2610_v4 = vcombine.high %v2151_v20, %v2151_v20  ;;  %v12756_v30 = vpop.permute.xlu0 %8960  ;;  %v12768_v23 = vpop.permute.xlu1 %9038 }
 0x1a5   : > { %v8245_v22 = vcombine.high %v8237_v61, %v8237_v61  ;;  %v8647_v44 = vcombine.low %v8212_v47, %v8211_v38  ;;  %v12751_v43 = vcombine.high %v12738_v34, %v12738_v34  ;;  %v2608_v40 = vrot.slane %v2594_v39, %v10749_v5  ;;  %13673 = vst [vmem:[#allocation18_spill] sm:$0xff] %v12768_v23 }
 0x1a6   : > { %13670 = vst [vmem:[#allocation8_spill] sm:$0xff] %v12742_v9  ;;  %v8648_v54 = vcombine.low %v12728_v59, %v12742_v9  ;;  %v2609_v12 = vcombine.high %v2601_v14, %v2601_v14  ;;  %v2123_v42 = vpack.c.bf16 %v2078_v55, %v2061_v52  ;;  %v2617_v37 = vrot.slane %v2151_v20, %v10749_v5 }
 0x1a7   : > { %13672 = vst [vmem:[#allocation17_spill] sm:$0xff] %v12751_v43  ;;  %v8655_v35 = vrot.slane %v8647_v44, %v10749_v5  ;;  %v8665_v47 = vcombine.low %v8237_v61, %v8245_v22  ;;  %v8664_v11 = vcombine.low %v12738_v34, %v12751_v43  ;;  %v2624_v2 = vrot.slane %v2610_v4, %v10749_v5  ;;  %v10044_v22 = vld [vmem:[%s10747_s28 + $0xd8] sm:$0x3f] }
 0x1a8   : > { %v8662_v38 = vrot.slane %v8648_v54, %v10749_v5  ;;  %v12766_v39 = vrot.slane %v12747_v62, %v10749_v5  ;;  %8966 = vrot.lane.b32.xlu0 %v2123_v42, %s10663_s30  ;;  %v2625_v61 = vcombine.high %v2617_v37, %v2617_v37  ;;  %v3017_v20 = vcombine.low %v2601_v14, %v2609_v12  ;;  %v12777_v62 = vld [vmem:[%s10747_s28 + $0xe8] sm:$0x3f] }
 0x1a9   : > { %v8679_v52 = vrot.slane %v8665_v47, %v10749_v5  ;;  %v3018_v55 = vcombine.low %v2608_v40, %v2617_v37  ;;  %v8672_v54 = vrot.slane %v8664_v11, %v10749_v5  ;;  %v2626_v43 = vcombine.high %v2624_v2, %v2624_v2  ;;  %v1167_v47 = vld [vmem:[%s10747_s28 + $0x71] sm:$0xff]  ;;  %v12786_v37 = vpop.permute.xlu0 %8999 }
 0x1aa   : > { %v8663_v44 = vcombine.low %v8655_v35, %v8662_v38  ;;  %v9407_v4 = vsel %vm9391_vm6, %v9380_v25, %v12591_v50  ;;  %v3025_v23 = vrot.slane %v3017_v20, %v10749_v5  ;;  %v3034_v9 = vcombine.low %v2625_v61, %v2624_v2  ;;  %v1168_v61 = vld [vmem:[%s10747_s28 + $0x79] sm:$0x3f]  ;;  %v12798_v20 = vpop.permute.xlu1 %9077 }
 0x1ab   : > { %v3032_v42 = vrot.slane %v3018_v55, %v10749_v5  ;;  %v9343_v12 = vsel %vm9337_vm3, %v9316_v21, %v12645_v8  ;;  %v8680_v40 = vcombine.low %v8672_v54, %v8679_v52  ;;  %v3035_v14 = vcombine.low %v2626_v43, %v12766_v39  ;;  %v13675_v55 = vld [vmem:[#allocation10_spill] sm:$0xff] }
 0x1ac   : > { %v3567_v35 = vcombine.high %v10044_v22, %v10044_v22  ;;  %v3574_v11 = vrot.slane %v10044_v22, %v10749_v5  ;;  %v3042_v25 = vrot.slane %v3034_v9, %v10749_v5  ;;  %v12791_v38 = vrot.slane %v12777_v62, %v10749_v5 }
 0x1ad   : > { %v3033_v50 = vcombine.low %v3025_v23, %v3032_v42  ;;  %v4007_v2 = vcombine.low %v12486_v0, %v12472_v16  ;;  %v8923_v8 = vpack.c.bf16 %v8680_v40, %v8663_v44  ;;  %v3049_v21 = vrot.slane %v3035_v14, %v10749_v5 }
 0x1ae   : > { %13674 = vst [vmem:[#allocation19_spill] sm:$0xff] %v12791_v38  ;;  %v3581_v43 = vrot.slane %v3567_v35, %v10749_v5  ;;  %v3582_v52 = vcombine.high %v3574_v11, %v3574_v11  ;;  %v4008_v23 = vcombine.low %v12490_v36, %v12791_v38  ;;  %v1424_v22 = vcombine.high %v13675_v55, %v13675_v55 }
 0x1af   : > { %v4015_v9 = vrot.slane %v4007_v2, %v10749_v5  ;;  %v1440_v54 = vcombine.high %v1167_v47, %v1167_v47  ;;  %9227 = vrot.lane.b32.xlu1 %v8923_v8, %s10668_s8  ;;  %v3050_v16 = vcombine.low %v3042_v25, %v3049_v21  ;;  %v1447_v42 = vrot.slane %v1167_v47, %v10749_v5  ;;  %v10072_v25 = vld [vmem:[%s10747_s28 + $0xd9] sm:$0x3f] }
 0x1b0   : > { %v3990_v0 = vcombine.low %v3574_v11, %v3582_v52  ;;  %v3991_v44 = vcombine.low %v3581_v43, %v12469_v18  ;;  %v4022_v40 = vrot.slane %v4008_v23, %v10749_v5  ;;  %v1438_v14 = vrot.slane %v1424_v22, %v10749_v5  ;;  %v12814_v11 = vpop.permute.xlu0 %8950 }
 0x1b1   : > { %v1454_v36 = vrot.slane %v1440_v54, %v10749_v5  ;;  %v1457_v35 = vcombine.high %v1168_v61, %v1168_v61  ;;  %v3095_v2 = vpack.c.bf16 %v3050_v16, %v3033_v50  ;;  %v1455_v8 = vcombine.high %v1447_v42, %v1447_v42  ;;  %v12822_v54 = vld [vmem:[%s10747_s28 + $0xe9] sm:$0x3f]  ;;  %v12824_v16 = vpop.permute.xlu1 %9116 }
 0x1b2   : > { %v3998_v55 = vrot.slane %v3990_v0, %v10749_v5  ;;  %v4005_v38 = vrot.slane %v3991_v44, %v10749_v5  ;;  %v4023_v18 = vcombine.low %v4015_v9, %v4022_v40  ;;  %v1464_v47 = vrot.slane %v1168_v61, %v10749_v5 }
 0x1b3   : > { %v1456_v21 = vcombine.high %v1454_v36, %v1454_v36  ;;  %v1471_v43 = vrot.slane %v1457_v35, %v10749_v5  ;;  %9005 = vrot.lane.b32.xlu0 %v3095_v2, %s10665_s5  ;;  %v1875_v23 = vcombine.low %v1438_v14, %v1447_v42  ;;  %v1876_v50 = vcombine.low %v1455_v8, %v1454_v36  ;;  %v2139_v14 = vld [vmem:[%s10747_s28 + $0x72] sm:$0xff] }
 0x1b4   : > { %v4006_v52 = vcombine.low %v3998_v55, %v4005_v38  ;;  %v9434_v22 = vsel %vm9418_vm7, %v9407_v4, %v12621_v41  ;;  %v1472_v0 = vcombine.high %v1464_v47, %v1464_v47  ;;  %v9370_v61 = vsel %vm9364_vm4, %v9343_v12, %v12684_v19 }
 0x1b5   : > { %v1892_v9 = vcombine.low %v1456_v21, %v1464_v47  ;;  %v4539_v44 = vcombine.high %v10072_v25, %v10072_v25  ;;  %v1883_v35 = vrot.slane %v1875_v23, %v10749_v5  ;;  %v1890_v38 = vrot.slane %v1876_v50, %v10749_v5 }
 0x1b6   : > { %v4068_v40 = vpack.c.bf16 %v4023_v18, %v4006_v52  ;;  %v4546_v42 = vrot.slane %v10072_v25, %v10749_v5  ;;  %v1893_v41 = vcombine.low %v1472_v0, %v1471_v43  ;;  %v12836_v2 = vrot.slane %v12822_v54, %v10749_v5  ;;  %v12843_v25 = vpop.permute.xlu0 %8989  ;;  %v2140_v43 = vld [vmem:[%s10747_s28 + $0x7a] sm:$0x3f] }
 0x1b7   : > { %v1900_v4 = vrot.slane %v1892_v9, %v10749_v5  ;;  %v4553_v36 = vrot.slane %v4539_v44, %v10749_v5  ;;  %v1891_v19 = vcombine.low %v1883_v35, %v1890_v38  ;;  %v4979_v55 = vcombine.low %v12545_v15, %v12539_v56 }
 0x1b8   : > { %9044 = vrot.lane.b32.xlu1 %v4068_v40, %s10662_s29  ;;  %v4554_v12 = vcombine.high %v4546_v42, %v4546_v42  ;;  %v2396_v8 = vcombine.high %v12366_v26, %v12366_v26  ;;  %v1907_v18 = vrot.slane %v1893_v41, %v10749_v5  ;;  %v4980_v47 = vcombine.low %v12554_v28, %v12836_v2  ;;  %v12853_v26 = vpop.permute.xlu1 %9155 }
 0x1b9   : > { %v4963_v21 = vcombine.low %v4553_v36, %v12530_v49  ;;  %v2412_v52 = vcombine.high %v2139_v14, %v2139_v14  ;;  %v4987_v50 = vrot.slane %v4979_v55, %v10749_v5  ;;  %v2419_v15 = vrot.slane %v2139_v14, %v10749_v5 }
 0x1ba   : > { %v4962_v23 = vcombine.low %v4546_v42, %v4554_v12  ;;  %v2410_v56 = vrot.slane %v2396_v8, %v10749_v5  ;;  %v1908_v0 = vcombine.low %v1900_v4, %v1907_v18  ;;  %v4994_v49 = vrot.slane %v4980_v47, %v10749_v5  ;;  %v10100_v12 = vld [vmem:[%s10747_s28 + $0xda] sm:$0x3f]  ;;  %v12865_v47 = vpop.permute.xlu0 %9028 }
 0x1bb   : > { %v4977_v9 = vrot.slane %v4963_v21, %v10749_v5  ;;  %v2426_v28 = vrot.slane %v2412_v52, %v10749_v5  ;;  %v2427_v40 = vcombine.high %v2419_v15, %v2419_v15  ;;  %v2429_v35 = vcombine.high %v2140_v43, %v2140_v43  ;;  %v12863_v21 = vld [vmem:[%s10747_s28 + $0xea] sm:$0x3f] }
 0x1bc   : > { %v4970_v44 = vrot.slane %v4962_v23, %v10749_v5  ;;  %v2436_v38 = vrot.slane %v2140_v43, %v10749_v5  ;;  %v2118_v42 = vpack.c.bf16 %v1908_v0, %v1891_v19  ;;  %v4995_v41 = vcombine.low %v4987_v50, %v4994_v49  ;;  %v12876_v49 = vpop.permute.xlu1 %9194 }
 0x1bd   : > { %v2428_v36 = vcombine.high %v2426_v28, %v2426_v28  ;;  %v2847_v14 = vcombine.low %v2410_v56, %v2419_v15  ;;  %v2443_v55 = vrot.slane %v2429_v35, %v10749_v5  ;;  %v2848_v18 = vcombine.low %v2427_v40, %v2426_v28 }
 0x1be   : > { %v4978_v4 = vcombine.low %v4970_v44, %v4977_v9  ;;  %v2444_v8 = vcombine.high %v2436_v38, %v2436_v38  ;;  %8956 = vrot.lane.b32.xlu0 %v2118_v42, %s10663_s30  ;;  %v9461_v19 = vsel %vm9445_vm9, %v9434_v22, %v12659_v60  ;;  %v9397_v23 = vsel %vm9391_vm6, %v9370_v61, %v12718_v24  ;;  %v10034_v9 = vld [vmem:[%s10747_s28 + $0x88] sm:$0x3f] }
 0x1bf   : > { %v2855_v52 = vrot.slane %v2847_v14, %v10749_v5  ;;  %v2864_v43 = vcombine.low %v2428_v36, %v2436_v38  ;;  %v2862_v56 = vrot.slane %v2848_v18, %v10749_v5  ;;  %v5511_v0 = vcombine.high %v10100_v12, %v10100_v12  ;;  %10271 = vmatmul.mubr.msk.bf16.vlgmr.msra.gmra.mrb[0].mxu1 %vm9508_vm10, %v9461_v19  ;;  %v200_v19 = vld [vmem:[%s10747_s28 + $0x98] sm:$0x3f] }
 0x1c0   : > { %v5040_v50 = vpack.c.bf16 %v4995_v41, %v4978_v4  ;;  %v2865_v15 = vcombine.low %v2444_v8, %v2443_v55  ;;  %v5518_v44 = vrot.slane %v10100_v12, %v10749_v5  ;;  %v12882_v60 = vrot.slane %v12863_v21, %v10749_v5  ;;  %10274 = vmatprep.mubr.msk.bf16.mxu1 %vm10671_vm8, %v13660_v1  ;;  %v12899_v4 = vpop.permute.xlu0 %9067 }
 0x1c1   : > { %v2872_v28 = vrot.slane %v2864_v43, %v10749_v5  ;;  %v5951_v24 = vcombine.low %v12625_v57, %v12610_v13  ;;  %v2863_v22 = vcombine.low %v2855_v52, %v2862_v56  ;;  %v5525_v40 = vrot.slane %v5511_v0, %v10749_v5 }
 0x1c2   : > { %9083 = vrot.lane.b32.xlu1 %v5040_v50, %s10664_s4  ;;  %v2879_v61 = vrot.slane %v2865_v15, %v10749_v5  ;;  %v3369_v35 = vcombine.high %v12400_v51, %v12400_v51  ;;  %v5526_v38 = vcombine.high %v5518_v44, %v5518_v44  ;;  %v5952_v42 = vcombine.low %v12629_v27, %v12882_v60  ;;  %v12908_v50 = vpop.permute.xlu1 %9233 }
 0x1c3   : > { %v5959_v13 = vrot.slane %v5951_v24, %v10749_v5  ;;  %v3402_v57 = vcombine.high %v10034_v9, %v10034_v9  ;;  %v5935_v36 = vcombine.low %v5525_v40, %v12607_v10  ;;  %v3409_v12 = vrot.slane %v10034_v9, %v10749_v5  ;;  %v10128_v24 = vld [vmem:[%s10747_s28 + $0xe8] sm:$0x3f] }
 0x1c4   : > { %v2880_v41 = vcombine.low %v2872_v28, %v2879_v61  ;;  %v3383_v14 = vrot.slane %v3369_v35, %v10749_v5  ;;  %v5934_v55 = vcombine.low %v5518_v44, %v5526_v38  ;;  %v5966_v51 = vrot.slane %v5952_v42, %v10749_v5  ;;  %v10129_v42 = vld [vmem:[%s10747_s28 + $0xf0] sm:$0xff] }
 0x1c5   : > { %v3416_v8 = vrot.slane %v3402_v57, %v10749_v5  ;;  %v3821_v27 = vcombine.low %v12443_v45, %v12439_v3  ;;  %v5949_v52 = vrot.slane %v5935_v36, %v10749_v5  ;;  %v3417_v10 = vcombine.high %v3409_v12, %v3409_v12 }
 0x1c6   : > { %v3090_v18 = vpack.c.bf16 %v2880_v41, %v2863_v22  ;;  %v3820_v43 = vcombine.low %v3383_v14, %v12432_v29  ;;  %v5942_v56 = vrot.slane %v5934_v55, %v10749_v5  ;;  %v5967_v15 = vcombine.low %v5959_v13, %v5966_v51  ;;  %v12920_v29 = vld [vmem:[%s10747_s28 + $0xa0] sm:$0xff]  ;;  %v12932_v13 = vpop.permute.xlu0 %9106  ;;  %v12937_v51 = vpop.permute.xlu1 %9184 }
 0x1c7   : > { %v3835_v0 = vrot.slane %v3821_v27, %v10749_v5  ;;  %v3837_v9 = vcombine.low %v12454_v33, %v3409_v12  ;;  %v3838_v45 = vcombine.low %v3417_v10, %v3416_v8  ;;  %v12917_v28 = vsel %vm9418_vm7, %v9397_v23, %v12695_v7  ;;  %v12941_v27 = vld [vmem:[%s10747_s28 + $0xf8] sm:$0x3f] }
 0x1c8   : > { %8995 = vrot.lane.b32.xlu0 %v3090_v18, %s10665_s5  ;;  %v3828_v3 = vrot.slane %v3820_v43, %v10749_v5  ;;  %v534_v44 = vcombine.high %v12426_v53, %v12426_v53  ;;  %v5950_v22 = vcombine.low %v5942_v56, %v5949_v52  ;;  %v549_v33 = vcombine.high %v12447_v48, %v12447_v48 }
 0x1c9   : > { %v3845_v61 = vrot.slane %v3837_v9, %v10749_v5  ;;  %v551_v40 = vcombine.high %v200_v19, %v200_v19  ;;  %v3852_v38 = vrot.slane %v3838_v45, %v10749_v5  ;;  %v558_v23 = vrot.slane %v200_v19, %v10749_v5 }
 0x1ca   : > { %v3836_v35 = vcombine.low %v3828_v3, %v3835_v0  ;;  %v548_v7 = vrot.slane %v534_v44, %v10749_v5  ;;  %v6012_v53 = vpack.c.bf16 %v5967_v15, %v5950_v22  ;;  %v574_v41 = vrot.slane %v12920_v29, %v10749_v5  ;;  %v10062_v44 = vld [vmem:[%s10747_s28 + $0x89] sm:$0x3f] }
 0x1cb   : > { %v565_v57 = vrot.slane %v551_v40, %v10749_v5  ;;  %v6484_v36 = vcombine.high %v10128_v24, %v10128_v24  ;;  %v3853_v48 = vcombine.low %v3845_v61, %v3852_v38  ;;  %v566_v12 = vcombine.high %v558_v23, %v558_v23  ;;  %v12958_v40 = vpop.permute.xlu0 %9145 }
 0x1cc   : > { %v550_v14 = vcombine.high %v548_v7, %v548_v7  ;;  %v971_v55 = vcombine.low %v549_v33, %v548_v7  ;;  %9122 = vrot.lane.b32.xlu1 %v6012_v53, %s10667_s7  ;;  %v582_v8 = vcombine.high %v574_v41, %v574_v41  ;;  %v6491_v18 = vrot.slane %v10128_v24, %v10749_v5 }
 0x1cd   : > { %v6498_v52 = vrot.slane %v6484_v36, %v10749_v5  ;;  %v6500_v10 = vcombine.high %v10129_v42, %v10129_v42  ;;  %v4063_v43 = vpack.c.bf16 %v3853_v48, %v3836_v35  ;;  %v988_v15 = vcombine.low %v566_v12, %v565_v57  ;;  %v12962_v36 = vpop.permute.xlu1 %9223 }
 0x1ce   : > { %v972_v19 = vcombine.low %v550_v14, %v558_v23  ;;  %v979_v56 = vrot.slane %v971_v55, %v10749_v5  ;;  %v989_v0 = vcombine.low %v574_v41, %v582_v8  ;;  %v6499_v9 = vcombine.high %v6491_v18, %v6491_v18 }
 0x1cf   : > { %v6507_v3 = vrot.slane %v10129_v42, %v10749_v5  ;;  %v6514_v45 = vrot.slane %v6500_v10, %v10749_v5  ;;  %9034 = vrot.lane.b32.xlu0 %v4063_v43, %s10662_s29  ;;  %v996_v24 = vrot.slane %v988_v15, %v10749_v5  ;;  %v12954_v61 = vrot.slane %v12941_v27, %v10749_v5  ;;  %v10156_v15 = vld [vmem:[%s10747_s28 + $0xe9] sm:$0x3f] }
 0x1d0   : > { %v986_v22 = vrot.slane %v972_v19, %v10749_v5  ;;  %v4341_v33 = vcombine.high %v12480_v17, %v12480_v17  ;;  %v1003_v35 = vrot.slane %v989_v0, %v10749_v5  ;;  %v6907_v23 = vcombine.low %v6491_v18, %v6499_v9 }
 0x1d1   : > { %v6515_v38 = vcombine.high %v6507_v3, %v6507_v3  ;;  %v6516_v7 = vcombine.high %v6514_v45, %v6514_v45  ;;  %v6908_v53 = vcombine.low %v6498_v52, %v6507_v3  ;;  %v4374_v41 = vcombine.high %v10062_v44, %v10062_v44 }
 0x1d2   : > { %v987_v42 = vcombine.low %v979_v56, %v986_v22  ;;  %v4355_v57 = vrot.slane %v4341_v33, %v10749_v5  ;;  %v1004_v48 = vcombine.low %v996_v24, %v1003_v35  ;;  %v6915_v14 = vrot.slane %v6907_v23, %v10749_v5  ;;  %v12978_v22 = vpop.permute.xlu0 %8962  ;;  %v10090_v23 = vld [vmem:[%s10747_s28 + $0x8a] sm:$0x3f] }
 0x1d3   : > { %v6924_v17 = vcombine.low %v6515_v38, %v6514_v45  ;;  %v6925_v12 = vcombine.low %v6516_v7, %v12954_v61  ;;  %v6922_v55 = vrot.slane %v6908_v53, %v10749_v5  ;;  %v4381_v8 = vrot.slane %v10062_v44, %v10749_v5  ;;  %v10157_v44 = vld [vmem:[%s10747_s28 + $0xf1] sm:$0xff] }
 0x1d4   : > { %v4388_v18 = vrot.slane %v4374_v41, %v10749_v5  ;;  %v4792_v52 = vcombine.low %v4355_v57, %v12664_v6  ;;  %v1148_v10 = vpack.c.bf16 %v1004_v48, %v987_v42  ;;  %v4793_v56 = vcombine.low %v12676_v63, %v12672_v31  ;;  %v12987_v63 = vld [vmem:[%s10747_s28 + $0xf9] sm:$0x3f] }
 0x1d5   : > { %v6932_v43 = vrot.slane %v6924_v17, %v10749_v5  ;;  %v6939_v19 = vrot.slane %v6925_v12, %v10749_v5  ;;  %v6923_v0 = vcombine.low %v6915_v14, %v6922_v55  ;;  %v4389_v9 = vcombine.high %v4381_v8, %v4381_v8 }
 0x1d6   : > { %v4800_v3 = vrot.slane %v4792_v52, %v10749_v5  ;;  %v4809_v45 = vcombine.low %v12689_v32, %v4381_v8  ;;  %v9270_v6 = vsel %vm9243_vm0, %v1148_v10, %v12756_v30  ;;  %v4807_v33 = vrot.slane %v4793_v56, %v10749_v5  ;;  %v12994_v30 = vpop.permute.xlu1 %9040 }
 0x1d7   : > { %v6940_v24 = vcombine.low %v6932_v43, %v6939_v19  ;;  %v9451_v31 = vsel %vm9445_vm9, %v12917_v28, %v12731_v46  ;;  %v4810_v35 = vcombine.low %v4389_v9, %v4388_v18  ;;  %v9301_v32 = vsel %vm9283_vm1, %v9270_v6, %v12786_v37  ;;  %v13011_v43 = vpop.permute.xlu0 %9001 }
 0x1d8   : > { %v4817_v38 = vrot.slane %v4809_v45, %v10749_v5  ;;  %v7456_v7 = vcombine.high %v10156_v15, %v10156_v15  ;;  %10251 = vmatmul.mubr.msk.bf16.gmra.mrb[8].mxu0 %vm9508_vm10, %v9451_v31  ;;  %v4808_v53 = vcombine.low %v4800_v3, %v4807_v33  ;;  %v7463_v57 = vrot.slane %v10156_v15, %v10749_v5  ;;  %v13676_v31 = vld [vmem:[#allocation8_spill] sm:$0xff] }
 0x1d9   : > { %v6985_v42 = vpack.c.bf16 %v6940_v24, %v6923_v0  ;;  %v7472_v41 = vcombine.high %v10157_v44, %v10157_v44  ;;  %10254 = vmatprep.mubr.msk.bf16.mxu0 %vm10671_vm8, %v13660_v1  ;;  %v4824_v46 = vrot.slane %v4810_v35, %v10749_v5  ;;  %v7479_v37 = vrot.slane %v10157_v44, %v10749_v5 }
 0x1da   : > { %v7470_v28 = vrot.slane %v7456_v7, %v10749_v5  ;;  %v13004_v48 = vrot.slane %v12987_v63, %v10749_v5  ;;  %v7471_v14 = vcombine.high %v7463_v57, %v7463_v57  ;;  %v5313_v12 = vcombine.high %v12533_v58, %v12533_v58  ;;  %v13016_v44 = vpop.permute.xlu1 %9079 }
 0x1db   : > { %9161 = vrot.lane.b32.xlu1 %v6985_v42, %s10666_s6  ;;  %v7486_v17 = vrot.slane %v7472_v41, %v10749_v5  ;;  %v5346_v55 = vcombine.high %v10090_v23, %v10090_v23  ;;  %v4825_v8 = vcombine.low %v4817_v38, %v4824_v46  ;;  %v7487_v18 = vcombine.high %v7479_v37, %v7479_v37  ;;  %v188_v38 = vld [vmem:[%s10747_s28 + $0x38] sm:$0x3f]  ;;  %v189_v46 = vld [vmem:[%s10747_s28 + $0x40] sm:$0xff] }
 0x1dc   : > { %v7880_v52 = vcombine.low %v7470_v28, %v7479_v37  ;;  %v5353_v10 = vrot.slane %v10090_v23, %v10749_v5  ;;  %v7879_v56 = vcombine.low %v7463_v57, %v7471_v14  ;;  %v5327_v15 = vrot.slane %v5313_v12, %v10749_v5  ;;  %v13677_v23 = vld [vmem:[#allocation17_spill] sm:$0xff]  ;;  %v13678_v57 = vld [vmem:[#allocation18_spill] sm:$0xff] }
 0x1dd   : > { %v7488_v19 = vcombine.high %v7486_v17, %v7486_v17  ;;  %v5360_v0 = vrot.slane %v5346_v55, %v10749_v5  ;;  %v5035_v9 = vpack.c.bf16 %v4825_v8, %v4808_v53  ;;  %v7896_v58 = vcombine.low %v7487_v18, %v7486_v17  ;;  %v10184_v14 = vld [vmem:[%s10747_s28 + $0xea] sm:$0x3f] }
 0x1de   : > { %v7894_v3 = vrot.slane %v7880_v52, %v10749_v5  ;;  %v5361_v45 = vcombine.high %v5353_v10, %v5353_v10  ;;  %v7887_v6 = vrot.slane %v7879_v56, %v10749_v5  ;;  %v5764_v33 = vcombine.low %v5327_v15, %v12728_v59  ;;  %v13679_v55 = vld [vmem:[#allocation11_spill] sm:$0xff] }
 0x1df   : > { %v7897_v24 = vcombine.low %v7488_v19, %v13004_v48  ;;  %v5765_v35 = vcombine.low %v13676_v31, %v12738_v34  ;;  %9073 = vrot.lane.b32.xlu0 %v5035_v9, %s10664_s4  ;;  %v7904_v7 = vrot.slane %v7896_v58, %v10749_v5  ;;  %v5781_v42 = vcombine.low %v13677_v23, %v5353_v10 }
 0x1e0   : > { %v5782_v53 = vcombine.low %v5361_v45, %v5360_v0  ;;  %v13029_v41 = vsel %vm9310_vm2, %v9301_v32, %v13678_v57  ;;  %v7895_v28 = vcombine.low %v7887_v6, %v7894_v3  ;;  %v5772_v59 = vrot.slane %v5764_v33, %v10749_v5  ;;  %v13040_v32 = vpop.permute.xlu0 %8952  ;;  %v10185_v3 = vld [vmem:[%s10747_s28 + $0xf2] sm:$0xff]  ;;  %v13046_v45 = vpop.permute.xlu1 %9118 }
 0x1e1   : > { %v7911_v37 = vrot.slane %v7897_v24, %v10749_v5  ;;  %v5779_v34 = vrot.slane %v5765_v35, %v10749_v5  ;;  %v5789_v17 = vrot.slane %v5781_v42, %v10749_v5  ;;  %v352_v8 = vcombine.high %v13679_v55, %v13679_v55  ;;  %v13050_v35 = vld [vmem:[%s10747_s28 + $0xfa] sm:$0x3f] }
 0x1e2   : > { %v5796_v12 = vrot.slane %v5782_v53, %v10749_v5  ;;  %v353_v18 = vcombine.high %v188_v38, %v188_v38  ;;  %v360_v19 = vrot.slane %v188_v38, %v10749_v5  ;;  %v369_v56 = vcombine.high %v189_v46, %v189_v46 }
 0x1e3   : > { %v7912_v52 = vcombine.low %v7904_v7, %v7911_v37  ;;  %v5780_v10 = vcombine.low %v5772_v59, %v5779_v34  ;;  %v376_v9 = vrot.slane %v189_v46, %v10749_v5  ;;  %v8428_v58 = vcombine.high %v10184_v14, %v10184_v14 }
 0x1e4   : > { %v5797_v15 = vcombine.low %v5789_v17, %v5796_v12  ;;  %v367_v0 = vrot.slane %v353_v18, %v10749_v5  ;;  %v368_v24 = vcombine.high %v360_v19, %v360_v19  ;;  %v383_v33 = vrot.slane %v369_v56, %v10749_v5  ;;  %v13062_v17 = vpop.permute.xlu0 %8991  ;;  %v10117_v18 = vld [vmem:[%s10747_s28 + $0x90] sm:$0xff] }
 0x1e5   : > { %v7957_v6 = vpack.c.bf16 %v7912_v52, %v7895_v28  ;;  %v801_v31 = vcombine.low %v352_v8, %v360_v19  ;;  %v384_v23 = vcombine.high %v376_v9, %v376_v9  ;;  %v8435_v38 = vrot.slane %v10184_v14, %v10749_v5  ;;  %v13680_v52 = vld [vmem:[#allocation12_spill] sm:$0xff] }
 0x1e6   : > { %v6007_v7 = vpack.c.bf16 %v5797_v15, %v5780_v10  ;;  %v8442_v42 = vrot.slane %v8428_v58, %v10749_v5  ;;  %v385_v53 = vcombine.high %v383_v33, %v383_v33  ;;  %v802_v57 = vcombine.low %v368_v24, %v367_v0 }
 0x1e7   : > { %9200 = vrot.lane.b32.xlu1 %v7957_v6, %s10669_s9  ;;  %v809_v46 = vrot.slane %v801_v31, %v10749_v5  ;;  %v8444_v28 = vcombine.high %v10185_v3, %v10185_v3  ;;  %v818_v37 = vcombine.low %v376_v9, %v384_v23  ;;  %v8443_v59 = vcombine.high %v8435_v38, %v8435_v38  ;;  %v10118_v9 = vld [vmem:[%s10747_s28 + $0x98] sm:$0x3f] }
 0x1e8   : > { %9112 = vrot.lane.b32.xlu0 %v6007_v7, %s10667_s7  ;;  %v8451_v34 = vrot.slane %v10185_v3, %v10749_v5  ;;  %v13060_v14 = vrot.slane %v13050_v35, %v10749_v5  ;;  %v816_v12 = vrot.slane %v802_v57, %v10749_v5  ;;  %v819_v55 = vcombine.low %v383_v33, %v385_v53  ;;  %v13071_v3 = vpop.permute.xlu1 %9157 }
 0x1e9   : > { %v8458_v8 = vrot.slane %v8444_v28, %v10749_v5  ;;  %v6286_v10 = vcombine.high %v13680_v52, %v13680_v52  ;;  %v826_v19 = vrot.slane %v818_v37, %v10749_v5  ;;  %v8851_v15 = vcombine.low %v8435_v38, %v8443_v59 }
 0x1ea   : > { %v8459_v56 = vcombine.high %v8451_v34, %v8451_v34  ;;  %v8852_v0 = vcombine.low %v8442_v42, %v8451_v34  ;;  %v817_v58 = vcombine.low %v809_v46, %v816_v12  ;;  %v833_v6 = vrot.slane %v819_v55, %v10749_v5  ;;  %v13082_v12 = vpop.permute.xlu0 %9030 }
 0x1eb   : > { %v8460_v24 = vcombine.high %v8458_v8, %v8458_v8  ;;  %v6300_v33 = vrot.slane %v6286_v10, %v10749_v5  ;;  %v8859_v31 = vrot.slane %v8851_v15, %v10749_v5  ;;  %v6302_v53 = vcombine.high %v10117_v18, %v10117_v18 }
 0x1ec   : > { %v8866_v7 = vrot.slane %v8852_v0, %v10749_v5  ;;  %v8868_v23 = vcombine.low %v8459_v56, %v8458_v8  ;;  %v834_v57 = vcombine.low %v826_v19, %v833_v6  ;;  %v6309_v38 = vrot.slane %v10117_v18, %v10749_v5  ;;  %v10145_v0 = vld [vmem:[%s10747_s28 + $0x91] sm:$0xff]  ;;  %v13090_v6 = vpop.permute.xlu1 %9196 }
 0x1ed   : > { %v8869_v28 = vcombine.low %v8460_v24, %v13060_v14  ;;  %v6319_v42 = vcombine.high %v10118_v9, %v10118_v9  ;;  %v6316_v59 = vrot.slane %v6302_v53, %v10749_v5  ;;  %v6326_v34 = vrot.slane %v10118_v9, %v10749_v5 }
 0x1ee   : > { %v8867_v37 = vcombine.low %v8859_v31, %v8866_v7  ;;  %v8876_v46 = vrot.slane %v8868_v23, %v10749_v5  ;;  %v1143_v55 = vpack.c.bf16 %v834_v57, %v817_v58  ;;  %v6317_v52 = vcombine.high %v6309_v38, %v6309_v38  ;;  %v10146_v31 = vld [vmem:[%s10747_s28 + $0x99] sm:$0x3f] }
 0x1ef   : > { %v8883_v8 = vrot.slane %v8869_v28, %v10749_v5  ;;  %v6333_v10 = vrot.slane %v6319_v42, %v10749_v5  ;;  %v6318_v19 = vcombine.high %v6316_v59, %v6316_v59  ;;  %v6334_v56 = vcombine.high %v6326_v34, %v6326_v34  ;;  %v13681_v7 = vld [vmem:[#allocation13_spill] sm:$0xff] }
 0x1f0   : > { %v6737_v18 = vcombine.low %v6300_v33, %v6309_v38  ;;  %v9355_v15 = vsel %vm9337_vm3, %v13029_v41, %v12798_v20  ;;  %v9255_v9 = vsel %vm9243_vm0, %v1143_v55, %v12814_v11  ;;  %v6738_v58 = vcombine.low %v6317_v52, %v6316_v59  ;;  %v13682_v52 = vld [vmem:[#allocation14_spill] sm:$0xff] }
 0x1f1   : > { %v8884_v24 = vcombine.low %v8876_v46, %v8883_v8  ;;  %v7258_v23 = vcombine.high %v13681_v7, %v13681_v7  ;;  %v6754_v57 = vcombine.low %v6318_v19, %v6326_v34  ;;  %v6755_v33 = vcombine.low %v6334_v56, %v6333_v10  ;;  %v13105_v8 = vpop.permute.xlu0 %9069 }
 0x1f2   : > { %v6745_v53 = vrot.slane %v6737_v18, %v10749_v5  ;;  %v9291_v28 = vsel %vm9283_vm1, %v9255_v9, %v12843_v25  ;;  %v6752_v41 = vrot.slane %v6738_v58, %v10749_v5  ;;  %v7274_v42 = vcombine.high %v10145_v0, %v10145_v0  ;;  %v13113_v9 = vpop.permute.xlu1 %9235 }
 0x1f3   : > { %v8929_v20 = vpack.c.bf16 %v8884_v24, %v8867_v37  ;;  %v7272_v38 = vrot.slane %v7258_v23, %v10749_v5  ;;  %v6762_v11 = vrot.slane %v6754_v57, %v10749_v5  ;;  %v6769_v46 = vrot.slane %v6755_v33, %v10749_v5  ;;  %v13683_v23 = vld [vmem:[#allocation15_spill] sm:$0xff] }
 0x1f4   : > { %v7281_v59 = vrot.slane %v10145_v0, %v10749_v5  ;;  %v7291_v55 = vcombine.high %v10146_v31, %v10146_v31  ;;  %v6753_v34 = vcombine.low %v6745_v53, %v6752_v41  ;;  %v7288_v25 = vrot.slane %v7274_v42, %v10749_v5  ;;  %v10173_v57 = vld [vmem:[%s10747_s28 + $0x92] sm:$0xff]  ;;  %v10174_v42 = vld [vmem:[%s10747_s28 + $0x9a] sm:$0x3f] }
 0x1f5   : > { %9239 = vrot.lane.b32.xlu1 %v8929_v20, %s10668_s8  ;;  %v7298_v37 = vrot.slane %v10146_v31, %v10749_v5  ;;  %v1655_v10 = vcombine.high %v13682_v52, %v13682_v52  ;;  %v6770_v19 = vcombine.low %v6762_v11, %v6769_v46  ;;  %v1670_v53 = vcombine.high %v13683_v23, %v13683_v23  ;;  %v13684_v52 = vld [vmem:[#allocation16_spill] sm:$0xff] }
 0x1f6   : > { %v7289_v56 = vcombine.high %v7281_v59, %v7281_v59  ;;  %v7305_v18 = vrot.slane %v7291_v55, %v10749_v5  ;;  %v7709_v0 = vcombine.low %v7272_v38, %v7281_v59  ;;  %v7290_v24 = vcombine.high %v7288_v25, %v7288_v25 }
 0x1f7   : > { %v7306_v58 = vcombine.high %v7298_v37, %v7298_v37  ;;  %v1669_v7 = vrot.slane %v1655_v10, %v10749_v5  ;;  %v6980_v31 = vpack.c.bf16 %v6770_v19, %v6753_v34  ;;  %v9382_v41 = vsel %vm9364_vm4, %v9355_v15, %v12824_v16  ;;  %v13130_v19 = vpop.permute.xlu0 %9108 }
 0x1f8   : > { %v7710_v33 = vcombine.low %v7289_v56, %v7288_v25  ;;  %v7717_v20 = vrot.slane %v7709_v0, %v10749_v5  ;;  %v7726_v11 = vcombine.low %v7290_v24, %v7298_v37  ;;  %v9318_v59 = vsel %vm9310_vm2, %v9291_v28, %v12865_v47  ;;  %v13137_v24 = vpop.permute.xlu1 %9186 }
 0x1f9   : > { %v7727_v38 = vcombine.low %v7306_v58, %v7305_v18  ;;  %v2079_v46 = vcombine.low %v1670_v53, %v1669_v7  ;;  %9151 = vrot.lane.b32.xlu0 %v6980_v31, %s10666_s6  ;;  %v8230_v34 = vcombine.high %v13684_v52, %v13684_v52  ;;  %v8246_v25 = vcombine.high %v10173_v57, %v10173_v57 }
 0x1fa   : > { %v7724_v55 = vrot.slane %v7710_v33, %v10749_v5  ;;  %v8253_v10 = vrot.slane %v10173_v57, %v10749_v5  ;;  %v7734_v16 = vrot.slane %v7726_v11, %v10749_v5  ;;  %v8263_v56 = vcombine.high %v10174_v42, %v10174_v42  ;;  %v13685_v11 = vld [vmem:[#allocation9_spill] sm:$0xff] }
 0x1fb   : > { %v7741_v15 = vrot.slane %v7727_v38, %v10749_v5  ;;  %v2086_v37 = vrot.slane %v2079_v46, %v10749_v5  ;;  %v8244_v28 = vrot.slane %v8230_v34, %v10749_v5  ;;  %v8260_v18 = vrot.slane %v8246_v25, %v10749_v5 }
 0x1fc   : > { %v7725_v47 = vcombine.low %v7717_v20, %v7724_v55  ;;  %v8261_v0 = vcombine.high %v8253_v10, %v8253_v10  ;;  %v8270_v23 = vrot.slane %v10174_v42, %v10749_v5  ;;  %v8277_v53 = vrot.slane %v8263_v56, %v10749_v5  ;;  %v13686_v56 = vld [vmem:[#allocation19_spill] sm:$0xff] }
 0x1fd   : > { %v7742_v58 = vcombine.low %v7734_v16, %v7741_v15  ;;  %v2124_v7 = vpack.c.bf16 %v2086_v37, %v2086_v37  ;;  %v8262_v57 = vcombine.high %v8260_v18, %v8260_v18  ;;  %v8681_v31 = vcombine.low %v8244_v28, %v8253_v10  ;;  %v13151_v16 = vpop.permute.xlu0 %9147 }
 0x1fe   : > { %v8682_v33 = vcombine.low %v8261_v0, %v8260_v18  ;;  %v2627_v38 = vcombine.high %v13685_v11, %v13685_v11  ;;  %v8278_v46 = vcombine.high %v8270_v23, %v8270_v23  ;;  %v2642_v55 = vcombine.high %v12766_v39, %v12766_v39  ;;  %v13163_v0 = vpop.permute.xlu1 %9225 }
 0x1ff   : > { %v7952_v20 = vpack.c.bf16 %v7742_v58, %v7725_v47  ;;  %8968 = vrot.lane.b32.xlu0 %v2124_v7, %s10663_s30  ;;  %v9409_v52 = vsel %vm9391_vm6, %v9382_v41, %v12853_v26  ;;  %v8689_v42 = vrot.slane %v8681_v31, %v10749_v5  ;;  %v8698_v25 = vcombine.low %v8262_v57, %v8270_v23  ;;  %s10209_s30 = sshll.u32 %s10715_s16, 5 }
 0x200   : > { %v8696_v34 = vrot.slane %v8682_v33, %v10749_v5  ;;  %v2641_v10 = vrot.slane %v2627_v38, %v10749_v5  ;;  %v8699_v15 = vcombine.low %v8278_v46, %v8277_v53  ;;  %v9345_v37 = vsel %vm9337_vm3, %v9318_v59, %v12899_v4 }
 0x201   : > { %9190 = vrot.lane.b32.xlu1 %v7952_v20, %s10669_s9  ;;  %v3600_v39 = vcombine.high %v12777_v62, %v12777_v62  ;;  %v3615_v26 = vcombine.high %v13686_v56, %v13686_v56  ;;  %v8706_v47 = vrot.slane %v8698_v25, %v10749_v5  ;;  %v4572_v18 = vcombine.high %v12822_v54, %v12822_v54  ;;  %v13184_v46 = vpop.permute.xlu0 %8964  ;;  %v203_v56 = vld [vmem:[%s10747_s28 + $0xb0] sm:$0xff] }
 0x202   : > { %v8697_v41 = vcombine.low %v8689_v42, %v8696_v34  ;;  %v3051_v28 = vcombine.low %v2642_v55, %v2641_v10  ;;  %v8713_v58 = vrot.slane %v8699_v15, %v10749_v5  ;;  %v4587_v4 = vcombine.high %v12836_v2, %v12836_v2  ;;  %v13196_v34 = vpop.permute.xlu1 %9042  ;;  %v202_v15 = vld [vmem:[%s10747_s28 + $0xa8] sm:$0x3f] }
 0x203   : > { %v3614_v7 = vrot.slane %v3600_v39, %v10749_v5  ;;  %v9436_v62 = vsel %vm9418_vm7, %v9409_v52, %v12876_v49  ;;  %v4586_v23 = vrot.slane %v4572_v18, %v10749_v5  ;;  %v9372_v53 = vsel %vm9364_vm4, %v9345_v37, %v12932_v13 }
 0x204   : > { %v3058_v59 = vrot.slane %v3051_v28, %v10749_v5  ;;  %v5544_v54 = vcombine.high %v12863_v21, %v12863_v21  ;;  %v8714_v57 = vcombine.low %v8706_v47, %v8713_v58  ;;  %v5559_v33 = vcombine.high %v12882_v60, %v12882_v60 }
 0x205   : > { %v4024_v31 = vcombine.low %v3615_v26, %v3614_v7  ;;  %v6517_v2 = vcombine.high %v12941_v27, %v12941_v27  ;;  %v4996_v49 = vcombine.low %v4587_v4, %v4586_v23  ;;  %v6532_v20 = vcombine.high %v12954_v61, %v12954_v61  ;;  %v13219_v7 = vpop.permute.xlu0 %9003 }
 0x206   : > { %v3096_v11 = vpack.c.bf16 %v3058_v59, %v3058_v59  ;;  %v5558_v38 = vrot.slane %v5544_v54, %v10749_v5  ;;  %v8924_v13 = vpack.c.bf16 %v8714_v57, %v8697_v41  ;;  %v9463_v60 = vsel %vm9445_vm9, %v9436_v62, %v12908_v50  ;;  %v190_v54 = vld [vmem:[%s10747_s28 + $0x48] sm:$0x3f]  ;;  %v13228_v57 = vpop.permute.xlu1 %9081 }
 0x207   : > { %v4031_v21 = vrot.slane %v4024_v31, %v10749_v5  ;;  %v6531_v55 = vrot.slane %v6517_v2, %v10749_v5  ;;  %v5003_v27 = vrot.slane %v4996_v49, %v10749_v5  ;;  %v9399_v61 = vsel %vm9391_vm6, %v9372_v53, %v12958_v40  ;;  %10275 = vmatmul.mubr.msk.bf16.gmra.mrb[4].mxu1 %vm9508_vm10, %v9463_v60 }
 0x208   : > { %9007 = vrot.lane.b32.xlu0 %v3096_v11, %s10665_s5  ;;  %v5968_v52 = vcombine.low %v5559_v33, %v5558_v38  ;;  %v7489_v42 = vcombine.high %v12987_v63, %v12987_v63  ;;  %9229 = vrot.lane.b32.xlu1 %v8924_v13, %s10668_s8  ;;  %v7504_v50 = vcombine.high %v13004_v48, %v13004_v48 }
 0x209   : > { %v4069_v25 = vpack.c.bf16 %v4031_v21, %v4031_v21  ;;  %v6941_v10 = vcombine.low %v6532_v20, %v6531_v55  ;;  %v5041_v37 = vpack.c.bf16 %v5003_v27, %v5003_v27  ;;  %v8461_v63 = vcombine.high %v13050_v35, %v13050_v35  ;;  %10278 = vmatprep.mubr.msk.bf16.mxu1 %vm10671_vm8, %v13660_v1  ;;  %v191_v21 = vld [vmem:[%s10747_s28 + $0x50] sm:$0xff]  ;;  %v13239_v27 = vld [vmem:[%s10747_s28 + $0x58] sm:$0x3f] }
 0x20a   : > { %v5975_v39 = vrot.slane %v5968_v52, %v10749_v5  ;;  %v7503_v40 = vrot.slane %v7489_v42, %v10749_v5  ;;  %v8476_v48 = vcombine.high %v13060_v14, %v13060_v14  ;;  %v9426_v41 = vsel %vm9418_vm7, %v9399_v61, %v12937_v51 }
 0x20b   : > { %v6948_v26 = vrot.slane %v6941_v10, %v10749_v5  ;;  %v567_v47 = vcombine.high %v12920_v29, %v12920_v29  ;;  %v8475_v18 = vrot.slane %v8461_v63, %v10749_v5  ;;  %v584_v58 = vcombine.high %v202_v15, %v202_v15  ;;  %v204_v10 = vld [vmem:[%s10747_s28 + $0xb8] sm:$0x3f] }
 0x20c   : > { %9046 = vrot.lane.b32.xlu0 %v4069_v25, %s10662_s29  ;;  %v6013_v28 = vpack.c.bf16 %v5975_v39, %v5975_v39  ;;  %v7913_v35 = vcombine.low %v7504_v50, %v7503_v40  ;;  %9085 = vrot.lane.b32.xlu1 %v5041_v37, %s10664_s4  ;;  %v591_v51 = vrot.slane %v202_v15, %v10749_v5  ;;  %v13246_v50 = vpop.permute.xlu0 %8954 }
 0x20d   : > { %v6986_v4 = vpack.c.bf16 %v6948_v26, %v6948_v26  ;;  %v581_v14 = vrot.slane %v567_v47, %v10749_v5  ;;  %v600_v62 = vcombine.high %v203_v56, %v203_v56  ;;  %v8885_v59 = vcombine.low %v8476_v48, %v8475_v18  ;;  %v13259_v47 = vpop.permute.xlu1 %9120 }
 0x20e   : > { %v7920_v29 = vrot.slane %v7913_v35, %v10749_v5  ;;  %v598_v23 = vrot.slane %v584_v58, %v10749_v5  ;;  %v607_v53 = vrot.slane %v203_v56, %v10749_v5  ;;  %v599_v33 = vcombine.high %v591_v51, %v591_v51 }
 0x20f   : > { %v583_v31 = vcombine.high %v581_v14, %v581_v14  ;;  %v614_v2 = vrot.slane %v600_v62, %v10749_v5  ;;  %v9453_v11 = vsel %vm9445_vm9, %v9426_v41, %v12962_v36  ;;  %v8892_v38 = vrot.slane %v8885_v59, %v10749_v5  ;;  %v205_v41 = vld [vmem:[%s10747_s28 + $0xc0] sm:$0xff] }
 0x210   : > { %9124 = vrot.lane.b32.xlu0 %v6013_v28, %s10667_s7  ;;  %v7958_v49 = vpack.c.bf16 %v7920_v29, %v7920_v29  ;;  %v615_v20 = vcombine.high %v607_v53, %v607_v53  ;;  %v1022_v13 = vcombine.low %v598_v23, %v607_v53  ;;  %9163 = vrot.lane.b32.xlu1 %v6986_v4, %s10666_s6 }
 0x211   : > { %v1005_v55 = vcombine.low %v581_v14, %v583_v31  ;;  %v1006_v60 = vcombine.low %v591_v51, %v599_v33  ;;  %10255 = vmatmul.mubr.msk.bf16.gmra.mrb[12].mxu0 %vm9508_vm10, %v9453_v11  ;;  %v386_v52 = vcombine.high %v190_v54, %v190_v54  ;;  %v8930_v61 = vpack.c.bf16 %v8892_v38, %v8892_v38 }
 0x212   : > { %v1023_v36 = vcombine.low %v615_v20, %v614_v2  ;;  %v1030_v42 = vrot.slane %v1022_v13, %v10749_v5  ;;  %v393_v25 = vrot.slane %v190_v54, %v10749_v5  ;;  %10258 = vmatprep.mubr.msk.bf16.mxu0 %vm10671_vm8, %v13660_v1  ;;  %v402_v40 = vcombine.high %v191_v21, %v191_v21 }
 0x213   : > { %v1013_v15 = vrot.slane %v1005_v55, %v10749_v5  ;;  %v1020_v37 = vrot.slane %v1006_v60, %v10749_v5  ;;  %v400_v39 = vrot.slane %v386_v52, %v10749_v5  ;;  %v409_v26 = vrot.slane %v191_v21, %v10749_v5 }
 0x214   : > { %9202 = vrot.lane.b32.xlu0 %v7958_v49, %s10669_s9  ;;  %v1037_v63 = vrot.slane %v1023_v36, %v10749_v5  ;;  %v401_v56 = vcombine.high %v393_v25, %v393_v25  ;;  %v13256_v48 = vrot.slane %v13239_v27, %v10749_v5  ;;  %9241 = vrot.lane.b32.xlu1 %v8930_v61, %s10668_s8  ;;  %v13267_v49 = vpop.permute.xlu0 %8993  ;;  %v13275_v61 = vpop.permute.xlu1 %9159  ;;  %s13562_s8 = scalar_lea.hbm %s13640_s3, %s10209_s30 }
 0x215   : > { %v1021_v28 = vcombine.low %v1013_v15, %v1020_v37  ;;  %v416_v35 = vrot.slane %v402_v40, %v10749_v5  ;;  %v616_v18 = vcombine.high %v614_v2, %v614_v2  ;;  %v617_v58 = vcombine.high %v204_v10, %v204_v10 }
 0x216   : > { %v1038_v4 = vcombine.low %v1030_v42, %v1037_v63  ;;  %v417_v14 = vcombine.high %v409_v26, %v409_v26  ;;  %v835_v51 = vcombine.low %v393_v25, %v401_v56  ;;  %v836_v62 = vcombine.low %v400_v39, %v409_v26 }
 0x217   : > { %v418_v29 = vcombine.high %v416_v35, %v416_v35  ;;  %v624_v59 = vrot.slane %v204_v10, %v10749_v5  ;;  %v631_v23 = vrot.slane %v617_v58, %v10749_v5  ;;  %v633_v53 = vcombine.high %v205_v41, %v205_v41 }
 0x218   : > { %v1149_v54 = vpack.c.bf16 %v1038_v4, %v1021_v28  ;;  %v843_v31 = vrot.slane %v835_v51, %v10749_v5  ;;  %v850_v33 = vrot.slane %v836_v62, %v10749_v5  ;;  %v852_v11 = vcombine.low %v417_v14, %v416_v35  ;;  %v13292_v35 = vld [vmem:[%s10747_s28 + $0x68] sm:$0x3f] }
 0x219   : > { %v853_v2 = vcombine.low %v418_v29, %v13256_v48  ;;  %v632_v38 = vcombine.high %v624_v59, %v624_v59  ;;  %v640_v20 = vrot.slane %v205_v41, %v10749_v5  ;;  %v647_v13 = vrot.slane %v633_v53, %v10749_v5 }
 0x21a   : > { %v9273_v21 = vsel %vm9243_vm0, %v1149_v54, %v12978_v22  ;;  %v851_v55 = vcombine.low %v843_v31, %v850_v33  ;;  %v860_v60 = vrot.slane %v852_v11, %v10749_v5  ;;  %v1039_v52 = vcombine.low %v616_v18, %v624_v59 }
 0x21b   : > { %v9303_v36 = vsel %vm9283_vm1, %v9273_v21, %v13011_v43  ;;  %v867_v42 = vrot.slane %v853_v2, %v10749_v5  ;;  %v648_v25 = vcombine.high %v640_v20, %v640_v20  ;;  %v649_v10 = vcombine.high %v647_v13, %v647_v13  ;;  %v193_v43 = vld [vmem:[%s10747_s28 + $0x60] sm:$0xff] }
 0x21c   : > { %v9330_v15 = vsel %vm9310_vm2, %v9303_v36, %v12994_v30  ;;  %v1040_v37 = vcombine.low %v632_v38, %v631_v23  ;;  %v1047_v22 = vrot.slane %v1039_v52, %v10749_v5  ;;  %v419_v39 = vcombine.high %v13239_v27, %v13239_v27  ;;  %v9033_v27 = vpop.permute.xlu0 %9032  ;;  %v9199_v23 = vpop.permute.xlu1 %9198 }
 0x21d   : > { %v868_v40 = vcombine.low %v860_v60, %v867_v42  ;;  %v9357_v63 = vsel %vm9337_vm3, %v9330_v15, %v13016_v44  ;;  %v1056_v56 = vcombine.low %v640_v20, %v648_v25  ;;  %v1057_v26 = vcombine.low %v647_v13, %v649_v10 }
 0x21e   : > { %v9384_v41 = vsel %vm9364_vm4, %v9357_v63, %v13046_v45  ;;  %v1054_v28 = vrot.slane %v1040_v37, %v10749_v5  ;;  %v433_v30 = vrot.slane %v419_v39, %v10749_v5  ;;  %v434_v18 = vcombine.high %v13256_v48, %v13256_v48 }
 0x21f   : > { %v1144_v58 = vpack.c.bf16 %v868_v40, %v851_v55  ;;  %v9411_v44 = vsel %vm9391_vm6, %v9384_v41, %v13071_v3  ;;  %v1064_v4 = vrot.slane %v1056_v56, %v10749_v5  ;;  %v1071_v14 = vrot.slane %v1057_v26, %v10749_v5  ;;  %v13301_v51 = vpop.f32.mrb[0].mxu0 }
 0x220   : > { %v9438_v45 = vsel %vm9418_vm7, %v9411_v44, %v13090_v6  ;;  %v1055_v62 = vcombine.low %v1047_v22, %v1054_v28  ;;  %v435_v29 = vcombine.high %v193_v43, %v193_v43  ;;  %v442_v59 = vrot.slane %v193_v43, %v10749_v5  ;;  %v10244_v48 = vpop.f32.mrb[1].mxu0  ;;  %v9072_v52 = vpop.permute.xlu0 %9071 }
 0x221   : > { %v9258_v53 = vsel %vm9243_vm0, %v1144_v58, %v13040_v32  ;;  %v9465_v3 = vsel %vm9445_vm9, %v9438_v45, %v13113_v9  ;;  %v1072_v54 = vcombine.low %v1064_v4, %v1071_v14  ;;  %v459_v31 = vrot.slane %v13292_v35, %v10749_v5  ;;  %v9576_v33 = vpop.f32.mrb[2].mxu0  ;;  %v9238_v37 = vpop.permute.xlu1 %9237  ;;  %v207_v48 = vld [vmem:[%s10747_s28 + $0xd0] sm:$0xff] }
 0x222   : > { %v9293_v6 = vsel %vm9283_vm1, %v9258_v53, %v13062_v17  ;;  %10279 = vmatmul.mubr.msk.bf16.gmra.mrb[8].mxu1 %vm9508_vm10, %v9465_v3  ;;  %v449_v11 = vrot.slane %v435_v29, %v10749_v5  ;;  %v450_v2 = vcombine.high %v442_v59, %v442_v59  ;;  %v869_v38 = vcombine.low %v434_v18, %v433_v30  ;;  %v10245_v20 = vpop.f32.mrb[3].mxu0  ;;  %v206_v3 = vld [vmem:[%s10747_s28 + $0xc8] sm:$0x3f] }
 0x223   : > { %v9320_v32 = vsel %vm9310_vm2, %v9293_v6, %v13082_v12  ;;  %v1150_v13 = vpack.c.bf16 %v1072_v54, %v1055_v62  ;;  %v467_v9 = vcombine.high %v459_v31, %v459_v31  ;;  %10282 = vmatprep.mubr.msk.bf16.mxu1 %vm10671_vm8, %v13660_v1  ;;  %v9677_v14 = vsel %vm9675_vm11, %v9576_v33, 0.0 }
 0x224   : > { %v9347_v21 = vsel %vm9337_vm3, %v9320_v32, %v13105_v8  ;;  %v451_v55 = vcombine.high %v449_v11, %v449_v11  ;;  %v870_v17 = vcombine.low %v442_v59, %v450_v2  ;;  %v877_v60 = vrot.slane %v869_v38, %v10749_v5  ;;  %v9111_v56 = vpop.permute.xlu0 %9110  ;;  %v13381_v38 = vld [vmem:[%s10747_s28 + $0xd8] sm:$0x3f] }
 0x225   : > { %v9374_v36 = vsel %vm9364_vm4, %v9347_v21, %v13130_v19  ;;  %v9276_v42 = vsel %vm9243_vm0, %v1150_v13, %v13184_v46  ;;  %v887_v12 = vcombine.low %v459_v31, %v467_v9  ;;  %v9189_v41 = vpop.permute.xlu1 %9188  ;;  %v9733_v45 = vmul.f32 %v9576_v33, %v9576_v33 }
 0x226   : > { %v9401_v25 = vsel %vm9391_vm6, %v9374_v36, %v13151_v16  ;;  %v9305_v10 = vsel %vm9283_vm1, %v9276_v42, %v13219_v7  ;;  %v884_v8 = vrot.slane %v870_v17, %v10749_v5  ;;  %v886_v15 = vcombine.low %v449_v11, %v451_v55 }
 0x227   : > { %v9428_v22 = vsel %vm9418_vm7, %v9401_v25, %v13137_v24  ;;  %v9332_v19 = vsel %vm9310_vm2, %v9305_v10, %v13196_v34  ;;  %v901_v39 = vrot.slane %v887_v12, %v10749_v5  ;;  %v9758_v59 = vsel %vm9675_vm11, %v9733_v45, 0.0 }
 0x228   : > { %v9455_v46 = vsel %vm9445_vm9, %v9428_v22, %v13163_v0  ;;  %v885_v40 = vcombine.low %v877_v60, %v884_v8  ;;  %v894_v16 = vrot.slane %v886_v15, %v10749_v5  ;;  %v9359_v7 = vsel %vm9337_vm3, %v9332_v19, %v13228_v57  ;;  %v9150_v28 = vpop.permute.xlu0 %9149 }
 0x229   : > { %10259 = vmatmul.mubr.msk.bf16.gmra.mrb[16].mxu0 %vm9508_vm10, %v9455_v46  ;;  %v9386_v63 = vsel %vm9364_vm4, %v9359_v7, %v13259_v47  ;;  %v9228_v58 = vpop.permute.xlu1 %9227  ;;  %v666_v54 = vcombine.high %v207_v48, %v207_v48  ;;  %v657_v31 = vrot.slane %v206_v3, %v10749_v5  ;;  %v650_v6 = vcombine.high %v206_v3, %v206_v3 }
 0x22a   : > { %v902_v24 = vcombine.low %v894_v16, %v901_v39  ;;  %v9413_v34 = vsel %vm9391_vm6, %v9386_v63, %v13275_v61  ;;  %10262 = vmatprep.mubr.msk.bf16.mxu0 %vm10671_vm8, %v13660_v1  ;;  %v673_v11 = vrot.slane %v207_v48, %v10749_v5  ;;  %v13386_v21 = vrot.slane %v13381_v38, %v10749_v5 }
 0x22b   : > { %v9440_v0 = vsel %vm9418_vm7, %v9413_v34, %v9199_v23  ;;  %v665_v20 = vcombine.high %v657_v31, %v657_v31  ;;  %v664_v32 = vrot.slane %v650_v6, %v10749_v5 }
 0x22c   : > { %v1145_v26 = vpack.c.bf16 %v902_v24, %v885_v40  ;;  %v9467_v43 = vsel %vm9445_vm9, %v9440_v0, %v9238_v37  ;;  %v8967_v53 = vpop.permute.xlu0 %8966  ;;  %v681_v13 = vcombine.high %v673_v11, %v673_v11  ;;  %v195_v0 = vld [vmem:[%s10747_s28 + $0x70] sm:$0xff] }
 0x22d   : > { %10283 = vmatmul.mubr.msk.bf16.gmra.mrb[12].mxu1 %vm9508_vm10, %v9467_v43  ;;  %v9045_v2 = vpop.permute.xlu1 %9044  ;;  %v1073_v55 = vcombine.low %v657_v31, %v665_v20  ;;  %v1074_v60 = vcombine.low %v664_v32, %v673_v11 }
 0x22e   : > { %v9261_v57 = vsel %vm9243_vm0, %v1145_v26, %v13246_v50  ;;  %10286 = vmatprep.mubr.msk.bf16.mxu1 %vm10671_vm8, %v13660_v1 }
 0x22f   : > { %v9295_v47 = vsel %vm9283_vm1, %v9261_v57, %v13267_v49  ;;  %v9676_v49 = vsel %vm9675_vm11, %v13301_v51, 0.0  ;;  %v1081_v15 = vrot.slane %v1073_v55, %v10749_v5  ;;  %v1088_v19 = vrot.slane %v1074_v60, %v10749_v5 }
 0x230   : > { %v9322_v61 = vsel %vm9310_vm2, %v9295_v47, %v9033_v27  ;;  %v9732_v27 = vmul.f32 %v13301_v51, %v13301_v51  ;;  %v9678_v62 = vadd.f32 %v9677_v14, %v9676_v49 }
 0x231   : > { %v9349_v30 = vsel %vm9337_vm3, %v9322_v61, %v9072_v52  ;;  %v1089_v57 = vcombine.low %v1081_v15, %v1088_v19  ;;  %v468_v61 = vcombine.high %v195_v0, %v195_v0 }
 0x232   : > { %v9376_v18 = vsel %vm9364_vm4, %v9349_v30, %v9111_v56  ;;  %9816 = vxpose.xlu0.b32.start [1/16] (narrow) %v13301_v51, 8  ;;  %v9757_v29 = vsel %vm9675_vm11, %v9732_v27, 0.0  ;;  %v680_v51 = vrot.slane %v666_v54, %v10749_v5 }
 0x233   : > { %v9403_v44 = vsel %vm9391_vm6, %v9376_v18, %v9150_v28  ;;  %v9759_v23 = vadd.f32 %v9758_v59, %v9757_v29  ;;  %v196_v28 = vld [vmem:[%s10747_s28 + $0x78] sm:$0x3f]  ;;  %v452_v18 = vcombine.high %v13292_v35, %v13292_v35  ;;  %s13555_s28 = sand.u32 1, %s10651_s13  }
 0x234   : > { %v9430_v50 = vsel %vm9418_vm7, %v9403_v44, %v9189_v41  ;;  %v682_v9 = vcombine.high %v680_v51, %v680_v51  ;;  %v9084_v17 = vpop.permute.xlu1 %9083  ;;  %v1090_v36 = vcombine.low %v681_v13, %v680_v51  ;;  %v485_v49 = vcombine.high %v196_v28, %v196_v28  ;;  %s10016_s29 = sshll.u32 %s13555_s28, 1  ;;  %s9893_s9 = scalar_lea.sflag [#allocation5], %s13555_s28 }
 0x235   : > { %v9457_v4 = vsel %vm9445_vm9, %v9430_v50, %v9228_v58  ;;  %v475_v58 = vrot.slane %v195_v0, %v10749_v5  ;;  %v492_v27 = vrot.slane %v196_v28, %v10749_v5  ;;  %v466_v14 = vrot.slane %v452_v18, %v10749_v5  ;;  %s174_s4 = scalar_lea.vmem [#allocation4], %s10016_s29 }
 0x236   : > { %10263 = vmatmul.mubr.msk.bf16.gmra.mrb[20].mxu0 %vm9508_vm10, %v9457_v4  ;;  %9817 = vxpose.xlu0.b32.cont [2/16] (narrow) %v9576_v33, 8  ;;  %v9006_v33 = vpop.permute.xlu0 %9005  ;;  %v1091_v42 = vcombine.low %v682_v9, %v13386_v21  ;;  %v1098_v7 = vrot.slane %v1090_v36, %v10749_v5  ;;  %v482_v4 = vrot.slane %v468_v61, %v10749_v5  ;;  %s9920_s5 = sshll.u32 %s174_s4, 4  ;;  %s13564_s5 = int_to_ptr.vmem [resolvable:$true] %s9920_s5 }
 0x237   : > { %10266 = vmatprep.mubr.msk.bf16.mxu0 %vm10671_vm8, %v13660_v1  ;;  %v483_v45 = vcombine.high %v475_v58, %v475_v58  ;;  %v499_v59 = vrot.slane %v485_v49, %v10749_v5  ;;  %v903_v31 = vcombine.low %v466_v14, %v475_v58  ;;  %s10565_s11 = scalar_lea.vmem %s13564_s5, 32  ;;  %p10572_p0 = scmp.lt.s32.totalorder %s13564_s5, %s10570_s19 }
 0x238   : > { %v1105_v63 = vrot.slane %v1091_v42, %v10749_v5  ;;  %v484_v29 = vcombine.high %v482_v4, %v482_v4  ;;  %p10566_p11 = scmp.ne.s32.totalorder %s13564_s5, %s10565_s11  ;;  %p10573_p1 = scmp.lt.s32.totalorder %s10571_s20, %s10565_s11 }
 0x239   : > { %v904_v11 = vcombine.low %v483_v45, %v482_v4 }
 0x23a   : > { %v13388_v52 = vpop.permute.xlu0 %8956  ;;  %v1106_v47 = vcombine.low %v1098_v7, %v1105_v63  ;;  %v920_v51 = vcombine.low %v484_v29, %v492_v27  ;;  %p10567_p12 = pnand %p10566_p11, %p10732_p5  ;;  %p10574_p2 = por %p10573_p1, %p10572_p0 }
 0x23c   : > { %v1151_v50 = vpack.c.bf16 %v1106_v47, %v1089_v57  ;;  %v928_v36 = vrot.slane %v920_v51, %v10749_v5  ;;  %p10568_p13 = pneg %p10567_p12 }
 0x23e   : > { %v9123_v24 = vpop.permute.xlu1 %9122  ;;  %v8996_v26 = vpop.permute.xlu0 %8995  ;;  %p10575_p3 = pnand %p10574_p2, %p10568_p13 }
 0x242   : > { %v9035_v44 = vpop.permute.xlu0 %9034 }
 0x24d   : > { %v9162_v30 = vpop.permute.xlu1 %9161 }
 0x251   : > { %v9581_v12 = vpop.f32.mrb[4].mxu0  ;;  %v9074_v3 = vpop.permute.xlu0 %9073 }
 0x252   : > { %v9679_v25 = vsel %vm9675_vm11, %v9581_v12, 0.0  ;;  %v9734_v10 = vmul.f32 %v9581_v12, %v9581_v12  ;;  %9818 = vxpose.xlu0.b32.cont [3/16] (narrow) %v9581_v12, 8  ;;  %v10248_v8 = vpop.f32.mrb[5].mxu0 }
 0x253   : > { %v9680_v37 = vadd.f32 %v9679_v25, %v9678_v62  ;;  %v9584_v22 = vpop.f32.mrb[6].mxu0  ;;  %v9279_v62 = vsel %vm9243_vm0, %v1151_v50, %v8967_v53 }
 0x254   : > { %v9760_v39 = vsel %vm9675_vm11, %v9734_v10, 0.0  ;;  %v9681_v46 = vsel %vm9675_vm11, %v9584_v22, 0.0  ;;  %v9735_v40 = vmul.f32 %v9584_v22, %v9584_v22  ;;  %v10249_v16 = vpop.f32.mrb[7].mxu0  ;;  %v9307_v35 = vsel %vm9283_vm1, %v9279_v62, %v9006_v33 }
 0x255   : > { %v9761_v34 = vadd.f32 %v9760_v39, %v9759_v23  ;;  %v13398_v56 = vadd.f32 %v9681_v46, %v9680_v37  ;;  %v500_v23 = vcombine.high %v492_v27, %v492_v27  ;;  %v9334_v54 = vsel %vm9310_vm2, %v9307_v35, %v9045_v2 }
 0x256   : > { %v9762_v43 = vsel %vm9675_vm11, %v9735_v40, 0.0  ;;  %9819 = vxpose.xlu0.b32.cont [4/16] (narrow) %v9584_v22, 8  ;;  %v9361_v6 = vsel %vm9337_vm3, %v9334_v54, %v9084_v17  ;;  %v683_v33 = vcombine.high %v13381_v38, %v13381_v38  ;;  %v911_v2 = vrot.slane %v903_v31, %v10749_v5 }
 0x257   : > { %v13402_v41 = vadd.f32 %v9762_v43, %v9761_v34  ;;  %v921_v20 = vcombine.low %v500_v23, %v499_v59  ;;  %v9388_v32 = vsel %vm9364_vm4, %v9361_v6, %v9123_v24  ;;  %v918_v17 = vrot.slane %v904_v11, %v10749_v5 }
 0x258   : > { %v9415_v53 = vsel %vm9391_vm6, %v9388_v32, %v9162_v30  ;;  %v697_v10 = vrot.slane %v683_v33, %v10749_v5  ;;  %v698_v38 = vcombine.high %v13386_v21, %v13386_v21 }
 0x259   : > { %v9201_v48 = vpop.permute.xlu1 %9200  ;;  %v935_v42 = vrot.slane %v921_v20, %v10749_v5  ;;  %v919_v12 = vcombine.low %v911_v2, %v918_v17 }
 0x25a   : > { %v9442_v13 = vsel %vm9418_vm7, %v9415_v53, %v9201_v48  ;;  %v9113_v55 = vpop.permute.xlu0 %9112  ;;  %v1107_v37 = vcombine.low %v698_v38, %v697_v10 }
 0x25b   : > { %v936_v25 = vcombine.low %v928_v36, %v935_v42 }
 0x25c   : > { %v1114_v46 = vrot.slane %v1107_v37, %v10749_v5 }
 0x25d   : > { %v1146_v15 = vpack.c.bf16 %v936_v25, %v919_v12 }
 0x25e   : > { %v1152_v63 = vpack.c.bf16 %v1114_v46, %v1114_v46 }
 0x25f   : > { %v9264_v19 = vsel %vm9243_vm0, %v1146_v15, %v13388_v52 }
 0x260   : > { %v9297_v40 = vsel %vm9283_vm1, %v9264_v19, %v8996_v26 }
 0x267   : > { %v9240_v9 = vpop.permute.xlu1 %9239 }
 0x268   : > { %v9469_v60 = vsel %vm9445_vm9, %v9442_v13, %v9240_v9 }
 0x269   : > { %10287 = vmatmul.mubr.msk.bf16.gmra.mrb[16].mxu1 %vm9508_vm10, %v9469_v60 }
 0x26a   : > { %10290 = vmatprep.mubr.msk.bf16.mxu1 %vm10671_vm8, %v13660_v1  ;;  %v9324_v1 = vsel %vm9310_vm2, %v9297_v40, %v9035_v44 }
 0x26b   : > { %v9152_v8 = vpop.permute.xlu0 %9151  ;;  %v9351_v16 = vsel %vm9337_vm3, %v9324_v1, %v9074_v3 }
 0x26c   : > { %v9378_v7 = vsel %vm9364_vm4, %v9351_v16, %v9113_v55 }
 0x26d   : > { %v9405_v21 = vsel %vm9391_vm6, %v9378_v7, %v9152_v8 }
 0x271   : > { %v8969_v22 = vpop.permute.xlu0 %8968 }
 0x272   : > { %v9282_v43 = vsel %vm9243_vm0, %v1152_v63, %v8969_v22 }
 0x273   : > { %v9191_v39 = vpop.permute.xlu1 %9190 }
 0x274   : > { %v9432_v34 = vsel %vm9418_vm7, %v9405_v21, %v9191_v39 }
 0x27a   : > { %v9008_v24 = vpop.permute.xlu0 %9007  ;;  %v9230_v0 = vpop.permute.xlu1 %9229 }
 0x27b   : > { %v9459_v52 = vsel %vm9445_vm9, %v9432_v34, %v9230_v0  ;;  %v9309_v5 = vsel %vm9283_vm1, %v9282_v43, %v9008_v24 }
 0x27c   : > { %10267 = vmatmul.mubr.msk.bf16.gmra.mrb[24].mxu0 %vm9508_vm10, %v9459_v52 }
 0x27e   : > { %v9047_v26 = vpop.permute.xlu0 %9046  ;;  %v9086_v47 = vpop.permute.xlu1 %9085 }
 0x27f   : > { %v9336_v57 = vsel %vm9310_vm2, %v9309_v5, %v9047_v26 }
 0x280   : > { %v9363_v61 = vsel %vm9337_vm3, %v9336_v57, %v9086_v47 }
 0x282   : > { %v9125_v28 = vpop.permute.xlu0 %9124  ;;  %v9164_v18 = vpop.permute.xlu1 %9163 }
 0x283   : > { %v9390_v30 = vsel %vm9364_vm4, %v9363_v61, %v9125_v28 }
 0x284   : > { %v9417_v58 = vsel %vm9391_vm6, %v9390_v30, %v9164_v18 }
 0x286   : > { %v9203_v44 = vpop.permute.xlu0 %9202  ;;  %v9242_v4 = vpop.permute.xlu1 %9241 }
 0x287   : > { %v9444_v50 = vsel %vm9418_vm7, %v9417_v58, %v9203_v44 }
 0x288   : > { %v9471_v49 = vsel %vm9445_vm9, %v9444_v50, %v9242_v4 }
 0x289   : > { %10291 = vmatmul.mubr.msk.bf16.gmra.mrb[20].mxu1 %vm9508_vm10, %v9471_v49 }
 0x292   : > { %v13452_v27 = vpop.f32.mrb[0].mxu1 }
 0x293   : > { %v10272_v14 = vpop.f32.mrb[1].mxu1 }
 0x294   : > { %v13454_v45 = vpop.f32.mrb[2].mxu1 }
 0x295   : > { %v10273_v62 = vpop.f32.mrb[3].mxu1 }
 0x2ab   : > { %v9589_v29 = vpop.f32.mrb[8].mxu0 }
 0x2ac   : > { %v9683_v59 = vsel %vm9675_vm11, %v9589_v29, 0.0  ;;  %v9736_v23 = vmul.f32 %v9589_v29, %v9589_v29  ;;  %9820 = vxpose.xlu0.b32.cont [5/16] (narrow) %v9589_v29, 8  ;;  %v10252_v48 = vpop.f32.mrb[9].mxu0 }
 0x2ad   : > { %v9684_v35 = vadd.f32 %v9683_v59, %v13398_v56  ;;  %v9592_v3 = vpop.f32.mrb[10].mxu0 }
 0x2ae   : > { %v9764_v54 = vsel %vm9675_vm11, %v9736_v23, 0.0  ;;  %v9685_v31 = vsel %vm9675_vm11, %v9592_v3, 0.0  ;;  %v9737_v6 = vmul.f32 %v9592_v3, %v9592_v3  ;;  %v10253_v11 = vpop.f32.mrb[11].mxu0 }
 0x2af   : > { %v9765_v51 = vadd.f32 %v9764_v54, %v13402_v41  ;;  %v9686_v20 = vadd.f32 %v9685_v31, %v9684_v35 }
 0x2b0   : > { %v9766_v32 = vsel %vm9675_vm11, %v9737_v6, 0.0  ;;  %9821 = vxpose.xlu0.b32.cont [6/16] (narrow) %v9592_v3, 8 }
 0x2b1   : > { %v9767_v53 = vadd.f32 %v9766_v32, %v9765_v51 }
 0x2da   : > { %v13462_v13 = vpop.f32.mrb[4].mxu1 }
 0x2db   : > { %9848 = vxpose.xlu1.b32.start [1/9] (short) (narrow) %v13462_v13, 8  ;;  %v10276_v9 = vpop.f32.mrb[5].mxu1 }
 0x2dc   : > { %v13465_v56 = vpop.f32.mrb[6].mxu1 }
 0x2dd   : > { %v10277_v55 = vpop.f32.mrb[7].mxu1 }
 0x2df   : > { %9849 = vxpose.xlu1.b32.cont [2/9] (short) (narrow) %v13465_v56, 8 }
 0x2e4   : > { %v9597_v60 = vpop.f32.mrb[12].mxu0 }
 0x2e5   : > { %v9687_v33 = vsel %vm9675_vm11, %v9597_v60, 0.0  ;;  %v9738_v2 = vmul.f32 %v9597_v60, %v9597_v60  ;;  %9822 = vxpose.xlu0.b32.cont [7/16] (narrow) %v9597_v60, 8  ;;  %v10256_v41 = vpop.f32.mrb[13].mxu0  ;;  %v9746_v60 = vmul.f32 %v13452_v27, %v13452_v27 }
 0x2e6   : > { %v9688_v17 = vadd.f32 %v9687_v33, %v9686_v20  ;;  %v9600_v36 = vpop.f32.mrb[14].mxu0 }
 0x2e7   : > { %v9768_v42 = vsel %vm9675_vm11, %v9738_v2, 0.0  ;;  %v9689_v12 = vsel %vm9675_vm11, %v9600_v36, 0.0  ;;  %v9739_v25 = vmul.f32 %v9600_v36, %v9600_v36  ;;  %v10257_v10 = vpop.f32.mrb[15].mxu0 }
 0x2e8   : > { %v9769_v38 = vadd.f32 %v9768_v42, %v9767_v53  ;;  %v9690_v8 = vadd.f32 %v9689_v12, %v9688_v17  ;;  %v9703_v12 = vsel %vm9675_vm11, %v13452_v27, 0.0 }
 0x2e9   : > { %v9770_v15 = vsel %vm9675_vm11, %v9739_v25, 0.0  ;;  %9823 = vxpose.xlu0.b32.cont [8/16] (narrow) %v9600_v36, 8  ;;  %v9747_v25 = vmul.f32 %v13454_v45, %v13454_v45 }
 0x2ea   : > { %v9771_v37 = vadd.f32 %v9770_v15, %v9769_v38  ;;  %v9784_v15 = vsel %vm9675_vm11, %v9746_v60, 0.0 }
 0x2f5   : > { %v13472_v22 = vpop.f32.mrb[8].mxu1 }
 0x2f6   : > { %9850 = vxpose.xlu1.b32.cont [3/9] (short) (narrow) %v13472_v22, 8  ;;  %v10280_v19 = vpop.f32.mrb[9].mxu1 }
 0x2f7   : > { %v13475_v39 = vpop.f32.mrb[10].mxu1  ;;  %v9748_v19 = vmul.f32 %v13462_v13, %v13462_v13 }
 0x2f8   : > { %v10281_v46 = vpop.f32.mrb[11].mxu1 }
 0x2fa   : > { %9851 = vxpose.xlu1.b32.cont [4/9] (short) (narrow) %v13475_v39, 8 }
 0x2fc   : > { %v9605_v40 = vpop.f32.mrb[16].mxu0 }
 0x2fd   : > { %v9691_v1 = vsel %vm9675_vm11, %v9605_v40, 0.0  ;;  %v9740_v16 = vmul.f32 %v9605_v40, %v9605_v40  ;;  %9824 = vxpose.xlu0.b32.cont [9/16] (narrow) %v9605_v40, 8  ;;  %v10260_v7 = vpop.f32.mrb[17].mxu0 }
 0x2fe   : > { %v9692_v63 = vadd.f32 %v9691_v1, %v9690_v8  ;;  %v9608_v21 = vpop.f32.mrb[18].mxu0  ;;  %v9786_v1 = vsel %vm9675_vm11, %v9747_v25, 0.0  ;;  %v9749_v7 = vmul.f32 %v13465_v56, %v13465_v56 }
 0x2ff   : > { %v9772_v24 = vsel %vm9675_vm11, %v9740_v16, 0.0  ;;  %v9693_v34 = vsel %vm9675_vm11, %v9608_v21, 0.0  ;;  %v9741_v0 = vmul.f32 %v9608_v21, %v9608_v21  ;;  %v10261_v52 = vpop.f32.mrb[19].mxu0  ;;  %v9707_v16 = vsel %vm9675_vm11, %v13462_v13, 0.0 }
 0x300   : > { %v9773_v43 = vadd.f32 %v9772_v24, %v9771_v37  ;;  %v9694_v5 = vadd.f32 %v9693_v34, %v9692_v63  ;;  %v13481_v26 = vpop.f32.mrb[12].mxu1  ;;  %v9705_v37 = vsel %vm9675_vm11, %v13454_v45, 0.0  ;;  %v9788_v24 = vsel %vm9675_vm11, %v9748_v19, 0.0 }
 0x301   : > { %v9774_v57 = vsel %vm9675_vm11, %v9741_v0, 0.0  ;;  %9825 = vxpose.xlu0.b32.cont [10/16] (narrow) %v9608_v21, 8  ;;  %9852 = vxpose.xlu1.b32.cont [5/9] (short) (narrow) %v13481_v26, 8  ;;  %v10284_v47 = vpop.f32.mrb[13].mxu1  ;;  %v9709_v34 = vsel %vm9675_vm11, %v13465_v56, 0.0  ;;  %v9750_v0 = vmul.f32 %v13472_v22, %v13472_v22  ;;  %v9790_v13 = vsel %vm9675_vm11, %v9749_v7, 0.0 }
 0x302   : > { %v9775_v61 = vadd.f32 %v9774_v57, %v9773_v43  ;;  %v13485_v28 = vpop.f32.mrb[14].mxu1  ;;  %v9711_v57 = vsel %vm9675_vm11, %v13472_v22, 0.0 }
 0x303   : > { %v10285_v30 = vpop.f32.mrb[15].mxu1 }
 0x305   : > { %9853 = vxpose.xlu1.b32.cont [6/9] (short) (narrow) %v13485_v28, 8 }
 0x309   : > { %v9613_v18 = vpop.f32.mrb[20].mxu0 }
 0x30a   : > { %v9695_v58 = vsel %vm9675_vm11, %v9613_v18, 0.0  ;;  %v9742_v44 = vmul.f32 %v9613_v18, %v9613_v18  ;;  %9826 = vxpose.xlu0.b32.cont [11/16] (narrow) %v9613_v18, 8  ;;  %v10264_v50 = vpop.f32.mrb[21].mxu0  ;;  %v9792_v18 = vsel %vm9675_vm11, %v9750_v0, 0.0 }
 0x30b   : > { %v9696_v4 = vadd.f32 %v9695_v58, %v9694_v5  ;;  %v9616_v49 = vpop.f32.mrb[22].mxu0  ;;  %v9713_v58 = vsel %vm9675_vm11, %v13475_v39, 0.0 }
 0x30c   : > { %v9776_v14 = vsel %vm9675_vm11, %v9742_v44, 0.0  ;;  %v9697_v62 = vsel %vm9675_vm11, %v9616_v49, 0.0  ;;  %v9743_v29 = vmul.f32 %v9616_v49, %v9616_v49  ;;  %v10265_v59 = vpop.f32.mrb[23].mxu0  ;;  %v9752_v44 = vmul.f32 %v13481_v26, %v13481_v26 }
 0x30d   : > { %v9777_v23 = vadd.f32 %v9776_v14, %v9775_v61  ;;  %v9698_v48 = vadd.f32 %v9697_v62, %v9696_v4  ;;  %v9753_v14 = vmul.f32 %v13485_v28, %v13485_v28 }
 0x30e   : > { %v9778_v35 = vsel %vm9675_vm11, %v9743_v29, 0.0  ;;  %9827 = vxpose.xlu0.b32.cont [12/16] (narrow) %v9616_v49, 8  ;;  %v9796_v59 = vsel %vm9675_vm11, %v9752_v44, 0.0 }
 0x30f   : > { %v9779_v3 = vadd.f32 %v9778_v35, %v9777_v23 }
 0x33c   : > { %v13492_v54 = vpop.f32.mrb[16].mxu1 }
 0x33d   : > { %9854 = vxpose.xlu1.b32.cont [7/9] (short) (narrow) %v13492_v54, 8  ;;  %v10288_v31 = vpop.f32.mrb[17].mxu1  ;;  %v9754_v23 = vmul.f32 %v13492_v54, %v13492_v54 }
 0x33e   : > { %v13495_v6 = vpop.f32.mrb[18].mxu1 }
 0x33f   : > { %v10289_v11 = vpop.f32.mrb[19].mxu1  ;;  %v9755_v31 = vmul.f32 %v13495_v6, %v13495_v6 }
 0x341   : > { %9855 = vxpose.xlu1.b32.cont [8/9] (short) (narrow) %v13495_v6, 8 }
 0x34f   : > { %v9621_v51 = vpop.f32.mrb[24].mxu0 }
 0x350   : > { %v9699_v20 = vsel %vm9675_vm11, %v9621_v51, 0.0  ;;  %v9744_v32 = vmul.f32 %v9621_v51, %v9621_v51  ;;  %9828 = vxpose.xlu0.b32.cont [13/16] (narrow) %v9621_v51, 8  ;;  %v10268_v53 = vpop.f32.mrb[25].mxu0 }
 0x351   : > { %v9700_v9 = vadd.f32 %v9699_v20, %v9698_v48  ;;  %v9624_v55 = vpop.f32.mrb[26].mxu0  ;;  %v9800_v20 = vsel %vm9675_vm11, %v9754_v23, 0.0 }
 0x352   : > { %v9780_v33 = vsel %vm9675_vm11, %v9744_v32, 0.0  ;;  %v9701_v2 = vsel %vm9675_vm11, %v9624_v55, 0.0  ;;  %v9745_v41 = vmul.f32 %v9624_v55, %v9624_v55  ;;  %v10269_v17 = vpop.f32.mrb[27].mxu0 }
 0x353   : > { %v9781_v36 = vadd.f32 %v9780_v33, %v9779_v3  ;;  %v9702_v42 = vadd.f32 %v9701_v2, %v9700_v9  ;;  %v9798_v3 = vsel %vm9675_vm11, %v9753_v14, 0.0 }
 0x354   : > { %v9782_v10 = vsel %vm9675_vm11, %v9745_v41, 0.0  ;;  %9829 = vxpose.xlu0.b32.cont [14/16] (narrow) %v9624_v55, 8  ;;  %v9802_v55 = vsel %vm9675_vm11, %v9755_v31, 0.0 }
 0x355   : > { %v9704_v38 = vadd.f32 %v9703_v12, %v9702_v42  ;;  %v9783_v8 = vadd.f32 %v9782_v10, %v9781_v36 }
 0x357   : > { %v9706_v46 = vadd.f32 %v9705_v37, %v9704_v38  ;;  %v9785_v40 = vadd.f32 %v9784_v15, %v9783_v8 }
 0x358   : > { %9830 = vxpose.xlu0.b32.cont [15/16] (narrow) %v13452_v27, 8  ;;  %v9751_v27 = vmul.f32 %v13475_v39, %v13475_v39  ;;  %v9717_v39 = vsel %vm9675_vm11, %v13485_v28, 0.0  ;;  %v9721_v28 = vsel %vm9675_vm11, %v13495_v6, 0.0 }
 0x359   : > { %v9708_v63 = vadd.f32 %v9707_v16, %v9706_v46  ;;  %v9787_v21 = vadd.f32 %v9786_v1, %v9785_v40 }
 0x35a   : > { %v9794_v49 = vsel %vm9675_vm11, %v9751_v27, 0.0 }
 0x35b   : > { %v9710_v52 = vadd.f32 %v9709_v34, %v9708_v63  ;;  %v9789_v43 = vadd.f32 %v9788_v24, %v9787_v21 }
 0x35c   : > { %v9669_v5 = vpop.f32.mrb[20].mxu1  ;;  %9831 = vxpose.xlu0.b32.end [16/16] (narrow) %v13454_v45, 8  ;;  %v9715_v45 = vsel %vm9675_vm11, %v13481_v26, 0.0  ;;  %v9719_v26 = vsel %vm9675_vm11, %v13492_v54, 0.0 }
 0x35d   : > { %9856 = vxpose.xlu1.b32.end [9/9] (short) (narrow) %v9669_v5, 8  ;;  %v10292_v47 = vpop.f32.mrb[21].mxu1  ;;  %v9712_v61 = vadd.f32 %v9711_v57, %v9710_v52  ;;  %v9791_v56 = vadd.f32 %v9790_v13, %v9789_v43  ;;  %v9756_v32 = vmul.f32 %v9669_v5, %v9669_v5  ;;  %v9724_v60 = vsel %vm9723_vm12, %v9669_v5, 0.0 }
 0x35e   : > { %v9672_v30 = vpop.f32.mrb[22].mxu1 }
 0x35f   : > { %v10293_v50 = vpop.f32.mrb[23].mxu1  ;;  %v9793_v22 = vadd.f32 %v9792_v18, %v9791_v56  ;;  %v9714_v4 = vadd.f32 %v9713_v58, %v9712_v61  ;;  %v9804_v2 = vsel %vm9723_vm12, %v9756_v32, 0.0 }
 0x361   : > { %v9716_v62 = vadd.f32 %v9715_v45, %v9714_v4  ;;  %v9795_v29 = vadd.f32 %v9794_v49, %v9793_v22 }
 0x363   : > { %v9718_v48 = vadd.f32 %v9717_v39, %v9716_v62  ;;  %v9797_v35 = vadd.f32 %v9796_v59, %v9795_v29 }
 0x365   : > { %v9720_v11 = vadd.f32 %v9719_v26, %v9718_v48  ;;  %v9799_v51 = vadd.f32 %v9798_v3, %v9797_v35 }
 0x367   : > { %v9722_v53 = vadd.f32 %v9721_v28, %v9720_v11  ;;  %v9801_v9 = vadd.f32 %v9800_v20, %v9799_v51 }
 0x369   : > { %v9725_v33 = vadd.f32 %v9724_v60, %v9722_v53  ;;  %v9803_v54 = vadd.f32 %v9802_v55, %v9801_v9 }
 0x36b   : > { %v9726_v41 = vrot.slane %v9725_v33, 4  ;;  %v9805_v17 = vadd.f32 %v9804_v2, %v9803_v54 }
 0x36d   : > { %v9727_v36 = vadd.f32 %v9726_v41, %v9725_v33  ;;  %v9806_v42 = vrot.slane %v9805_v17, 4 }
 0x36f   : > { %v9728_v12 = vrot.slane %v9727_v36, 2  ;;  %v9807_v25 = vadd.f32 %v9806_v42, %v9805_v17 }
 0x371   : > { %v9729_v6 = vadd.f32 %v9728_v12, %v9727_v36  ;;  %v9808_v10 = vrot.slane %v9807_v25, 2 }
 0x373   : > { %v9730_v38 = vrot.slane %v9729_v6, 1  ;;  %v9809_v8 = vadd.f32 %v9808_v10, %v9807_v25 }
 0x375   : > { %v9810_v15 = vrot.slane %v9809_v8, 1  ;;  %v9731_v37 = vadd.f32 %v9730_v38, %v9729_v6 }
 0x377   : > { %v9811_v19 = vadd.f32 %v9810_v15, %v9809_v8 }
 0x379   : > { %v9813_v46 = vsel %vm9812_vm13, %v9731_v37, %v9811_v19 }
 0x37a   : > { %9815 = vst.msk [vmem:[%s174_s4] sm:$0x3] %vm9814_vm14, %v9813_v46 }
 0x37b   : > { %10578 = shalt.err (!%p10575_p3)
}
 0x37c   : > { %s10579_s24 = scalar_lea.hbm %s13562_s8, 32  ;;  %s10583_s27 = scalar_lea.hbm %s13640_s3, 64 }
 0x37d   : > { %p10580_p4 = scmp.ne.s32.totalorder %s13562_s8, %s10579_s24  ;;  %p10584_p9 = scmp.lt.u32.totalorder %s13562_s8, %s13640_s3 }
 0x37e   : > { %p10585_p10 = scmp.lt.u32.totalorder %s10583_s27, %s10579_s24  ;;  %p10587_p12 = scmp.lt.u32.totalorder %s10579_s24, %s13562_s8 }
 0x37f   : > { %p10581_p7 = pnand %p10580_p4, %p10732_p5 }
 0x380   : > { %p10586_p11 = por %p10585_p10, %p10584_p9 }
 0x381   : > { %p10582_p8 = pneg %p10581_p7 }
 0x382   : > { %p10588_p13 = por %p10587_p12, %p10586_p11 }
 0x384   : > { %p10589_p0 = pnand %p10588_p13, %p10582_p8 }
 0x386   : > { %10592 = shalt.err (!%p10589_p0)
}
 0x387   : > { %10305 = dma.vmem_to_hbm [thread:$0]  (%p10732_p5), %s13564_s5, 32, %s13562_s8, %s9893_s9   ;;  %vm9884_vm15 = vcmask 556036  }
 0x388   : > { %s10015_s30 = sshll.u32 %s13555_s28, 3  ;;  %s10213_s4 = sshll.u32 %s10715_s16, 7  ;;  %vm9885_vm0 = vmor %vm9884_vm15, %vm9535_vm5 }
 0x389   : > { %s167_s6 = scalar_lea.vmem [#allocation2], %s10015_s30  ;;  %s13594_s19 = scalar_lea.hbm %s13639_s2, %s10213_s4 }
 0x38a   : > { %s9907_s7 = sshll.u32 %s167_s6, 4  ;;  %s9888_s5 = scalar_lea.sflag [#allocation3], %s13555_s28  ;;  %s13596_s7 = int_to_ptr.vmem [resolvable:$true] %s9907_s7 }
 0x38b   : > { %s10593_s8 = scalar_lea.vmem %s13596_s7, 128  ;;  %s10673_s16 = smov [#allocation2]  }
 0x38c   : > { %p10594_p1 = scmp.ne.s32.totalorder %s13596_s7, %s10593_s8  ;;  %s10597_s9 = sshll.u32 %s10673_s16, 4  ;;  %s10598_s9 = int_to_ptr.vmem [resolvable:$false] %s10597_s9 }
 0x38d   : > { %s10599_s20 = scalar_lea.vmem %s10598_s9, 256  ;;  %p10600_p4 = scmp.lt.s32.totalorder %s13596_s7, %s10598_s9 }
 0x38e   : > { %p10595_p2 = pnand %p10594_p1, %p10732_p5  ;;  %p10601_p7 = scmp.lt.s32.totalorder %s10599_s20, %s10593_s8 }
 0x390   : > { %p10596_p3 = pneg %p10595_p2  ;;  %p10602_p8 = por %p10601_p7, %p10600_p4 }
 0x392   : > { %p10603_p9 = pnand %p10602_p8, %p10596_p3 }
 0x3a0   : > { %v9832_v40 = vpop.trf.xlu0 }
 0x3bd   : > { %v9864_v1 = vpop.trf.xlu1 }
 0x3be   : > { %v9882_v16 = vcombine.low %v9832_v40, %v9864_v1 }
 0x3c0   : > { %9886 = vst.msk [vmem:[%s167_s6] sm:$0xff] %vm9885_vm0, %v9882_v16 }
 0x3c1   : > { %10606 = shalt.err (!%p10603_p9)
}
 0x3c2   : > { %s10607_s28 = scalar_lea.hbm %s13594_s19, 128  ;;  %s10611_s26 = scalar_lea.hbm %s13639_s2, 256 }
 0x3c3   : > { %p10608_p10 = scmp.ne.s32.totalorder %s13594_s19, %s10607_s28  ;;  %p10612_p13 = scmp.lt.u32.totalorder %s13594_s19, %s13639_s2 }
 0x3c4   : > { %p10613_p0 = scmp.lt.u32.totalorder %s10611_s26, %s10607_s28  ;;  %p10615_p2 = scmp.lt.u32.totalorder %s10607_s28, %s13594_s19 }
 0x3c5   : > { %p10609_p11 = pnand %p10608_p10, %p10732_p5 }
 0x3c6   : > { %p10614_p1 = por %p10613_p0, %p10612_p13 }
 0x3c7   : > { %p10610_p12 = pneg %p10609_p11 }
 0x3c8   : > { %p10616_p3 = por %p10615_p2, %p10614_p1 }
 0x3ca   : > { %p10617_p4 = pnand %p10616_p3, %p10610_p12 }
 0x3cc   : > { %10620 = shalt.err (!%p10617_p4)
}
 0x3cd   : > { %10304 = dma.vmem_to_hbm [thread:$0]  (%p10732_p5), %s13596_s7, 128, %s13594_s19, %s9888_s5  }
 0x3ce PF: > { %p10315_p7 = scmp.ge.s32.totalorder %s10659_s15, 2  ;;  %s9932_s29 = sand.u32 1, %s10647_s12  }
 0x3cf   : > { %s9933_s30 = scalar_lea.sflag [#allocation3], %s9932_s29 }
 0x3d0   : > { %p10309_p8 = pnand %p10315_p7, %p10736_p6 }
 0x3d2   : > { %10638 = dma.done.wait (!%p10309_p8), %s9933_s30, 128  }
 0x3d3   : > { %10640 = vsyncadd (!%p10309_p8), %s9933_s30, 4294967168  ;;  %s9942_s4 = scalar_lea.sflag [#allocation5], %s9932_s29 }
 0x3d4   : > { %10642 = dma.done.wait (!%p10309_p8), %s9942_s4, 32  }
 0x3d5   : > { %10644 = vsyncadd (!%p10309_p8), %s9942_s4, 4294967264  ;;  %p17_p5 = scmp.ge.s32.totalorder %s10719_s18, 4   ;;  %s13687_s12 = smov %s10651_s13 }
 0x3d6   : > { %s13688_s13 = smov %s10655_s14  ;;  %s13689_s14 = smov %s10730_s21 }
 0x3d7   : > { %s13690_s15 = smov %s10719_s18  ;;  %19 = sbr.rel (!%p17_p5) target bundleno = 5 (0x5), region = 82 }
 0x3de   :  { %9947 = vsyncpa [#allocation3], 1 }
 0x3df   :  { %9949 = vsyncpa [#allocation3 + $0x1], 1 }
 0x3e0   :  { %9950 = vsyncpa [#allocation5], 1 }
 0x3e1   :  { %9952 = vsyncpa [#allocation5 + $0x1], 1 }

</bundles_post_ra>
